<compile_context>
chip_gen: v7x
topology: tpu7x:2x2x1
jax: 0.10.0
libtpu: 0.0.40
codegen_flags: <defaults>
</compile_context>

<pallas_src>
from functools import partial

import numpy as np
import jax
import jax.numpy as jnp
from jax import lax
from jax.experimental import pallas as pl
from jax.experimental.pallas import tpu as pltpu

_EPS = 1e-5
_INV_SQRT2 = 0.7071067811865476
_SQRT_2_OVER_PI = 0.7978845608028654


def _round_up(x, m):
    return ((x + m - 1) // m) * m


# ---------------------------------------------------------------------------
# small math helpers (shared by the Pallas kernel and the pure-JAX reference)
# ---------------------------------------------------------------------------
def _gelu(x, approx):
    if approx:
        # tanh approximation -> EUP tanh (separate VLIW slot), per perf review.
        return 0.5 * x * (1.0 + jnp.tanh(_SQRT_2_OVER_PI * (x + 0.044715 * x * x * x)))
    return 0.5 * x * (1.0 + lax.erf(x * _INV_SQRT2))       # exact nn.GELU default


def _act(x, name, approx):
    return jnp.maximum(x, 0.0) if name == "relu" else _gelu(x, approx)


def _ln(x, g, b):
    """Standard LayerNorm (reference path, unpadded channels)."""
    m = jnp.mean(x, axis=-1, keepdims=True)
    v = jnp.mean(jnp.square(x - m), axis=-1, keepdims=True)
    return (x - m) * lax.rsqrt(v + _EPS) * g + b


def _ln_padded(x, g, b, count):
    """LayerNorm over a zero-padded last axis, normalized with the true `count`.

    Padded lanes of x are exactly 0 (invariant maintained by zero-padded weights
    / biases / gamma / beta), so sum(x) and sum(x*x) are unaffected by padding;
    E[x^2]-m^2 avoids needing a lane mask for the variance.  Padded gamma=beta=0
    keeps padded output lanes exactly 0.
    """
    inv = 1.0 / count
    m = jnp.sum(x, axis=-1, keepdims=True) * inv
    ex2 = jnp.sum(x * x, axis=-1, keepdims=True) * inv
    v = jnp.maximum(ex2 - m * m, 0.0)
    return (x - m) * lax.rsqrt(v + _EPS) * g + b


# ---------------------------------------------------------------------------
# fused NanoConv Pallas kernel
# ---------------------------------------------------------------------------
def nano_conv(x, params, *, kernel_size, dilations, activation="gelu",
              batch_block=None, use_bf16=True, approx_gelu=True):
    """x: (B, L, d_model) float32. Returns (B, L, d_model) float32."""
    B, L, d_model = x.shape
    n_layers = len(dilations)
    k = kernel_size
    d_h = params["w1"].shape[-1]

    assert L % 8 == 0, "L must be a multiple of 8 (sublane-aligned merge of (B,L)->rows)"

    if batch_block is None:
        # >=2 grid steps so both v7x TensorCores get work (no effect on v5e/v6e).
        batch_block = B // 2 if (B >= 2 and B % 2 == 0) else B
    assert B % batch_block == 0, "batch must be divisible by batch_block"
    grid = (B // batch_block,)
    rows = batch_block * L
    assert rows % 8 == 0

    dm_pad = _round_up(d_model, 128)        # lane-dense activations & stores
    dh_pad = _round_up(d_h, 128)
    cdt = jnp.bfloat16 if use_bf16 else jnp.float32
    f32 = jnp.float32

    # ---- weight prep: pad feature dims to 128 lanes with zeros (keeps padded
    #      lanes of every intermediate exactly 0); matmul weights in bf16.
    def pad_last(a, to):
        return jnp.pad(a.astype(f32), ((0, 0), (0, 0), (0, to - a.shape[-1])))

    def pad_last2(a, to_r, to_c):
        pads = [(0, 0)] * (a.ndim - 2) + [(0, to_r - a.shape[-2]),
                                          (0, to_c - a.shape[-1])]
        return jnp.pad(a, pads)

    ln1_g = pad_last(params["ln1_g"], dm_pad)
    ln1_b = pad_last(params["ln1_b"], dm_pad)
    w1 = pad_last2(params["w1"], dm_pad, dh_pad).astype(cdt)
    b1 = pad_last(params["b1"], dh_pad)
    ln2_g = pad_last(params["ln2_g"], dh_pad)
    ln2_b = pad_last(params["ln2_b"], dh_pad)
    # (n_layers, k*d_h, d_h) -> per-tap split (n_layers, k, d_h, d_h), then pad
    wconv = params["wconv"].reshape(n_layers, k, d_h, d_h)
    wconv = pad_last2(wconv, dh_pad, dh_pad).astype(cdt)
    bconv = pad_last(params["bconv"], dh_pad)
    ln3_g = pad_last(params["ln3_g"], dh_pad)
    ln3_b = pad_last(params["ln3_b"], dh_pad)
    w2 = pad_last2(params["w2"], dh_pad, dm_pad).astype(cdt)
    b2 = pad_last(params["b2"], dm_pad)

    weight_args = [ln1_g, ln1_b, w1, b1, ln2_g, ln2_b, wconv, bconv,
                   ln3_g, ln3_b, w2, b2]

    def kernel(x_ref, ln1g, ln1b, w1_r, b1_r, ln2g, ln2b, wc_r, bc_r,
               ln3g, ln3b, w2_r, b2_r, o_ref):
        # whole batch chunk as one (rows, C) slab; L % 8 == 0 so the merge/split
        # reshapes are layout no-ops.
        x_in = x_ref[...].reshape(rows, d_model)
        if dm_pad != d_model:
            x2 = jnp.concatenate(
                [x_in, jnp.zeros((rows, dm_pad - d_model), x_in.dtype)], axis=-1)
        else:
            x2 = x_in

        # row position inside its batch element + hoisted per-shift edge masks
        # (shared across layers with equal dilation; also guards cross-batch
        #  leakage of the roll over the merged (batch*L) axis).
        t_idx = lax.broadcasted_iota(jnp.int32, (rows, 1), 0) % L
        shift_mask = {}
        for dil in sorted(set(dilations)):
            pad = dil * (k - 1) // 2
            for j in range(k):
                s = j * dil - pad
                if s != 0 and s not in shift_mask:
                    src = t_idx + s
                    shift_mask[s] = jnp.logical_and(src >= 0, src < L)

        for l in range(n_layers):               # layers unrolled, weights resident
            dil = dilations[l]
            pad = dil * (k - 1) // 2

            h = _act(_ln_padded(x2, ln1g[l], ln1b[l], d_model), activation, approx_gelu)
            h = jnp.dot(h.astype(cdt), w1_r[l],
                        preferred_element_type=jnp.float32) + b1_r[l]
            h = _act(_ln_padded(h, ln2g[l], ln2b[l], d_h), activation, approx_gelu)

            # dilated zero-padded MaskedConv1d: k per-tap MXU matmuls accumulated
            # in f32 (no lane-dim concat / relayout); taps via roll (XLU) + mask.
            y = None
            for j in range(k):
                s = j * dil - pad               # static tap shift
                if s == 0:
                    tap = h
                else:
                    shifted = pltpu.roll(h, (-s) % rows, 0)
                    tap = jnp.where(shift_mask[s], shifted, jnp.zeros_like(shifted))
                d = jnp.dot(tap.astype(cdt), wc_r[l, j],
                            preferred_element_type=jnp.float32)
                y = d if y is None else y + d
            y = y + bc_r[l]

            h = _act(_ln_padded(y, ln3g[l], ln3b[l], d_h), activation, approx_gelu)
            h = jnp.dot(h.astype(cdt), w2_r[l],
                        preferred_element_type=jnp.float32) + b2_r[l]
            x2 = x2 + h                         # residual

        o_ref[...] = x2.reshape(batch_block, L, dm_pad)   # lane-dense store

    # weights never change block index -> single-buffer them (no useless 2x VMEM)
    def _const_spec(a):
        zmap = lambda i, n=a.ndim: (0,) * n
        if hasattr(pl, "Buffered"):
            try:
                return pl.BlockSpec(a.shape, zmap, pipeline_mode=pl.Buffered(1))
            except TypeError:
                pass
        return pl.BlockSpec(a.shape, zmap)

    in_specs = [pl.BlockSpec((batch_block, L, d_model), lambda i: (i, 0, 0))]
    in_specs += [_const_spec(a) for a in weight_args]

    # generation-aware scoped-VMEM raise (defaults are 16 MiB v5e / 32 MiB v6e,v7x)
    def _nbytes(a):
        return int(np.prod(a.shape)) * a.dtype.itemsize

    est = (2 * sum(_nbytes(a) for a in weight_args)                 # weights (worst case 2x)
           + 2 * batch_block * L * (d_model + dm_pad) * 4           # in/out double buffers
           + rows * (4 * dm_pad + 8 * dh_pad) * 4)                  # live temporaries bound
    try:
        cap = int(pltpu.get_tpu_info().vmem_capacity_bytes)
    except Exception:
        cap = 128 * 1024 * 1024
    vmem_limit = int(min(max(2 * est, 32 * 1024 * 1024), int(0.8 * cap)))

    out = pl.pallas_call(
        kernel,
        grid=grid,
        in_specs=in_specs,
        out_specs=pl.BlockSpec((batch_block, L, dm_pad), lambda i: (i, 0, 0)),
        out_shape=jax.ShapeDtypeStruct((B, L, dm_pad), jnp.float32),
        compiler_params=pltpu.CompilerParams(
            dimension_semantics=("parallel",),
            vmem_limit_bytes=vmem_limit),
    )(x, *weight_args)
    return out[..., :d_model]


# ---------------------------------------------------------------------------
# pure-JAX reference (independent padding-based conv, unpadded channels)
# ---------------------------------------------------------------------------
def nano_conv_ref(x, params, *, kernel_size, dilations, activation="gelu",
                  use_bf16=True, approx_gelu=True):
    cdt = jnp.bfloat16 if use_bf16 else jnp.float32
    k = kernel_size
    B, L, _ = x.shape
    d_h = params["w1"].shape[-1]

    def mm(a, w):
        return jnp.dot(a.astype(cdt), w.astype(cdt),
                       preferred_element_type=jnp.float32)

    for l, dil in enumerate(dilations):
        pad = dil * (k - 1) // 2
        h = _act(_ln(x, params["ln1_g"][l], params["ln1_b"][l]), activation, approx_gelu)
        h = mm(h, params["w1"][l]) + params["b1"][l]
        h = _act(_ln(h, params["ln2_g"][l], params["ln2_b"][l]), activation, approx_gelu)
        hp = jnp.pad(h, ((0, 0), (pad, pad), (0, 0)))
        y = jnp.zeros((B, L, d_h), jnp.float32) + params["bconv"][l]
        for j in range(k):
            y = y + mm(hp[:, j * dil:j * dil + L, :],
                       params["wconv"][l, j * d_h:(j + 1) * d_h, :])
        h = _act(_ln(y, params["ln3_g"][l], params["ln3_b"][l]), activation, approx_gelu)
        h = mm(h, params["w2"][l]) + params["b2"][l]
        x = x + h
    return x


# ---------------------------------------------------------------------------
# deterministic synthetic parameters (per-layer weights stacked on axis 0)
# ---------------------------------------------------------------------------
def init_nano_conv_params(key, *, d_model, n_layers, kernel_size, slim=True):
    d_h = d_model // 2 if slim else d_model
    k = kernel_size
    keys = jax.random.split(key, 6)

    def nrm(kk, shape):
        return 0.05 * jax.random.normal(kk, shape, dtype=jnp.float32)

    return dict(
        ln1_g=jnp.ones((n_layers, 1, d_model), jnp.float32),
        ln1_b=jnp.zeros((n_layers, 1, d_model), jnp.float32),
        w1=nrm(keys[0], (n_layers, d_model, d_h)),
        b1=nrm(keys[1], (n_layers, 1, d_h)),
        ln2_g=jnp.ones((n_layers, 1, d_h), jnp.float32),
        ln2_b=jnp.zeros((n_layers, 1, d_h), jnp.float32),
        # wconv[l] = torch_conv_weight.permute(2, 1, 0).reshape(k*d_h, d_h)
        wconv=nrm(keys[2], (n_layers, k * d_h, d_h)),
        bconv=nrm(keys[3], (n_layers, 1, d_h)),
        ln3_g=jnp.ones((n_layers, 1, d_h), jnp.float32),
        ln3_b=jnp.zeros((n_layers, 1, d_h), jnp.float32),
        w2=nrm(keys[4], (n_layers, d_h, d_model)),
        b2=nrm(keys[5], (n_layers, 1, d_model)),
    )


# ---------------------------------------------------------------------------
if __name__ == "__main__":
    # NanoConv(d_model=64, n_layers=4, kernel_size=3, r=4, slim=True, activation='gelu')
    B, L = 2, 16
    d_model, n_layers, kernel_size, r = 64, 4, 3, 4
    log2 = int(np.log2(r)) + 1
    dilations = tuple(2 ** (n % log2) for n in range(n_layers))   # (1, 2, 4, 1)

    key = jax.random.PRNGKey(0)
    kp, kx = jax.random.split(key)
    params = init_nano_conv_params(kp, d_model=d_model, n_layers=n_layers,
                                   kernel_size=kernel_size, slim=True)
    s = jax.random.normal(kx, (B, L, d_model), dtype=jnp.float32)

    fwd = jax.jit(partial(nano_conv, kernel_size=kernel_size,
                          dilations=dilations, activation="gelu",
                          use_bf16=True, approx_gelu=True))
    out = fwd(s, params)
    jax.block_until_ready(out)

    assert out.shape == (B, L, d_model), out.shape
    assert out.dtype == jnp.float32

    ref = nano_conv_ref(s, params, kernel_size=kernel_size,
                        dilations=dilations, activation="gelu",
                        use_bf16=True, approx_gelu=True)
    err = float(jnp.max(jnp.abs(out - ref)))
    assert err < 5e-3, f"max abs err vs JAX reference: {err}"
    print("KERNEL_OK")
</pallas_src>

<mosaic_0001>
module attributes {stable_mosaic.version = 11 : i64} {
  func.func @kernel(%arg0: i32, %arg1: memref<1x16x64xf32, #tpu.memory_space<vmem>>, %arg2: memref<4x1x128xf32, #tpu.memory_space<vmem>>, %arg3: memref<4x1x128xf32, #tpu.memory_space<vmem>>, %arg4: memref<4x128x128xbf16, #tpu.memory_space<vmem>>, %arg5: memref<4x1x128xf32, #tpu.memory_space<vmem>>, %arg6: memref<4x1x128xf32, #tpu.memory_space<vmem>>, %arg7: memref<4x1x128xf32, #tpu.memory_space<vmem>>, %arg8: memref<4x3x128x128xbf16, #tpu.memory_space<vmem>>, %arg9: memref<4x1x128xf32, #tpu.memory_space<vmem>>, %arg10: memref<4x1x128xf32, #tpu.memory_space<vmem>>, %arg11: memref<4x1x128xf32, #tpu.memory_space<vmem>>, %arg12: memref<4x128x128xbf16, #tpu.memory_space<vmem>>, %arg13: memref<4x1x128xf32, #tpu.memory_space<vmem>>, %arg14: memref<1x16x128xf32, #tpu.memory_space<vmem>>) attributes {dimension_semantics = [#tpu.dimension_semantics<parallel>], iteration_bounds = array<i64: 2>, scalar_prefetch = 0 : i64, scratch_operands = 0 : i64, tpu.core_type = #tpu.core_type<tc>, window_params = [{transform_indices = @transform_0, window_bounds = array<i64: 1, 16, 64>}, {pipeline_mode = #tpu.pipeline_mode<synchronous>, transform_indices = @transform_1, window_bounds = array<i64: 4, 1, 128>}, {pipeline_mode = #tpu.pipeline_mode<synchronous>, transform_indices = @transform_2, window_bounds = array<i64: 4, 1, 128>}, {pipeline_mode = #tpu.pipeline_mode<synchronous>, transform_indices = @transform_3, window_bounds = array<i64: 4, 128, 128>}, {pipeline_mode = #tpu.pipeline_mode<synchronous>, transform_indices = @transform_4, window_bounds = array<i64: 4, 1, 128>}, {pipeline_mode = #tpu.pipeline_mode<synchronous>, transform_indices = @transform_5, window_bounds = array<i64: 4, 1, 128>}, {pipeline_mode = #tpu.pipeline_mode<synchronous>, transform_indices = @transform_6, window_bounds = array<i64: 4, 1, 128>}, {pipeline_mode = #tpu.pipeline_mode<synchronous>, transform_indices = @transform_7, window_bounds = array<i64: 4, 3, 128, 128>}, {pipeline_mode = #tpu.pipeline_mode<synchronous>, transform_indices = @transform_8, window_bounds = array<i64: 4, 1, 128>}, {pipeline_mode = #tpu.pipeline_mode<synchronous>, transform_indices = @transform_9, window_bounds = array<i64: 4, 1, 128>}, {pipeline_mode = #tpu.pipeline_mode<synchronous>, transform_indices = @transform_10, window_bounds = array<i64: 4, 1, 128>}, {pipeline_mode = #tpu.pipeline_mode<synchronous>, transform_indices = @transform_11, window_bounds = array<i64: 4, 128, 128>}, {pipeline_mode = #tpu.pipeline_mode<synchronous>, transform_indices = @transform_12, window_bounds = array<i64: 4, 1, 128>}, {transform_indices = @transform_13, window_bounds = array<i64: 1, 16, 128>}]} {
    %c0 = arith.constant 0 : index
    %c0_0 = arith.constant 0 : index
    %c0_1 = arith.constant 0 : index
    %0 = vector.load %arg1[%c0, %c0_0, %c0_1] : memref<1x16x64xf32, #tpu.memory_space<vmem>>, vector<1x16x64xf32>
    %1 = vector.shape_cast %0 : vector<1x16x64xf32> to vector<16x64xf32>
    %cst = arith.constant 0.000000e+00 : f32
    %2 = vector.broadcast %cst : f32 to vector<16x64xf32>
    %3 = tpu.concatenate %1, %2 in 1 : vector<16x64xf32>, vector<16x64xf32> -> vector<16x128xf32>
    %4 = tpu.iota {dimensions = array<i32: 0>} : vector<16x1xi32>
    %c16_i32 = arith.constant 16 : i32
    %c0_i32 = arith.constant 0 : i32
    %5 = arith.cmpi eq, %c16_i32, %c0_i32 : i32
    %c1_i32 = arith.constant 1 : i32
    %6 = arith.select %5, %c1_i32, %c16_i32 : i32
    %7 = vector.broadcast %6 : i32 to vector<16x1xi32>
    %8 = arith.remsi %4, %7 : vector<16x1xi32>
    %c0_i32_2 = arith.constant 0 : i32
    %9 = vector.broadcast %c0_i32_2 : i32 to vector<16x1xi32>
    %10 = arith.cmpi ne, %8, %9 : vector<16x1xi32>
    %c0_i32_3 = arith.constant 0 : i32
    %11 = vector.broadcast %c0_i32_3 : i32 to vector<16x1xi32>
    %12 = arith.cmpi slt, %8, %11 : vector<16x1xi32>
    %c0_i32_4 = arith.constant 0 : i32
    %13 = arith.cmpi slt, %6, %c0_i32_4 : i32
    %14 = vector.broadcast %13 : i1 to vector<16x1xi1>
    %15 = vector.broadcast %14 : vector<16x1xi1> to vector<16x1xi1>
    %16 = arith.xori %12, %15 : vector<16x1xi1>
    %17 = arith.andi %16, %10 : vector<16x1xi1>
    %18 = vector.broadcast %6 : i32 to vector<16x1xi32>
    %19 = arith.addi %8, %18 : vector<16x1xi32>
    %20 = arith.select %17, %19, %8 : vector<16x1xi1>, vector<16x1xi32>
    %c-1_i32 = arith.constant -1 : i32
    %21 = vector.broadcast %c-1_i32 : i32 to vector<16x1xi32>
    %22 = arith.addi %20, %21 : vector<16x1xi32>
    %c0_i32_5 = arith.constant 0 : i32
    %23 = vector.broadcast %c0_i32_5 : i32 to vector<16x1xi32>
    %24 = arith.cmpi sge, %22, %23 : vector<16x1xi32>
    %c16_i32_6 = arith.constant 16 : i32
    %25 = vector.broadcast %c16_i32_6 : i32 to vector<16x1xi32>
    %26 = arith.cmpi slt, %22, %25 : vector<16x1xi32>
    %27 = arith.andi %24, %26 : vector<16x1xi1>
    %c1_i32_7 = arith.constant 1 : i32
    %28 = vector.broadcast %c1_i32_7 : i32 to vector<16x1xi32>
    %29 = arith.addi %20, %28 : vector<16x1xi32>
    %c0_i32_8 = arith.constant 0 : i32
    %30 = vector.broadcast %c0_i32_8 : i32 to vector<16x1xi32>
    %31 = arith.cmpi sge, %29, %30 : vector<16x1xi32>
    %c16_i32_9 = arith.constant 16 : i32
    %32 = vector.broadcast %c16_i32_9 : i32 to vector<16x1xi32>
    %33 = arith.cmpi slt, %29, %32 : vector<16x1xi32>
    %34 = arith.andi %31, %33 : vector<16x1xi1>
    %c-2_i32 = arith.constant -2 : i32
    %35 = vector.broadcast %c-2_i32 : i32 to vector<16x1xi32>
    %36 = arith.addi %20, %35 : vector<16x1xi32>
    %c0_i32_10 = arith.constant 0 : i32
    %37 = vector.broadcast %c0_i32_10 : i32 to vector<16x1xi32>
    %38 = arith.cmpi sge, %36, %37 : vector<16x1xi32>
    %c16_i32_11 = arith.constant 16 : i32
    %39 = vector.broadcast %c16_i32_11 : i32 to vector<16x1xi32>
    %40 = arith.cmpi slt, %36, %39 : vector<16x1xi32>
    %41 = arith.andi %38, %40 : vector<16x1xi1>
    %c2_i32 = arith.constant 2 : i32
    %42 = vector.broadcast %c2_i32 : i32 to vector<16x1xi32>
    %43 = arith.addi %20, %42 : vector<16x1xi32>
    %c0_i32_12 = arith.constant 0 : i32
    %44 = vector.broadcast %c0_i32_12 : i32 to vector<16x1xi32>
    %45 = arith.cmpi sge, %43, %44 : vector<16x1xi32>
    %c16_i32_13 = arith.constant 16 : i32
    %46 = vector.broadcast %c16_i32_13 : i32 to vector<16x1xi32>
    %47 = arith.cmpi slt, %43, %46 : vector<16x1xi32>
    %48 = arith.andi %45, %47 : vector<16x1xi1>
    %c-4_i32 = arith.constant -4 : i32
    %49 = vector.broadcast %c-4_i32 : i32 to vector<16x1xi32>
    %50 = arith.addi %20, %49 : vector<16x1xi32>
    %c0_i32_14 = arith.constant 0 : i32
    %51 = vector.broadcast %c0_i32_14 : i32 to vector<16x1xi32>
    %52 = arith.cmpi sge, %50, %51 : vector<16x1xi32>
    %c16_i32_15 = arith.constant 16 : i32
    %53 = vector.broadcast %c16_i32_15 : i32 to vector<16x1xi32>
    %54 = arith.cmpi slt, %50, %53 : vector<16x1xi32>
    %55 = arith.andi %52, %54 : vector<16x1xi1>
    %c4_i32 = arith.constant 4 : i32
    %56 = vector.broadcast %c4_i32 : i32 to vector<16x1xi32>
    %57 = arith.addi %20, %56 : vector<16x1xi32>
    %c0_i32_16 = arith.constant 0 : i32
    %58 = vector.broadcast %c0_i32_16 : i32 to vector<16x1xi32>
    %59 = arith.cmpi sge, %57, %58 : vector<16x1xi32>
    %c16_i32_17 = arith.constant 16 : i32
    %60 = vector.broadcast %c16_i32_17 : i32 to vector<16x1xi32>
    %61 = arith.cmpi slt, %57, %60 : vector<16x1xi32>
    %62 = arith.andi %59, %61 : vector<16x1xi1>
    %c0_18 = arith.constant 0 : index
    %c0_19 = arith.constant 0 : index
    %c0_20 = arith.constant 0 : index
    %63 = vector.load %arg2[%c0_18, %c0_19, %c0_20] : memref<4x1x128xf32, #tpu.memory_space<vmem>>, vector<1x1x128xf32>
    %64 = vector.shape_cast %63 : vector<1x1x128xf32> to vector<1x128xf32>
    %c0_21 = arith.constant 0 : index
    %c0_22 = arith.constant 0 : index
    %c0_23 = arith.constant 0 : index
    %65 = vector.load %arg3[%c0_21, %c0_22, %c0_23] : memref<4x1x128xf32, #tpu.memory_space<vmem>>, vector<1x1x128xf32>
    %66 = vector.shape_cast %65 : vector<1x1x128xf32> to vector<1x128xf32>
    %cst_24 = arith.constant dense<0.000000e+00> : vector<16xf32>
    %67 = vector.multi_reduction <add>, %3, %cst_24 [1] : vector<16x128xf32> to vector<16xf32>
    %68 = vector.shape_cast %67 : vector<16xf32> to vector<16x1xf32>
    %cst_25 = arith.constant 1.562500e-02 : f32
    %69 = vector.broadcast %cst_25 : f32 to vector<16x1xf32>
    %70 = arith.mulf %68, %69 : vector<16x1xf32>
    %71 = arith.mulf %3, %3 : vector<16x128xf32>
    %cst_26 = arith.constant dense<0.000000e+00> : vector<16xf32>
    %72 = vector.multi_reduction <add>, %71, %cst_26 [1] : vector<16x128xf32> to vector<16xf32>
    %73 = vector.shape_cast %72 : vector<16xf32> to vector<16x1xf32>
    %cst_27 = arith.constant 1.562500e-02 : f32
    %74 = vector.broadcast %cst_27 : f32 to vector<16x1xf32>
    %75 = arith.mulf %73, %74 : vector<16x1xf32>
    %76 = arith.mulf %70, %70 : vector<16x1xf32>
    %77 = arith.subf %75, %76 : vector<16x1xf32>
    %cst_28 = arith.constant 0.000000e+00 : f32
    %78 = vector.broadcast %cst_28 : f32 to vector<16x1xf32>
    %79 = arith.maximumf %77, %78 : vector<16x1xf32>
    %80 = vector.broadcast %70 : vector<16x1xf32> to vector<16x128xf32>
    %81 = arith.subf %3, %80 : vector<16x128xf32>
    %cst_29 = arith.constant 9.99999974E-6 : f32
    %82 = vector.broadcast %cst_29 : f32 to vector<16x1xf32>
    %83 = arith.addf %79, %82 : vector<16x1xf32>
    %84 = math.rsqrt %83 : vector<16x1xf32>
    %85 = vector.broadcast %84 : vector<16x1xf32> to vector<16x128xf32>
    %86 = arith.mulf %81, %85 : vector<16x128xf32>
    %87 = vector.broadcast %64 : vector<1x128xf32> to vector<16x128xf32>
    %88 = arith.mulf %86, %87 : vector<16x128xf32>
    %89 = vector.broadcast %66 : vector<1x128xf32> to vector<16x128xf32>
    %90 = arith.addf %88, %89 : vector<16x128xf32>
    %cst_30 = arith.constant 5.000000e-01 : f32
    %91 = vector.broadcast %cst_30 : f32 to vector<16x128xf32>
    %92 = arith.mulf %91, %90 : vector<16x128xf32>
    %cst_31 = arith.constant 4.471500e-02 : f32
    %93 = vector.broadcast %cst_31 : f32 to vector<16x128xf32>
    %94 = arith.mulf %93, %90 : vector<16x128xf32>
    %95 = arith.mulf %94, %90 : vector<16x128xf32>
    %96 = arith.mulf %95, %90 : vector<16x128xf32>
    %97 = arith.addf %90, %96 : vector<16x128xf32>
    %cst_32 = arith.constant 0.797884583 : f32
    %98 = vector.broadcast %cst_32 : f32 to vector<16x128xf32>
    %99 = arith.mulf %98, %97 : vector<16x128xf32>
    %100 = math.tanh %99 : vector<16x128xf32>
    %cst_33 = arith.constant 1.000000e+00 : f32
    %101 = vector.broadcast %cst_33 : f32 to vector<16x128xf32>
    %102 = arith.addf %101, %100 : vector<16x128xf32>
    %103 = arith.mulf %92, %102 : vector<16x128xf32>
    %104 = arith.truncf %103 : vector<16x128xf32> to vector<16x128xbf16>
    %c0_34 = arith.constant 0 : index
    %c0_35 = arith.constant 0 : index
    %c0_36 = arith.constant 0 : index
    %105 = vector.load %arg4[%c0_34, %c0_35, %c0_36] : memref<4x128x128xbf16, #tpu.memory_space<vmem>>, vector<1x128x128xbf16>
    %106 = vector.shape_cast %105 : vector<1x128x128xbf16> to vector<128x128xbf16>
    %cst_37 = arith.constant dense<0.000000e+00> : vector<16x128xf32>
    %107 = tpu.matmul %104, %106, %cst_37 {dimension_numbers = #tpu.dot_dimension_numbers<[1], [0], [0], [1], [0, 0, 1, 1], [], []>} : vector<16x128xbf16>, vector<128x128xbf16>, vector<16x128xf32> -> vector<16x128xf32>
    %c0_38 = arith.constant 0 : index
    %c0_39 = arith.constant 0 : index
    %c0_40 = arith.constant 0 : index
    %108 = vector.load %arg5[%c0_38, %c0_39, %c0_40] : memref<4x1x128xf32, #tpu.memory_space<vmem>>, vector<1x1x128xf32>
    %109 = vector.shape_cast %108 : vector<1x1x128xf32> to vector<1x128xf32>
    %110 = vector.broadcast %109 : vector<1x128xf32> to vector<16x128xf32>
    %111 = arith.addf %107, %110 : vector<16x128xf32>
    %c0_41 = arith.constant 0 : index
    %c0_42 = arith.constant 0 : index
    %c0_43 = arith.constant 0 : index
    %112 = vector.load %arg6[%c0_41, %c0_42, %c0_43] : memref<4x1x128xf32, #tpu.memory_space<vmem>>, vector<1x1x128xf32>
    %113 = vector.shape_cast %112 : vector<1x1x128xf32> to vector<1x128xf32>
    %c0_44 = arith.constant 0 : index
    %c0_45 = arith.constant 0 : index
    %c0_46 = arith.constant 0 : index
    %114 = vector.load %arg7[%c0_44, %c0_45, %c0_46] : memref<4x1x128xf32, #tpu.memory_space<vmem>>, vector<1x1x128xf32>
    %115 = vector.shape_cast %114 : vector<1x1x128xf32> to vector<1x128xf32>
    %cst_47 = arith.constant dense<0.000000e+00> : vector<16xf32>
    %116 = vector.multi_reduction <add>, %111, %cst_47 [1] : vector<16x128xf32> to vector<16xf32>
    %117 = vector.shape_cast %116 : vector<16xf32> to vector<16x1xf32>
    %cst_48 = arith.constant 3.125000e-02 : f32
    %118 = vector.broadcast %cst_48 : f32 to vector<16x1xf32>
    %119 = arith.mulf %117, %118 : vector<16x1xf32>
    %120 = arith.mulf %111, %111 : vector<16x128xf32>
    %cst_49 = arith.constant dense<0.000000e+00> : vector<16xf32>
    %121 = vector.multi_reduction <add>, %120, %cst_49 [1] : vector<16x128xf32> to vector<16xf32>
    %122 = vector.shape_cast %121 : vector<16xf32> to vector<16x1xf32>
    %cst_50 = arith.constant 3.125000e-02 : f32
    %123 = vector.broadcast %cst_50 : f32 to vector<16x1xf32>
    %124 = arith.mulf %122, %123 : vector<16x1xf32>
    %125 = arith.mulf %119, %119 : vector<16x1xf32>
    %126 = arith.subf %124, %125 : vector<16x1xf32>
    %cst_51 = arith.constant 0.000000e+00 : f32
    %127 = vector.broadcast %cst_51 : f32 to vector<16x1xf32>
    %128 = arith.maximumf %126, %127 : vector<16x1xf32>
    %129 = vector.broadcast %119 : vector<16x1xf32> to vector<16x128xf32>
    %130 = arith.subf %111, %129 : vector<16x128xf32>
    %cst_52 = arith.constant 9.99999974E-6 : f32
    %131 = vector.broadcast %cst_52 : f32 to vector<16x1xf32>
    %132 = arith.addf %128, %131 : vector<16x1xf32>
    %133 = math.rsqrt %132 : vector<16x1xf32>
    %134 = vector.broadcast %133 : vector<16x1xf32> to vector<16x128xf32>
    %135 = arith.mulf %130, %134 : vector<16x128xf32>
    %136 = vector.broadcast %113 : vector<1x128xf32> to vector<16x128xf32>
    %137 = arith.mulf %135, %136 : vector<16x128xf32>
    %138 = vector.broadcast %115 : vector<1x128xf32> to vector<16x128xf32>
    %139 = arith.addf %137, %138 : vector<16x128xf32>
    %cst_53 = arith.constant 5.000000e-01 : f32
    %140 = vector.broadcast %cst_53 : f32 to vector<16x128xf32>
    %141 = arith.mulf %140, %139 : vector<16x128xf32>
    %cst_54 = arith.constant 4.471500e-02 : f32
    %142 = vector.broadcast %cst_54 : f32 to vector<16x128xf32>
    %143 = arith.mulf %142, %139 : vector<16x128xf32>
    %144 = arith.mulf %143, %139 : vector<16x128xf32>
    %145 = arith.mulf %144, %139 : vector<16x128xf32>
    %146 = arith.addf %139, %145 : vector<16x128xf32>
    %cst_55 = arith.constant 0.797884583 : f32
    %147 = vector.broadcast %cst_55 : f32 to vector<16x128xf32>
    %148 = arith.mulf %147, %146 : vector<16x128xf32>
    %149 = math.tanh %148 : vector<16x128xf32>
    %cst_56 = arith.constant 1.000000e+00 : f32
    %150 = vector.broadcast %cst_56 : f32 to vector<16x128xf32>
    %151 = arith.addf %150, %149 : vector<16x128xf32>
    %152 = arith.mulf %141, %151 : vector<16x128xf32>
    %c1_i32_57 = arith.constant 1 : i32
    %153 = tpu.dynamic_rotate %152 by %c1_i32_57 dim 0 : vector<16x128xf32>, i32 -> vector<16x128xf32>
    %cst_58 = arith.constant 0.000000e+00 : f32
    %154 = vector.broadcast %cst_58 : f32 to vector<16x128xf32>
    %155 = vector.shape_cast %27 : vector<16x1xi1> to vector<16x1xi1>
    %156 = vector.broadcast %155 : vector<16x1xi1> to vector<16x128xi1>
    %157 = arith.select %156, %153, %154 : vector<16x128xi1>, vector<16x128xf32>
    %158 = arith.truncf %157 : vector<16x128xf32> to vector<16x128xbf16>
    %c0_59 = arith.constant 0 : index
    %c0_60 = arith.constant 0 : index
    %c0_61 = arith.constant 0 : index
    %c0_62 = arith.constant 0 : index
    %159 = vector.load %arg8[%c0_59, %c0_60, %c0_61, %c0_62] : memref<4x3x128x128xbf16, #tpu.memory_space<vmem>>, vector<1x1x128x128xbf16>
    %160 = vector.shape_cast %159 : vector<1x1x128x128xbf16> to vector<128x128xbf16>
    %cst_63 = arith.constant dense<0.000000e+00> : vector<16x128xf32>
    %161 = tpu.matmul %158, %160, %cst_63 {dimension_numbers = #tpu.dot_dimension_numbers<[1], [0], [0], [1], [0, 0, 1, 1], [], []>} : vector<16x128xbf16>, vector<128x128xbf16>, vector<16x128xf32> -> vector<16x128xf32>
    %162 = arith.truncf %152 : vector<16x128xf32> to vector<16x128xbf16>
    %c0_64 = arith.constant 0 : index
    %c1 = arith.constant 1 : index
    %c0_65 = arith.constant 0 : index
    %c0_66 = arith.constant 0 : index
    %163 = vector.load %arg8[%c0_64, %c1, %c0_65, %c0_66] : memref<4x3x128x128xbf16, #tpu.memory_space<vmem>>, vector<1x1x128x128xbf16>
    %164 = vector.shape_cast %163 : vector<1x1x128x128xbf16> to vector<128x128xbf16>
    %cst_67 = arith.constant dense<0.000000e+00> : vector<16x128xf32>
    %165 = tpu.matmul %162, %164, %cst_67 {dimension_numbers = #tpu.dot_dimension_numbers<[1], [0], [0], [1], [0, 0, 1, 1], [], []>} : vector<16x128xbf16>, vector<128x128xbf16>, vector<16x128xf32> -> vector<16x128xf32>
    %166 = arith.addf %161, %165 : vector<16x128xf32>
    %c15_i32 = arith.constant 15 : i32
    %167 = tpu.dynamic_rotate %152 by %c15_i32 dim 0 : vector<16x128xf32>, i32 -> vector<16x128xf32>
    %cst_68 = arith.constant 0.000000e+00 : f32
    %168 = vector.broadcast %cst_68 : f32 to vector<16x128xf32>
    %169 = vector.shape_cast %34 : vector<16x1xi1> to vector<16x1xi1>
    %170 = vector.broadcast %169 : vector<16x1xi1> to vector<16x128xi1>
    %171 = arith.select %170, %167, %168 : vector<16x128xi1>, vector<16x128xf32>
    %172 = arith.truncf %171 : vector<16x128xf32> to vector<16x128xbf16>
    %c0_69 = arith.constant 0 : index
    %c2 = arith.constant 2 : index
    %c0_70 = arith.constant 0 : index
    %c0_71 = arith.constant 0 : index
    %173 = vector.load %arg8[%c0_69, %c2, %c0_70, %c0_71] : memref<4x3x128x128xbf16, #tpu.memory_space<vmem>>, vector<1x1x128x128xbf16>
    %174 = vector.shape_cast %173 : vector<1x1x128x128xbf16> to vector<128x128xbf16>
    %cst_72 = arith.constant dense<0.000000e+00> : vector<16x128xf32>
    %175 = tpu.matmul %172, %174, %cst_72 {dimension_numbers = #tpu.dot_dimension_numbers<[1], [0], [0], [1], [0, 0, 1, 1], [], []>} : vector<16x128xbf16>, vector<128x128xbf16>, vector<16x128xf32> -> vector<16x128xf32>
    %176 = arith.addf %166, %175 : vector<16x128xf32>
    %c0_73 = arith.constant 0 : index
    %c0_74 = arith.constant 0 : index
    %c0_75 = arith.constant 0 : index
    %177 = vector.load %arg9[%c0_73, %c0_74, %c0_75] : memref<4x1x128xf32, #tpu.memory_space<vmem>>, vector<1x1x128xf32>
    %178 = vector.shape_cast %177 : vector<1x1x128xf32> to vector<1x128xf32>
    %179 = vector.broadcast %178 : vector<1x128xf32> to vector<16x128xf32>
    %180 = arith.addf %176, %179 : vector<16x128xf32>
    %c0_76 = arith.constant 0 : index
    %c0_77 = arith.constant 0 : index
    %c0_78 = arith.constant 0 : index
    %181 = vector.load %arg10[%c0_76, %c0_77, %c0_78] : memref<4x1x128xf32, #tpu.memory_space<vmem>>, vector<1x1x128xf32>
    %182 = vector.shape_cast %181 : vector<1x1x128xf32> to vector<1x128xf32>
    %c0_79 = arith.constant 0 : index
    %c0_80 = arith.constant 0 : index
    %c0_81 = arith.constant 0 : index
    %183 = vector.load %arg11[%c0_79, %c0_80, %c0_81] : memref<4x1x128xf32, #tpu.memory_space<vmem>>, vector<1x1x128xf32>
    %184 = vector.shape_cast %183 : vector<1x1x128xf32> to vector<1x128xf32>
    %cst_82 = arith.constant dense<0.000000e+00> : vector<16xf32>
    %185 = vector.multi_reduction <add>, %180, %cst_82 [1] : vector<16x128xf32> to vector<16xf32>
    %186 = vector.shape_cast %185 : vector<16xf32> to vector<16x1xf32>
    %cst_83 = arith.constant 3.125000e-02 : f32
    %187 = vector.broadcast %cst_83 : f32 to vector<16x1xf32>
    %188 = arith.mulf %186, %187 : vector<16x1xf32>
    %189 = arith.mulf %180, %180 : vector<16x128xf32>
    %cst_84 = arith.constant dense<0.000000e+00> : vector<16xf32>
    %190 = vector.multi_reduction <add>, %189, %cst_84 [1] : vector<16x128xf32> to vector<16xf32>
    %191 = vector.shape_cast %190 : vector<16xf32> to vector<16x1xf32>
    %cst_85 = arith.constant 3.125000e-02 : f32
    %192 = vector.broadcast %cst_85 : f32 to vector<16x1xf32>
    %193 = arith.mulf %191, %192 : vector<16x1xf32>
    %194 = arith.mulf %188, %188 : vector<16x1xf32>
    %195 = arith.subf %193, %194 : vector<16x1xf32>
    %cst_86 = arith.constant 0.000000e+00 : f32
    %196 = vector.broadcast %cst_86 : f32 to vector<16x1xf32>
    %197 = arith.maximumf %195, %196 : vector<16x1xf32>
    %198 = vector.broadcast %188 : vector<16x1xf32> to vector<16x128xf32>
    %199 = arith.subf %180, %198 : vector<16x128xf32>
    %cst_87 = arith.constant 9.99999974E-6 : f32
    %200 = vector.broadcast %cst_87 : f32 to vector<16x1xf32>
    %201 = arith.addf %197, %200 : vector<16x1xf32>
    %202 = math.rsqrt %201 : vector<16x1xf32>
    %203 = vector.broadcast %202 : vector<16x1xf32> to vector<16x128xf32>
    %204 = arith.mulf %199, %203 : vector<16x128xf32>
    %205 = vector.broadcast %182 : vector<1x128xf32> to vector<16x128xf32>
    %206 = arith.mulf %204, %205 : vector<16x128xf32>
    %207 = vector.broadcast %184 : vector<1x128xf32> to vector<16x128xf32>
    %208 = arith.addf %206, %207 : vector<16x128xf32>
    %cst_88 = arith.constant 5.000000e-01 : f32
    %209 = vector.broadcast %cst_88 : f32 to vector<16x128xf32>
    %210 = arith.mulf %209, %208 : vector<16x128xf32>
    %cst_89 = arith.constant 4.471500e-02 : f32
    %211 = vector.broadcast %cst_89 : f32 to vector<16x128xf32>
    %212 = arith.mulf %211, %208 : vector<16x128xf32>
    %213 = arith.mulf %212, %208 : vector<16x128xf32>
    %214 = arith.mulf %213, %208 : vector<16x128xf32>
    %215 = arith.addf %208, %214 : vector<16x128xf32>
    %cst_90 = arith.constant 0.797884583 : f32
    %216 = vector.broadcast %cst_90 : f32 to vector<16x128xf32>
    %217 = arith.mulf %216, %215 : vector<16x128xf32>
    %218 = math.tanh %217 : vector<16x128xf32>
    %cst_91 = arith.constant 1.000000e+00 : f32
    %219 = vector.broadcast %cst_91 : f32 to vector<16x128xf32>
    %220 = arith.addf %219, %218 : vector<16x128xf32>
    %221 = arith.mulf %210, %220 : vector<16x128xf32>
    %222 = arith.truncf %221 : vector<16x128xf32> to vector<16x128xbf16>
    %c0_92 = arith.constant 0 : index
    %c0_93 = arith.constant 0 : index
    %c0_94 = arith.constant 0 : index
    %223 = vector.load %arg12[%c0_92, %c0_93, %c0_94] : memref<4x128x128xbf16, #tpu.memory_space<vmem>>, vector<1x128x128xbf16>
    %224 = vector.shape_cast %223 : vector<1x128x128xbf16> to vector<128x128xbf16>
    %cst_95 = arith.constant dense<0.000000e+00> : vector<16x128xf32>
    %225 = tpu.matmul %222, %224, %cst_95 {dimension_numbers = #tpu.dot_dimension_numbers<[1], [0], [0], [1], [0, 0, 1, 1], [], []>} : vector<16x128xbf16>, vector<128x128xbf16>, vector<16x128xf32> -> vector<16x128xf32>
    %c0_96 = arith.constant 0 : index
    %c0_97 = arith.constant 0 : index
    %c0_98 = arith.constant 0 : index
    %226 = vector.load %arg13[%c0_96, %c0_97, %c0_98] : memref<4x1x128xf32, #tpu.memory_space<vmem>>, vector<1x1x128xf32>
    %227 = vector.shape_cast %226 : vector<1x1x128xf32> to vector<1x128xf32>
    %228 = vector.broadcast %227 : vector<1x128xf32> to vector<16x128xf32>
    %229 = arith.addf %225, %228 : vector<16x128xf32>
    %230 = arith.addf %3, %229 : vector<16x128xf32>
    %c1_99 = arith.constant 1 : index
    %c0_100 = arith.constant 0 : index
    %c0_101 = arith.constant 0 : index
    %231 = vector.load %arg2[%c1_99, %c0_100, %c0_101] : memref<4x1x128xf32, #tpu.memory_space<vmem>>, vector<1x1x128xf32>
    %232 = vector.shape_cast %231 : vector<1x1x128xf32> to vector<1x128xf32>
    %c1_102 = arith.constant 1 : index
    %c0_103 = arith.constant 0 : index
    %c0_104 = arith.constant 0 : index
    %233 = vector.load %arg3[%c1_102, %c0_103, %c0_104] : memref<4x1x128xf32, #tpu.memory_space<vmem>>, vector<1x1x128xf32>
    %234 = vector.shape_cast %233 : vector<1x1x128xf32> to vector<1x128xf32>
    %cst_105 = arith.constant dense<0.000000e+00> : vector<16xf32>
    %235 = vector.multi_reduction <add>, %230, %cst_105 [1] : vector<16x128xf32> to vector<16xf32>
    %236 = vector.shape_cast %235 : vector<16xf32> to vector<16x1xf32>
    %cst_106 = arith.constant 1.562500e-02 : f32
    %237 = vector.broadcast %cst_106 : f32 to vector<16x1xf32>
    %238 = arith.mulf %236, %237 : vector<16x1xf32>
    %239 = arith.mulf %230, %230 : vector<16x128xf32>
    %cst_107 = arith.constant dense<0.000000e+00> : vector<16xf32>
    %240 = vector.multi_reduction <add>, %239, %cst_107 [1] : vector<16x128xf32> to vector<16xf32>
    %241 = vector.shape_cast %240 : vector<16xf32> to vector<16x1xf32>
    %cst_108 = arith.constant 1.562500e-02 : f32
    %242 = vector.broadcast %cst_108 : f32 to vector<16x1xf32>
    %243 = arith.mulf %241, %242 : vector<16x1xf32>
    %244 = arith.mulf %238, %238 : vector<16x1xf32>
    %245 = arith.subf %243, %244 : vector<16x1xf32>
    %cst_109 = arith.constant 0.000000e+00 : f32
    %246 = vector.broadcast %cst_109 : f32 to vector<16x1xf32>
    %247 = arith.maximumf %245, %246 : vector<16x1xf32>
    %248 = vector.broadcast %238 : vector<16x1xf32> to vector<16x128xf32>
    %249 = arith.subf %230, %248 : vector<16x128xf32>
    %cst_110 = arith.constant 9.99999974E-6 : f32
    %250 = vector.broadcast %cst_110 : f32 to vector<16x1xf32>
    %251 = arith.addf %247, %250 : vector<16x1xf32>
    %252 = math.rsqrt %251 : vector<16x1xf32>
    %253 = vector.broadcast %252 : vector<16x1xf32> to vector<16x128xf32>
    %254 = arith.mulf %249, %253 : vector<16x128xf32>
    %255 = vector.broadcast %232 : vector<1x128xf32> to vector<16x128xf32>
    %256 = arith.mulf %254, %255 : vector<16x128xf32>
    %257 = vector.broadcast %234 : vector<1x128xf32> to vector<16x128xf32>
    %258 = arith.addf %256, %257 : vector<16x128xf32>
    %cst_111 = arith.constant 5.000000e-01 : f32
    %259 = vector.broadcast %cst_111 : f32 to vector<16x128xf32>
    %260 = arith.mulf %259, %258 : vector<16x128xf32>
    %cst_112 = arith.constant 4.471500e-02 : f32
    %261 = vector.broadcast %cst_112 : f32 to vector<16x128xf32>
    %262 = arith.mulf %261, %258 : vector<16x128xf32>
    %263 = arith.mulf %262, %258 : vector<16x128xf32>
    %264 = arith.mulf %263, %258 : vector<16x128xf32>
    %265 = arith.addf %258, %264 : vector<16x128xf32>
    %cst_113 = arith.constant 0.797884583 : f32
    %266 = vector.broadcast %cst_113 : f32 to vector<16x128xf32>
    %267 = arith.mulf %266, %265 : vector<16x128xf32>
    %268 = math.tanh %267 : vector<16x128xf32>
    %cst_114 = arith.constant 1.000000e+00 : f32
    %269 = vector.broadcast %cst_114 : f32 to vector<16x128xf32>
    %270 = arith.addf %269, %268 : vector<16x128xf32>
    %271 = arith.mulf %260, %270 : vector<16x128xf32>
    %272 = arith.truncf %271 : vector<16x128xf32> to vector<16x128xbf16>
    %c1_115 = arith.constant 1 : index
    %c0_116 = arith.constant 0 : index
    %c0_117 = arith.constant 0 : index
    %273 = vector.load %arg4[%c1_115, %c0_116, %c0_117] : memref<4x128x128xbf16, #tpu.memory_space<vmem>>, vector<1x128x128xbf16>
    %274 = vector.shape_cast %273 : vector<1x128x128xbf16> to vector<128x128xbf16>
    %cst_118 = arith.constant dense<0.000000e+00> : vector<16x128xf32>
    %275 = tpu.matmul %272, %274, %cst_118 {dimension_numbers = #tpu.dot_dimension_numbers<[1], [0], [0], [1], [0, 0, 1, 1], [], []>} : vector<16x128xbf16>, vector<128x128xbf16>, vector<16x128xf32> -> vector<16x128xf32>
    %c1_119 = arith.constant 1 : index
    %c0_120 = arith.constant 0 : index
    %c0_121 = arith.constant 0 : index
    %276 = vector.load %arg5[%c1_119, %c0_120, %c0_121] : memref<4x1x128xf32, #tpu.memory_space<vmem>>, vector<1x1x128xf32>
    %277 = vector.shape_cast %276 : vector<1x1x128xf32> to vector<1x128xf32>
    %278 = vector.broadcast %277 : vector<1x128xf32> to vector<16x128xf32>
    %279 = arith.addf %275, %278 : vector<16x128xf32>
    %c1_122 = arith.constant 1 : index
    %c0_123 = arith.constant 0 : index
    %c0_124 = arith.constant 0 : index
    %280 = vector.load %arg6[%c1_122, %c0_123, %c0_124] : memref<4x1x128xf32, #tpu.memory_space<vmem>>, vector<1x1x128xf32>
    %281 = vector.shape_cast %280 : vector<1x1x128xf32> to vector<1x128xf32>
    %c1_125 = arith.constant 1 : index
    %c0_126 = arith.constant 0 : index
    %c0_127 = arith.constant 0 : index
    %282 = vector.load %arg7[%c1_125, %c0_126, %c0_127] : memref<4x1x128xf32, #tpu.memory_space<vmem>>, vector<1x1x128xf32>
    %283 = vector.shape_cast %282 : vector<1x1x128xf32> to vector<1x128xf32>
    %cst_128 = arith.constant dense<0.000000e+00> : vector<16xf32>
    %284 = vector.multi_reduction <add>, %279, %cst_128 [1] : vector<16x128xf32> to vector<16xf32>
    %285 = vector.shape_cast %284 : vector<16xf32> to vector<16x1xf32>
    %cst_129 = arith.constant 3.125000e-02 : f32
    %286 = vector.broadcast %cst_129 : f32 to vector<16x1xf32>
    %287 = arith.mulf %285, %286 : vector<16x1xf32>
    %288 = arith.mulf %279, %279 : vector<16x128xf32>
    %cst_130 = arith.constant dense<0.000000e+00> : vector<16xf32>
    %289 = vector.multi_reduction <add>, %288, %cst_130 [1] : vector<16x128xf32> to vector<16xf32>
    %290 = vector.shape_cast %289 : vector<16xf32> to vector<16x1xf32>
    %cst_131 = arith.constant 3.125000e-02 : f32
    %291 = vector.broadcast %cst_131 : f32 to vector<16x1xf32>
    %292 = arith.mulf %290, %291 : vector<16x1xf32>
    %293 = arith.mulf %287, %287 : vector<16x1xf32>
    %294 = arith.subf %292, %293 : vector<16x1xf32>
    %cst_132 = arith.constant 0.000000e+00 : f32
    %295 = vector.broadcast %cst_132 : f32 to vector<16x1xf32>
    %296 = arith.maximumf %294, %295 : vector<16x1xf32>
    %297 = vector.broadcast %287 : vector<16x1xf32> to vector<16x128xf32>
    %298 = arith.subf %279, %297 : vector<16x128xf32>
    %cst_133 = arith.constant 9.99999974E-6 : f32
    %299 = vector.broadcast %cst_133 : f32 to vector<16x1xf32>
    %300 = arith.addf %296, %299 : vector<16x1xf32>
    %301 = math.rsqrt %300 : vector<16x1xf32>
    %302 = vector.broadcast %301 : vector<16x1xf32> to vector<16x128xf32>
    %303 = arith.mulf %298, %302 : vector<16x128xf32>
    %304 = vector.broadcast %281 : vector<1x128xf32> to vector<16x128xf32>
    %305 = arith.mulf %303, %304 : vector<16x128xf32>
    %306 = vector.broadcast %283 : vector<1x128xf32> to vector<16x128xf32>
    %307 = arith.addf %305, %306 : vector<16x128xf32>
    %cst_134 = arith.constant 5.000000e-01 : f32
    %308 = vector.broadcast %cst_134 : f32 to vector<16x128xf32>
    %309 = arith.mulf %308, %307 : vector<16x128xf32>
    %cst_135 = arith.constant 4.471500e-02 : f32
    %310 = vector.broadcast %cst_135 : f32 to vector<16x128xf32>
    %311 = arith.mulf %310, %307 : vector<16x128xf32>
    %312 = arith.mulf %311, %307 : vector<16x128xf32>
    %313 = arith.mulf %312, %307 : vector<16x128xf32>
    %314 = arith.addf %307, %313 : vector<16x128xf32>
    %cst_136 = arith.constant 0.797884583 : f32
    %315 = vector.broadcast %cst_136 : f32 to vector<16x128xf32>
    %316 = arith.mulf %315, %314 : vector<16x128xf32>
    %317 = math.tanh %316 : vector<16x128xf32>
    %cst_137 = arith.constant 1.000000e+00 : f32
    %318 = vector.broadcast %cst_137 : f32 to vector<16x128xf32>
    %319 = arith.addf %318, %317 : vector<16x128xf32>
    %320 = arith.mulf %309, %319 : vector<16x128xf32>
    %c2_i32_138 = arith.constant 2 : i32
    %321 = tpu.dynamic_rotate %320 by %c2_i32_138 dim 0 : vector<16x128xf32>, i32 -> vector<16x128xf32>
    %cst_139 = arith.constant 0.000000e+00 : f32
    %322 = vector.broadcast %cst_139 : f32 to vector<16x128xf32>
    %323 = vector.shape_cast %41 : vector<16x1xi1> to vector<16x1xi1>
    %324 = vector.broadcast %323 : vector<16x1xi1> to vector<16x128xi1>
    %325 = arith.select %324, %321, %322 : vector<16x128xi1>, vector<16x128xf32>
    %326 = arith.truncf %325 : vector<16x128xf32> to vector<16x128xbf16>
    %c1_140 = arith.constant 1 : index
    %c0_141 = arith.constant 0 : index
    %c0_142 = arith.constant 0 : index
    %c0_143 = arith.constant 0 : index
    %327 = vector.load %arg8[%c1_140, %c0_141, %c0_142, %c0_143] : memref<4x3x128x128xbf16, #tpu.memory_space<vmem>>, vector<1x1x128x128xbf16>
    %328 = vector.shape_cast %327 : vector<1x1x128x128xbf16> to vector<128x128xbf16>
    %cst_144 = arith.constant dense<0.000000e+00> : vector<16x128xf32>
    %329 = tpu.matmul %326, %328, %cst_144 {dimension_numbers = #tpu.dot_dimension_numbers<[1], [0], [0], [1], [0, 0, 1, 1], [], []>} : vector<16x128xbf16>, vector<128x128xbf16>, vector<16x128xf32> -> vector<16x128xf32>
    %330 = arith.truncf %320 : vector<16x128xf32> to vector<16x128xbf16>
    %c1_145 = arith.constant 1 : index
    %c1_146 = arith.constant 1 : index
    %c0_147 = arith.constant 0 : index
    %c0_148 = arith.constant 0 : index
    %331 = vector.load %arg8[%c1_145, %c1_146, %c0_147, %c0_148] : memref<4x3x128x128xbf16, #tpu.memory_space<vmem>>, vector<1x1x128x128xbf16>
    %332 = vector.shape_cast %331 : vector<1x1x128x128xbf16> to vector<128x128xbf16>
    %cst_149 = arith.constant dense<0.000000e+00> : vector<16x128xf32>
    %333 = tpu.matmul %330, %332, %cst_149 {dimension_numbers = #tpu.dot_dimension_numbers<[1], [0], [0], [1], [0, 0, 1, 1], [], []>} : vector<16x128xbf16>, vector<128x128xbf16>, vector<16x128xf32> -> vector<16x128xf32>
    %334 = arith.addf %329, %333 : vector<16x128xf32>
    %c14_i32 = arith.constant 14 : i32
    %335 = tpu.dynamic_rotate %320 by %c14_i32 dim 0 : vector<16x128xf32>, i32 -> vector<16x128xf32>
    %cst_150 = arith.constant 0.000000e+00 : f32
    %336 = vector.broadcast %cst_150 : f32 to vector<16x128xf32>
    %337 = vector.shape_cast %48 : vector<16x1xi1> to vector<16x1xi1>
    %338 = vector.broadcast %337 : vector<16x1xi1> to vector<16x128xi1>
    %339 = arith.select %338, %335, %336 : vector<16x128xi1>, vector<16x128xf32>
    %340 = arith.truncf %339 : vector<16x128xf32> to vector<16x128xbf16>
    %c1_151 = arith.constant 1 : index
    %c2_152 = arith.constant 2 : index
    %c0_153 = arith.constant 0 : index
    %c0_154 = arith.constant 0 : index
    %341 = vector.load %arg8[%c1_151, %c2_152, %c0_153, %c0_154] : memref<4x3x128x128xbf16, #tpu.memory_space<vmem>>, vector<1x1x128x128xbf16>
    %342 = vector.shape_cast %341 : vector<1x1x128x128xbf16> to vector<128x128xbf16>
    %cst_155 = arith.constant dense<0.000000e+00> : vector<16x128xf32>
    %343 = tpu.matmul %340, %342, %cst_155 {dimension_numbers = #tpu.dot_dimension_numbers<[1], [0], [0], [1], [0, 0, 1, 1], [], []>} : vector<16x128xbf16>, vector<128x128xbf16>, vector<16x128xf32> -> vector<16x128xf32>
    %344 = arith.addf %334, %343 : vector<16x128xf32>
    %c1_156 = arith.constant 1 : index
    %c0_157 = arith.constant 0 : index
    %c0_158 = arith.constant 0 : index
    %345 = vector.load %arg9[%c1_156, %c0_157, %c0_158] : memref<4x1x128xf32, #tpu.memory_space<vmem>>, vector<1x1x128xf32>
    %346 = vector.shape_cast %345 : vector<1x1x128xf32> to vector<1x128xf32>
    %347 = vector.broadcast %346 : vector<1x128xf32> to vector<16x128xf32>
    %348 = arith.addf %344, %347 : vector<16x128xf32>
    %c1_159 = arith.constant 1 : index
    %c0_160 = arith.constant 0 : index
    %c0_161 = arith.constant 0 : index
    %349 = vector.load %arg10[%c1_159, %c0_160, %c0_161] : memref<4x1x128xf32, #tpu.memory_space<vmem>>, vector<1x1x128xf32>
    %350 = vector.shape_cast %349 : vector<1x1x128xf32> to vector<1x128xf32>
    %c1_162 = arith.constant 1 : index
    %c0_163 = arith.constant 0 : index
    %c0_164 = arith.constant 0 : index
    %351 = vector.load %arg11[%c1_162, %c0_163, %c0_164] : memref<4x1x128xf32, #tpu.memory_space<vmem>>, vector<1x1x128xf32>
    %352 = vector.shape_cast %351 : vector<1x1x128xf32> to vector<1x128xf32>
    %cst_165 = arith.constant dense<0.000000e+00> : vector<16xf32>
    %353 = vector.multi_reduction <add>, %348, %cst_165 [1] : vector<16x128xf32> to vector<16xf32>
    %354 = vector.shape_cast %353 : vector<16xf32> to vector<16x1xf32>
    %cst_166 = arith.constant 3.125000e-02 : f32
    %355 = vector.broadcast %cst_166 : f32 to vector<16x1xf32>
    %356 = arith.mulf %354, %355 : vector<16x1xf32>
    %357 = arith.mulf %348, %348 : vector<16x128xf32>
    %cst_167 = arith.constant dense<0.000000e+00> : vector<16xf32>
    %358 = vector.multi_reduction <add>, %357, %cst_167 [1] : vector<16x128xf32> to vector<16xf32>
    %359 = vector.shape_cast %358 : vector<16xf32> to vector<16x1xf32>
    %cst_168 = arith.constant 3.125000e-02 : f32
    %360 = vector.broadcast %cst_168 : f32 to vector<16x1xf32>
    %361 = arith.mulf %359, %360 : vector<16x1xf32>
    %362 = arith.mulf %356, %356 : vector<16x1xf32>
    %363 = arith.subf %361, %362 : vector<16x1xf32>
    %cst_169 = arith.constant 0.000000e+00 : f32
    %364 = vector.broadcast %cst_169 : f32 to vector<16x1xf32>
    %365 = arith.maximumf %363, %364 : vector<16x1xf32>
    %366 = vector.broadcast %356 : vector<16x1xf32> to vector<16x128xf32>
    %367 = arith.subf %348, %366 : vector<16x128xf32>
    %cst_170 = arith.constant 9.99999974E-6 : f32
    %368 = vector.broadcast %cst_170 : f32 to vector<16x1xf32>
    %369 = arith.addf %365, %368 : vector<16x1xf32>
    %370 = math.rsqrt %369 : vector<16x1xf32>
    %371 = vector.broadcast %370 : vector<16x1xf32> to vector<16x128xf32>
    %372 = arith.mulf %367, %371 : vector<16x128xf32>
    %373 = vector.broadcast %350 : vector<1x128xf32> to vector<16x128xf32>
    %374 = arith.mulf %372, %373 : vector<16x128xf32>
    %375 = vector.broadcast %352 : vector<1x128xf32> to vector<16x128xf32>
    %376 = arith.addf %374, %375 : vector<16x128xf32>
    %cst_171 = arith.constant 5.000000e-01 : f32
    %377 = vector.broadcast %cst_171 : f32 to vector<16x128xf32>
    %378 = arith.mulf %377, %376 : vector<16x128xf32>
    %cst_172 = arith.constant 4.471500e-02 : f32
    %379 = vector.broadcast %cst_172 : f32 to vector<16x128xf32>
    %380 = arith.mulf %379, %376 : vector<16x128xf32>
    %381 = arith.mulf %380, %376 : vector<16x128xf32>
    %382 = arith.mulf %381, %376 : vector<16x128xf32>
    %383 = arith.addf %376, %382 : vector<16x128xf32>
    %cst_173 = arith.constant 0.797884583 : f32
    %384 = vector.broadcast %cst_173 : f32 to vector<16x128xf32>
    %385 = arith.mulf %384, %383 : vector<16x128xf32>
    %386 = math.tanh %385 : vector<16x128xf32>
    %cst_174 = arith.constant 1.000000e+00 : f32
    %387 = vector.broadcast %cst_174 : f32 to vector<16x128xf32>
    %388 = arith.addf %387, %386 : vector<16x128xf32>
    %389 = arith.mulf %378, %388 : vector<16x128xf32>
    %390 = arith.truncf %389 : vector<16x128xf32> to vector<16x128xbf16>
    %c1_175 = arith.constant 1 : index
    %c0_176 = arith.constant 0 : index
    %c0_177 = arith.constant 0 : index
    %391 = vector.load %arg12[%c1_175, %c0_176, %c0_177] : memref<4x128x128xbf16, #tpu.memory_space<vmem>>, vector<1x128x128xbf16>
    %392 = vector.shape_cast %391 : vector<1x128x128xbf16> to vector<128x128xbf16>
    %cst_178 = arith.constant dense<0.000000e+00> : vector<16x128xf32>
    %393 = tpu.matmul %390, %392, %cst_178 {dimension_numbers = #tpu.dot_dimension_numbers<[1], [0], [0], [1], [0, 0, 1, 1], [], []>} : vector<16x128xbf16>, vector<128x128xbf16>, vector<16x128xf32> -> vector<16x128xf32>
    %c1_179 = arith.constant 1 : index
    %c0_180 = arith.constant 0 : index
    %c0_181 = arith.constant 0 : index
    %394 = vector.load %arg13[%c1_179, %c0_180, %c0_181] : memref<4x1x128xf32, #tpu.memory_space<vmem>>, vector<1x1x128xf32>
    %395 = vector.shape_cast %394 : vector<1x1x128xf32> to vector<1x128xf32>
    %396 = vector.broadcast %395 : vector<1x128xf32> to vector<16x128xf32>
    %397 = arith.addf %393, %396 : vector<16x128xf32>
    %398 = arith.addf %230, %397 : vector<16x128xf32>
    %c2_182 = arith.constant 2 : index
    %c0_183 = arith.constant 0 : index
    %c0_184 = arith.constant 0 : index
    %399 = vector.load %arg2[%c2_182, %c0_183, %c0_184] : memref<4x1x128xf32, #tpu.memory_space<vmem>>, vector<1x1x128xf32>
    %400 = vector.shape_cast %399 : vector<1x1x128xf32> to vector<1x128xf32>
    %c2_185 = arith.constant 2 : index
    %c0_186 = arith.constant 0 : index
    %c0_187 = arith.constant 0 : index
    %401 = vector.load %arg3[%c2_185, %c0_186, %c0_187] : memref<4x1x128xf32, #tpu.memory_space<vmem>>, vector<1x1x128xf32>
    %402 = vector.shape_cast %401 : vector<1x1x128xf32> to vector<1x128xf32>
    %cst_188 = arith.constant dense<0.000000e+00> : vector<16xf32>
    %403 = vector.multi_reduction <add>, %398, %cst_188 [1] : vector<16x128xf32> to vector<16xf32>
    %404 = vector.shape_cast %403 : vector<16xf32> to vector<16x1xf32>
    %cst_189 = arith.constant 1.562500e-02 : f32
    %405 = vector.broadcast %cst_189 : f32 to vector<16x1xf32>
    %406 = arith.mulf %404, %405 : vector<16x1xf32>
    %407 = arith.mulf %398, %398 : vector<16x128xf32>
    %cst_190 = arith.constant dense<0.000000e+00> : vector<16xf32>
    %408 = vector.multi_reduction <add>, %407, %cst_190 [1] : vector<16x128xf32> to vector<16xf32>
    %409 = vector.shape_cast %408 : vector<16xf32> to vector<16x1xf32>
    %cst_191 = arith.constant 1.562500e-02 : f32
    %410 = vector.broadcast %cst_191 : f32 to vector<16x1xf32>
    %411 = arith.mulf %409, %410 : vector<16x1xf32>
    %412 = arith.mulf %406, %406 : vector<16x1xf32>
    %413 = arith.subf %411, %412 : vector<16x1xf32>
    %cst_192 = arith.constant 0.000000e+00 : f32
    %414 = vector.broadcast %cst_192 : f32 to vector<16x1xf32>
    %415 = arith.maximumf %413, %414 : vector<16x1xf32>
    %416 = vector.broadcast %406 : vector<16x1xf32> to vector<16x128xf32>
    %417 = arith.subf %398, %416 : vector<16x128xf32>
    %cst_193 = arith.constant 9.99999974E-6 : f32
    %418 = vector.broadcast %cst_193 : f32 to vector<16x1xf32>
    %419 = arith.addf %415, %418 : vector<16x1xf32>
    %420 = math.rsqrt %419 : vector<16x1xf32>
    %421 = vector.broadcast %420 : vector<16x1xf32> to vector<16x128xf32>
    %422 = arith.mulf %417, %421 : vector<16x128xf32>
    %423 = vector.broadcast %400 : vector<1x128xf32> to vector<16x128xf32>
    %424 = arith.mulf %422, %423 : vector<16x128xf32>
    %425 = vector.broadcast %402 : vector<1x128xf32> to vector<16x128xf32>
    %426 = arith.addf %424, %425 : vector<16x128xf32>
    %cst_194 = arith.constant 5.000000e-01 : f32
    %427 = vector.broadcast %cst_194 : f32 to vector<16x128xf32>
    %428 = arith.mulf %427, %426 : vector<16x128xf32>
    %cst_195 = arith.constant 4.471500e-02 : f32
    %429 = vector.broadcast %cst_195 : f32 to vector<16x128xf32>
    %430 = arith.mulf %429, %426 : vector<16x128xf32>
    %431 = arith.mulf %430, %426 : vector<16x128xf32>
    %432 = arith.mulf %431, %426 : vector<16x128xf32>
    %433 = arith.addf %426, %432 : vector<16x128xf32>
    %cst_196 = arith.constant 0.797884583 : f32
    %434 = vector.broadcast %cst_196 : f32 to vector<16x128xf32>
    %435 = arith.mulf %434, %433 : vector<16x128xf32>
    %436 = math.tanh %435 : vector<16x128xf32>
    %cst_197 = arith.constant 1.000000e+00 : f32
    %437 = vector.broadcast %cst_197 : f32 to vector<16x128xf32>
    %438 = arith.addf %437, %436 : vector<16x128xf32>
    %439 = arith.mulf %428, %438 : vector<16x128xf32>
    %440 = arith.truncf %439 : vector<16x128xf32> to vector<16x128xbf16>
    %c2_198 = arith.constant 2 : index
    %c0_199 = arith.constant 0 : index
    %c0_200 = arith.constant 0 : index
    %441 = vector.load %arg4[%c2_198, %c0_199, %c0_200] : memref<4x128x128xbf16, #tpu.memory_space<vmem>>, vector<1x128x128xbf16>
    %442 = vector.shape_cast %441 : vector<1x128x128xbf16> to vector<128x128xbf16>
    %cst_201 = arith.constant dense<0.000000e+00> : vector<16x128xf32>
    %443 = tpu.matmul %440, %442, %cst_201 {dimension_numbers = #tpu.dot_dimension_numbers<[1], [0], [0], [1], [0, 0, 1, 1], [], []>} : vector<16x128xbf16>, vector<128x128xbf16>, vector<16x128xf32> -> vector<16x128xf32>
    %c2_202 = arith.constant 2 : index
    %c0_203 = arith.constant 0 : index
    %c0_204 = arith.constant 0 : index
    %444 = vector.load %arg5[%c2_202, %c0_203, %c0_204] : memref<4x1x128xf32, #tpu.memory_space<vmem>>, vector<1x1x128xf32>
    %445 = vector.shape_cast %444 : vector<1x1x128xf32> to vector<1x128xf32>
    %446 = vector.broadcast %445 : vector<1x128xf32> to vector<16x128xf32>
    %447 = arith.addf %443, %446 : vector<16x128xf32>
    %c2_205 = arith.constant 2 : index
    %c0_206 = arith.constant 0 : index
    %c0_207 = arith.constant 0 : index
    %448 = vector.load %arg6[%c2_205, %c0_206, %c0_207] : memref<4x1x128xf32, #tpu.memory_space<vmem>>, vector<1x1x128xf32>
    %449 = vector.shape_cast %448 : vector<1x1x128xf32> to vector<1x128xf32>
    %c2_208 = arith.constant 2 : index
    %c0_209 = arith.constant 0 : index
    %c0_210 = arith.constant 0 : index
    %450 = vector.load %arg7[%c2_208, %c0_209, %c0_210] : memref<4x1x128xf32, #tpu.memory_space<vmem>>, vector<1x1x128xf32>
    %451 = vector.shape_cast %450 : vector<1x1x128xf32> to vector<1x128xf32>
    %cst_211 = arith.constant dense<0.000000e+00> : vector<16xf32>
    %452 = vector.multi_reduction <add>, %447, %cst_211 [1] : vector<16x128xf32> to vector<16xf32>
    %453 = vector.shape_cast %452 : vector<16xf32> to vector<16x1xf32>
    %cst_212 = arith.constant 3.125000e-02 : f32
    %454 = vector.broadcast %cst_212 : f32 to vector<16x1xf32>
    %455 = arith.mulf %453, %454 : vector<16x1xf32>
    %456 = arith.mulf %447, %447 : vector<16x128xf32>
    %cst_213 = arith.constant dense<0.000000e+00> : vector<16xf32>
    %457 = vector.multi_reduction <add>, %456, %cst_213 [1] : vector<16x128xf32> to vector<16xf32>
    %458 = vector.shape_cast %457 : vector<16xf32> to vector<16x1xf32>
    %cst_214 = arith.constant 3.125000e-02 : f32
    %459 = vector.broadcast %cst_214 : f32 to vector<16x1xf32>
    %460 = arith.mulf %458, %459 : vector<16x1xf32>
    %461 = arith.mulf %455, %455 : vector<16x1xf32>
    %462 = arith.subf %460, %461 : vector<16x1xf32>
    %cst_215 = arith.constant 0.000000e+00 : f32
    %463 = vector.broadcast %cst_215 : f32 to vector<16x1xf32>
    %464 = arith.maximumf %462, %463 : vector<16x1xf32>
    %465 = vector.broadcast %455 : vector<16x1xf32> to vector<16x128xf32>
    %466 = arith.subf %447, %465 : vector<16x128xf32>
    %cst_216 = arith.constant 9.99999974E-6 : f32
    %467 = vector.broadcast %cst_216 : f32 to vector<16x1xf32>
    %468 = arith.addf %464, %467 : vector<16x1xf32>
    %469 = math.rsqrt %468 : vector<16x1xf32>
    %470 = vector.broadcast %469 : vector<16x1xf32> to vector<16x128xf32>
    %471 = arith.mulf %466, %470 : vector<16x128xf32>
    %472 = vector.broadcast %449 : vector<1x128xf32> to vector<16x128xf32>
    %473 = arith.mulf %471, %472 : vector<16x128xf32>
    %474 = vector.broadcast %451 : vector<1x128xf32> to vector<16x128xf32>
    %475 = arith.addf %473, %474 : vector<16x128xf32>
    %cst_217 = arith.constant 5.000000e-01 : f32
    %476 = vector.broadcast %cst_217 : f32 to vector<16x128xf32>
    %477 = arith.mulf %476, %475 : vector<16x128xf32>
    %cst_218 = arith.constant 4.471500e-02 : f32
    %478 = vector.broadcast %cst_218 : f32 to vector<16x128xf32>
    %479 = arith.mulf %478, %475 : vector<16x128xf32>
    %480 = arith.mulf %479, %475 : vector<16x128xf32>
    %481 = arith.mulf %480, %475 : vector<16x128xf32>
    %482 = arith.addf %475, %481 : vector<16x128xf32>
    %cst_219 = arith.constant 0.797884583 : f32
    %483 = vector.broadcast %cst_219 : f32 to vector<16x128xf32>
    %484 = arith.mulf %483, %482 : vector<16x128xf32>
    %485 = math.tanh %484 : vector<16x128xf32>
    %cst_220 = arith.constant 1.000000e+00 : f32
    %486 = vector.broadcast %cst_220 : f32 to vector<16x128xf32>
    %487 = arith.addf %486, %485 : vector<16x128xf32>
    %488 = arith.mulf %477, %487 : vector<16x128xf32>
    %c4_i32_221 = arith.constant 4 : i32
    %489 = tpu.dynamic_rotate %488 by %c4_i32_221 dim 0 : vector<16x128xf32>, i32 -> vector<16x128xf32>
    %cst_222 = arith.constant 0.000000e+00 : f32
    %490 = vector.broadcast %cst_222 : f32 to vector<16x128xf32>
    %491 = vector.shape_cast %55 : vector<16x1xi1> to vector<16x1xi1>
    %492 = vector.broadcast %491 : vector<16x1xi1> to vector<16x128xi1>
    %493 = arith.select %492, %489, %490 : vector<16x128xi1>, vector<16x128xf32>
    %494 = arith.truncf %493 : vector<16x128xf32> to vector<16x128xbf16>
    %c2_223 = arith.constant 2 : index
    %c0_224 = arith.constant 0 : index
    %c0_225 = arith.constant 0 : index
    %c0_226 = arith.constant 0 : index
    %495 = vector.load %arg8[%c2_223, %c0_224, %c0_225, %c0_226] : memref<4x3x128x128xbf16, #tpu.memory_space<vmem>>, vector<1x1x128x128xbf16>
    %496 = vector.shape_cast %495 : vector<1x1x128x128xbf16> to vector<128x128xbf16>
    %cst_227 = arith.constant dense<0.000000e+00> : vector<16x128xf32>
    %497 = tpu.matmul %494, %496, %cst_227 {dimension_numbers = #tpu.dot_dimension_numbers<[1], [0], [0], [1], [0, 0, 1, 1], [], []>} : vector<16x128xbf16>, vector<128x128xbf16>, vector<16x128xf32> -> vector<16x128xf32>
    %498 = arith.truncf %488 : vector<16x128xf32> to vector<16x128xbf16>
    %c2_228 = arith.constant 2 : index
    %c1_229 = arith.constant 1 : index
    %c0_230 = arith.constant 0 : index
    %c0_231 = arith.constant 0 : index
    %499 = vector.load %arg8[%c2_228, %c1_229, %c0_230, %c0_231] : memref<4x3x128x128xbf16, #tpu.memory_space<vmem>>, vector<1x1x128x128xbf16>
    %500 = vector.shape_cast %499 : vector<1x1x128x128xbf16> to vector<128x128xbf16>
    %cst_232 = arith.constant dense<0.000000e+00> : vector<16x128xf32>
    %501 = tpu.matmul %498, %500, %cst_232 {dimension_numbers = #tpu.dot_dimension_numbers<[1], [0], [0], [1], [0, 0, 1, 1], [], []>} : vector<16x128xbf16>, vector<128x128xbf16>, vector<16x128xf32> -> vector<16x128xf32>
    %502 = arith.addf %497, %501 : vector<16x128xf32>
    %c12_i32 = arith.constant 12 : i32
    %503 = tpu.dynamic_rotate %488 by %c12_i32 dim 0 : vector<16x128xf32>, i32 -> vector<16x128xf32>
    %cst_233 = arith.constant 0.000000e+00 : f32
    %504 = vector.broadcast %cst_233 : f32 to vector<16x128xf32>
    %505 = vector.shape_cast %62 : vector<16x1xi1> to vector<16x1xi1>
    %506 = vector.broadcast %505 : vector<16x1xi1> to vector<16x128xi1>
    %507 = arith.select %506, %503, %504 : vector<16x128xi1>, vector<16x128xf32>
    %508 = arith.truncf %507 : vector<16x128xf32> to vector<16x128xbf16>
    %c2_234 = arith.constant 2 : index
    %c2_235 = arith.constant 2 : index
    %c0_236 = arith.constant 0 : index
    %c0_237 = arith.constant 0 : index
    %509 = vector.load %arg8[%c2_234, %c2_235, %c0_236, %c0_237] : memref<4x3x128x128xbf16, #tpu.memory_space<vmem>>, vector<1x1x128x128xbf16>
    %510 = vector.shape_cast %509 : vector<1x1x128x128xbf16> to vector<128x128xbf16>
    %cst_238 = arith.constant dense<0.000000e+00> : vector<16x128xf32>
    %511 = tpu.matmul %508, %510, %cst_238 {dimension_numbers = #tpu.dot_dimension_numbers<[1], [0], [0], [1], [0, 0, 1, 1], [], []>} : vector<16x128xbf16>, vector<128x128xbf16>, vector<16x128xf32> -> vector<16x128xf32>
    %512 = arith.addf %502, %511 : vector<16x128xf32>
    %c2_239 = arith.constant 2 : index
    %c0_240 = arith.constant 0 : index
    %c0_241 = arith.constant 0 : index
    %513 = vector.load %arg9[%c2_239, %c0_240, %c0_241] : memref<4x1x128xf32, #tpu.memory_space<vmem>>, vector<1x1x128xf32>
    %514 = vector.shape_cast %513 : vector<1x1x128xf32> to vector<1x128xf32>
    %515 = vector.broadcast %514 : vector<1x128xf32> to vector<16x128xf32>
    %516 = arith.addf %512, %515 : vector<16x128xf32>
    %c2_242 = arith.constant 2 : index
    %c0_243 = arith.constant 0 : index
    %c0_244 = arith.constant 0 : index
    %517 = vector.load %arg10[%c2_242, %c0_243, %c0_244] : memref<4x1x128xf32, #tpu.memory_space<vmem>>, vector<1x1x128xf32>
    %518 = vector.shape_cast %517 : vector<1x1x128xf32> to vector<1x128xf32>
    %c2_245 = arith.constant 2 : index
    %c0_246 = arith.constant 0 : index
    %c0_247 = arith.constant 0 : index
    %519 = vector.load %arg11[%c2_245, %c0_246, %c0_247] : memref<4x1x128xf32, #tpu.memory_space<vmem>>, vector<1x1x128xf32>
    %520 = vector.shape_cast %519 : vector<1x1x128xf32> to vector<1x128xf32>
    %cst_248 = arith.constant dense<0.000000e+00> : vector<16xf32>
    %521 = vector.multi_reduction <add>, %516, %cst_248 [1] : vector<16x128xf32> to vector<16xf32>
    %522 = vector.shape_cast %521 : vector<16xf32> to vector<16x1xf32>
    %cst_249 = arith.constant 3.125000e-02 : f32
    %523 = vector.broadcast %cst_249 : f32 to vector<16x1xf32>
    %524 = arith.mulf %522, %523 : vector<16x1xf32>
    %525 = arith.mulf %516, %516 : vector<16x128xf32>
    %cst_250 = arith.constant dense<0.000000e+00> : vector<16xf32>
    %526 = vector.multi_reduction <add>, %525, %cst_250 [1] : vector<16x128xf32> to vector<16xf32>
    %527 = vector.shape_cast %526 : vector<16xf32> to vector<16x1xf32>
    %cst_251 = arith.constant 3.125000e-02 : f32
    %528 = vector.broadcast %cst_251 : f32 to vector<16x1xf32>
    %529 = arith.mulf %527, %528 : vector<16x1xf32>
    %530 = arith.mulf %524, %524 : vector<16x1xf32>
    %531 = arith.subf %529, %530 : vector<16x1xf32>
    %cst_252 = arith.constant 0.000000e+00 : f32
    %532 = vector.broadcast %cst_252 : f32 to vector<16x1xf32>
    %533 = arith.maximumf %531, %532 : vector<16x1xf32>
    %534 = vector.broadcast %524 : vector<16x1xf32> to vector<16x128xf32>
    %535 = arith.subf %516, %534 : vector<16x128xf32>
    %cst_253 = arith.constant 9.99999974E-6 : f32
    %536 = vector.broadcast %cst_253 : f32 to vector<16x1xf32>
    %537 = arith.addf %533, %536 : vector<16x1xf32>
    %538 = math.rsqrt %537 : vector<16x1xf32>
    %539 = vector.broadcast %538 : vector<16x1xf32> to vector<16x128xf32>
    %540 = arith.mulf %535, %539 : vector<16x128xf32>
    %541 = vector.broadcast %518 : vector<1x128xf32> to vector<16x128xf32>
    %542 = arith.mulf %540, %541 : vector<16x128xf32>
    %543 = vector.broadcast %520 : vector<1x128xf32> to vector<16x128xf32>
    %544 = arith.addf %542, %543 : vector<16x128xf32>
    %cst_254 = arith.constant 5.000000e-01 : f32
    %545 = vector.broadcast %cst_254 : f32 to vector<16x128xf32>
    %546 = arith.mulf %545, %544 : vector<16x128xf32>
    %cst_255 = arith.constant 4.471500e-02 : f32
    %547 = vector.broadcast %cst_255 : f32 to vector<16x128xf32>
    %548 = arith.mulf %547, %544 : vector<16x128xf32>
    %549 = arith.mulf %548, %544 : vector<16x128xf32>
    %550 = arith.mulf %549, %544 : vector<16x128xf32>
    %551 = arith.addf %544, %550 : vector<16x128xf32>
    %cst_256 = arith.constant 0.797884583 : f32
    %552 = vector.broadcast %cst_256 : f32 to vector<16x128xf32>
    %553 = arith.mulf %552, %551 : vector<16x128xf32>
    %554 = math.tanh %553 : vector<16x128xf32>
    %cst_257 = arith.constant 1.000000e+00 : f32
    %555 = vector.broadcast %cst_257 : f32 to vector<16x128xf32>
    %556 = arith.addf %555, %554 : vector<16x128xf32>
    %557 = arith.mulf %546, %556 : vector<16x128xf32>
    %558 = arith.truncf %557 : vector<16x128xf32> to vector<16x128xbf16>
    %c2_258 = arith.constant 2 : index
    %c0_259 = arith.constant 0 : index
    %c0_260 = arith.constant 0 : index
    %559 = vector.load %arg12[%c2_258, %c0_259, %c0_260] : memref<4x128x128xbf16, #tpu.memory_space<vmem>>, vector<1x128x128xbf16>
    %560 = vector.shape_cast %559 : vector<1x128x128xbf16> to vector<128x128xbf16>
    %cst_261 = arith.constant dense<0.000000e+00> : vector<16x128xf32>
    %561 = tpu.matmul %558, %560, %cst_261 {dimension_numbers = #tpu.dot_dimension_numbers<[1], [0], [0], [1], [0, 0, 1, 1], [], []>} : vector<16x128xbf16>, vector<128x128xbf16>, vector<16x128xf32> -> vector<16x128xf32>
    %c2_262 = arith.constant 2 : index
    %c0_263 = arith.constant 0 : index
    %c0_264 = arith.constant 0 : index
    %562 = vector.load %arg13[%c2_262, %c0_263, %c0_264] : memref<4x1x128xf32, #tpu.memory_space<vmem>>, vector<1x1x128xf32>
    %563 = vector.shape_cast %562 : vector<1x1x128xf32> to vector<1x128xf32>
    %564 = vector.broadcast %563 : vector<1x128xf32> to vector<16x128xf32>
    %565 = arith.addf %561, %564 : vector<16x128xf32>
    %566 = arith.addf %398, %565 : vector<16x128xf32>
    %c3 = arith.constant 3 : index
    %c0_265 = arith.constant 0 : index
    %c0_266 = arith.constant 0 : index
    %567 = vector.load %arg2[%c3, %c0_265, %c0_266] : memref<4x1x128xf32, #tpu.memory_space<vmem>>, vector<1x1x128xf32>
    %568 = vector.shape_cast %567 : vector<1x1x128xf32> to vector<1x128xf32>
    %c3_267 = arith.constant 3 : index
    %c0_268 = arith.constant 0 : index
    %c0_269 = arith.constant 0 : index
    %569 = vector.load %arg3[%c3_267, %c0_268, %c0_269] : memref<4x1x128xf32, #tpu.memory_space<vmem>>, vector<1x1x128xf32>
    %570 = vector.shape_cast %569 : vector<1x1x128xf32> to vector<1x128xf32>
    %cst_270 = arith.constant dense<0.000000e+00> : vector<16xf32>
    %571 = vector.multi_reduction <add>, %566, %cst_270 [1] : vector<16x128xf32> to vector<16xf32>
    %572 = vector.shape_cast %571 : vector<16xf32> to vector<16x1xf32>
    %cst_271 = arith.constant 1.562500e-02 : f32
    %573 = vector.broadcast %cst_271 : f32 to vector<16x1xf32>
    %574 = arith.mulf %572, %573 : vector<16x1xf32>
    %575 = arith.mulf %566, %566 : vector<16x128xf32>
    %cst_272 = arith.constant dense<0.000000e+00> : vector<16xf32>
    %576 = vector.multi_reduction <add>, %575, %cst_272 [1] : vector<16x128xf32> to vector<16xf32>
    %577 = vector.shape_cast %576 : vector<16xf32> to vector<16x1xf32>
    %cst_273 = arith.constant 1.562500e-02 : f32
    %578 = vector.broadcast %cst_273 : f32 to vector<16x1xf32>
    %579 = arith.mulf %577, %578 : vector<16x1xf32>
    %580 = arith.mulf %574, %574 : vector<16x1xf32>
    %581 = arith.subf %579, %580 : vector<16x1xf32>
    %cst_274 = arith.constant 0.000000e+00 : f32
    %582 = vector.broadcast %cst_274 : f32 to vector<16x1xf32>
    %583 = arith.maximumf %581, %582 : vector<16x1xf32>
    %584 = vector.broadcast %574 : vector<16x1xf32> to vector<16x128xf32>
    %585 = arith.subf %566, %584 : vector<16x128xf32>
    %cst_275 = arith.constant 9.99999974E-6 : f32
    %586 = vector.broadcast %cst_275 : f32 to vector<16x1xf32>
    %587 = arith.addf %583, %586 : vector<16x1xf32>
    %588 = math.rsqrt %587 : vector<16x1xf32>
    %589 = vector.broadcast %588 : vector<16x1xf32> to vector<16x128xf32>
    %590 = arith.mulf %585, %589 : vector<16x128xf32>
    %591 = vector.broadcast %568 : vector<1x128xf32> to vector<16x128xf32>
    %592 = arith.mulf %590, %591 : vector<16x128xf32>
    %593 = vector.broadcast %570 : vector<1x128xf32> to vector<16x128xf32>
    %594 = arith.addf %592, %593 : vector<16x128xf32>
    %cst_276 = arith.constant 5.000000e-01 : f32
    %595 = vector.broadcast %cst_276 : f32 to vector<16x128xf32>
    %596 = arith.mulf %595, %594 : vector<16x128xf32>
    %cst_277 = arith.constant 4.471500e-02 : f32
    %597 = vector.broadcast %cst_277 : f32 to vector<16x128xf32>
    %598 = arith.mulf %597, %594 : vector<16x128xf32>
    %599 = arith.mulf %598, %594 : vector<16x128xf32>
    %600 = arith.mulf %599, %594 : vector<16x128xf32>
    %601 = arith.addf %594, %600 : vector<16x128xf32>
    %cst_278 = arith.constant 0.797884583 : f32
    %602 = vector.broadcast %cst_278 : f32 to vector<16x128xf32>
    %603 = arith.mulf %602, %601 : vector<16x128xf32>
    %604 = math.tanh %603 : vector<16x128xf32>
    %cst_279 = arith.constant 1.000000e+00 : f32
    %605 = vector.broadcast %cst_279 : f32 to vector<16x128xf32>
    %606 = arith.addf %605, %604 : vector<16x128xf32>
    %607 = arith.mulf %596, %606 : vector<16x128xf32>
    %608 = arith.truncf %607 : vector<16x128xf32> to vector<16x128xbf16>
    %c3_280 = arith.constant 3 : index
    %c0_281 = arith.constant 0 : index
    %c0_282 = arith.constant 0 : index
    %609 = vector.load %arg4[%c3_280, %c0_281, %c0_282] : memref<4x128x128xbf16, #tpu.memory_space<vmem>>, vector<1x128x128xbf16>
    %610 = vector.shape_cast %609 : vector<1x128x128xbf16> to vector<128x128xbf16>
    %cst_283 = arith.constant dense<0.000000e+00> : vector<16x128xf32>
    %611 = tpu.matmul %608, %610, %cst_283 {dimension_numbers = #tpu.dot_dimension_numbers<[1], [0], [0], [1], [0, 0, 1, 1], [], []>} : vector<16x128xbf16>, vector<128x128xbf16>, vector<16x128xf32> -> vector<16x128xf32>
    %c3_284 = arith.constant 3 : index
    %c0_285 = arith.constant 0 : index
    %c0_286 = arith.constant 0 : index
    %612 = vector.load %arg5[%c3_284, %c0_285, %c0_286] : memref<4x1x128xf32, #tpu.memory_space<vmem>>, vector<1x1x128xf32>
    %613 = vector.shape_cast %612 : vector<1x1x128xf32> to vector<1x128xf32>
    %614 = vector.broadcast %613 : vector<1x128xf32> to vector<16x128xf32>
    %615 = arith.addf %611, %614 : vector<16x128xf32>
    %c3_287 = arith.constant 3 : index
    %c0_288 = arith.constant 0 : index
    %c0_289 = arith.constant 0 : index
    %616 = vector.load %arg6[%c3_287, %c0_288, %c0_289] : memref<4x1x128xf32, #tpu.memory_space<vmem>>, vector<1x1x128xf32>
    %617 = vector.shape_cast %616 : vector<1x1x128xf32> to vector<1x128xf32>
    %c3_290 = arith.constant 3 : index
    %c0_291 = arith.constant 0 : index
    %c0_292 = arith.constant 0 : index
    %618 = vector.load %arg7[%c3_290, %c0_291, %c0_292] : memref<4x1x128xf32, #tpu.memory_space<vmem>>, vector<1x1x128xf32>
    %619 = vector.shape_cast %618 : vector<1x1x128xf32> to vector<1x128xf32>
    %cst_293 = arith.constant dense<0.000000e+00> : vector<16xf32>
    %620 = vector.multi_reduction <add>, %615, %cst_293 [1] : vector<16x128xf32> to vector<16xf32>
    %621 = vector.shape_cast %620 : vector<16xf32> to vector<16x1xf32>
    %cst_294 = arith.constant 3.125000e-02 : f32
    %622 = vector.broadcast %cst_294 : f32 to vector<16x1xf32>
    %623 = arith.mulf %621, %622 : vector<16x1xf32>
    %624 = arith.mulf %615, %615 : vector<16x128xf32>
    %cst_295 = arith.constant dense<0.000000e+00> : vector<16xf32>
    %625 = vector.multi_reduction <add>, %624, %cst_295 [1] : vector<16x128xf32> to vector<16xf32>
    %626 = vector.shape_cast %625 : vector<16xf32> to vector<16x1xf32>
    %cst_296 = arith.constant 3.125000e-02 : f32
    %627 = vector.broadcast %cst_296 : f32 to vector<16x1xf32>
    %628 = arith.mulf %626, %627 : vector<16x1xf32>
    %629 = arith.mulf %623, %623 : vector<16x1xf32>
    %630 = arith.subf %628, %629 : vector<16x1xf32>
    %cst_297 = arith.constant 0.000000e+00 : f32
    %631 = vector.broadcast %cst_297 : f32 to vector<16x1xf32>
    %632 = arith.maximumf %630, %631 : vector<16x1xf32>
    %633 = vector.broadcast %623 : vector<16x1xf32> to vector<16x128xf32>
    %634 = arith.subf %615, %633 : vector<16x128xf32>
    %cst_298 = arith.constant 9.99999974E-6 : f32
    %635 = vector.broadcast %cst_298 : f32 to vector<16x1xf32>
    %636 = arith.addf %632, %635 : vector<16x1xf32>
    %637 = math.rsqrt %636 : vector<16x1xf32>
    %638 = vector.broadcast %637 : vector<16x1xf32> to vector<16x128xf32>
    %639 = arith.mulf %634, %638 : vector<16x128xf32>
    %640 = vector.broadcast %617 : vector<1x128xf32> to vector<16x128xf32>
    %641 = arith.mulf %639, %640 : vector<16x128xf32>
    %642 = vector.broadcast %619 : vector<1x128xf32> to vector<16x128xf32>
    %643 = arith.addf %641, %642 : vector<16x128xf32>
    %cst_299 = arith.constant 5.000000e-01 : f32
    %644 = vector.broadcast %cst_299 : f32 to vector<16x128xf32>
    %645 = arith.mulf %644, %643 : vector<16x128xf32>
    %cst_300 = arith.constant 4.471500e-02 : f32
    %646 = vector.broadcast %cst_300 : f32 to vector<16x128xf32>
    %647 = arith.mulf %646, %643 : vector<16x128xf32>
    %648 = arith.mulf %647, %643 : vector<16x128xf32>
    %649 = arith.mulf %648, %643 : vector<16x128xf32>
    %650 = arith.addf %643, %649 : vector<16x128xf32>
    %cst_301 = arith.constant 0.797884583 : f32
    %651 = vector.broadcast %cst_301 : f32 to vector<16x128xf32>
    %652 = arith.mulf %651, %650 : vector<16x128xf32>
    %653 = math.tanh %652 : vector<16x128xf32>
    %cst_302 = arith.constant 1.000000e+00 : f32
    %654 = vector.broadcast %cst_302 : f32 to vector<16x128xf32>
    %655 = arith.addf %654, %653 : vector<16x128xf32>
    %656 = arith.mulf %645, %655 : vector<16x128xf32>
    %c1_i32_303 = arith.constant 1 : i32
    %657 = tpu.dynamic_rotate %656 by %c1_i32_303 dim 0 : vector<16x128xf32>, i32 -> vector<16x128xf32>
    %cst_304 = arith.constant 0.000000e+00 : f32
    %658 = vector.broadcast %cst_304 : f32 to vector<16x128xf32>
    %659 = vector.shape_cast %27 : vector<16x1xi1> to vector<16x1xi1>
    %660 = vector.broadcast %659 : vector<16x1xi1> to vector<16x128xi1>
    %661 = arith.select %660, %657, %658 : vector<16x128xi1>, vector<16x128xf32>
    %662 = arith.truncf %661 : vector<16x128xf32> to vector<16x128xbf16>
    %c3_305 = arith.constant 3 : index
    %c0_306 = arith.constant 0 : index
    %c0_307 = arith.constant 0 : index
    %c0_308 = arith.constant 0 : index
    %663 = vector.load %arg8[%c3_305, %c0_306, %c0_307, %c0_308] : memref<4x3x128x128xbf16, #tpu.memory_space<vmem>>, vector<1x1x128x128xbf16>
    %664 = vector.shape_cast %663 : vector<1x1x128x128xbf16> to vector<128x128xbf16>
    %cst_309 = arith.constant dense<0.000000e+00> : vector<16x128xf32>
    %665 = tpu.matmul %662, %664, %cst_309 {dimension_numbers = #tpu.dot_dimension_numbers<[1], [0], [0], [1], [0, 0, 1, 1], [], []>} : vector<16x128xbf16>, vector<128x128xbf16>, vector<16x128xf32> -> vector<16x128xf32>
    %666 = arith.truncf %656 : vector<16x128xf32> to vector<16x128xbf16>
    %c3_310 = arith.constant 3 : index
    %c1_311 = arith.constant 1 : index
    %c0_312 = arith.constant 0 : index
    %c0_313 = arith.constant 0 : index
    %667 = vector.load %arg8[%c3_310, %c1_311, %c0_312, %c0_313] : memref<4x3x128x128xbf16, #tpu.memory_space<vmem>>, vector<1x1x128x128xbf16>
    %668 = vector.shape_cast %667 : vector<1x1x128x128xbf16> to vector<128x128xbf16>
    %cst_314 = arith.constant dense<0.000000e+00> : vector<16x128xf32>
    %669 = tpu.matmul %666, %668, %cst_314 {dimension_numbers = #tpu.dot_dimension_numbers<[1], [0], [0], [1], [0, 0, 1, 1], [], []>} : vector<16x128xbf16>, vector<128x128xbf16>, vector<16x128xf32> -> vector<16x128xf32>
    %670 = arith.addf %665, %669 : vector<16x128xf32>
    %c15_i32_315 = arith.constant 15 : i32
    %671 = tpu.dynamic_rotate %656 by %c15_i32_315 dim 0 : vector<16x128xf32>, i32 -> vector<16x128xf32>
    %cst_316 = arith.constant 0.000000e+00 : f32
    %672 = vector.broadcast %cst_316 : f32 to vector<16x128xf32>
    %673 = vector.shape_cast %34 : vector<16x1xi1> to vector<16x1xi1>
    %674 = vector.broadcast %673 : vector<16x1xi1> to vector<16x128xi1>
    %675 = arith.select %674, %671, %672 : vector<16x128xi1>, vector<16x128xf32>
    %676 = arith.truncf %675 : vector<16x128xf32> to vector<16x128xbf16>
    %c3_317 = arith.constant 3 : index
    %c2_318 = arith.constant 2 : index
    %c0_319 = arith.constant 0 : index
    %c0_320 = arith.constant 0 : index
    %677 = vector.load %arg8[%c3_317, %c2_318, %c0_319, %c0_320] : memref<4x3x128x128xbf16, #tpu.memory_space<vmem>>, vector<1x1x128x128xbf16>
    %678 = vector.shape_cast %677 : vector<1x1x128x128xbf16> to vector<128x128xbf16>
    %cst_321 = arith.constant dense<0.000000e+00> : vector<16x128xf32>
    %679 = tpu.matmul %676, %678, %cst_321 {dimension_numbers = #tpu.dot_dimension_numbers<[1], [0], [0], [1], [0, 0, 1, 1], [], []>} : vector<16x128xbf16>, vector<128x128xbf16>, vector<16x128xf32> -> vector<16x128xf32>
    %680 = arith.addf %670, %679 : vector<16x128xf32>
    %c3_322 = arith.constant 3 : index
    %c0_323 = arith.constant 0 : index
    %c0_324 = arith.constant 0 : index
    %681 = vector.load %arg9[%c3_322, %c0_323, %c0_324] : memref<4x1x128xf32, #tpu.memory_space<vmem>>, vector<1x1x128xf32>
    %682 = vector.shape_cast %681 : vector<1x1x128xf32> to vector<1x128xf32>
    %683 = vector.broadcast %682 : vector<1x128xf32> to vector<16x128xf32>
    %684 = arith.addf %680, %683 : vector<16x128xf32>
    %c3_325 = arith.constant 3 : index
    %c0_326 = arith.constant 0 : index
    %c0_327 = arith.constant 0 : index
    %685 = vector.load %arg10[%c3_325, %c0_326, %c0_327] : memref<4x1x128xf32, #tpu.memory_space<vmem>>, vector<1x1x128xf32>
    %686 = vector.shape_cast %685 : vector<1x1x128xf32> to vector<1x128xf32>
    %c3_328 = arith.constant 3 : index
    %c0_329 = arith.constant 0 : index
    %c0_330 = arith.constant 0 : index
    %687 = vector.load %arg11[%c3_328, %c0_329, %c0_330] : memref<4x1x128xf32, #tpu.memory_space<vmem>>, vector<1x1x128xf32>
    %688 = vector.shape_cast %687 : vector<1x1x128xf32> to vector<1x128xf32>
    %cst_331 = arith.constant dense<0.000000e+00> : vector<16xf32>
    %689 = vector.multi_reduction <add>, %684, %cst_331 [1] : vector<16x128xf32> to vector<16xf32>
    %690 = vector.shape_cast %689 : vector<16xf32> to vector<16x1xf32>
    %cst_332 = arith.constant 3.125000e-02 : f32
    %691 = vector.broadcast %cst_332 : f32 to vector<16x1xf32>
    %692 = arith.mulf %690, %691 : vector<16x1xf32>
    %693 = arith.mulf %684, %684 : vector<16x128xf32>
    %cst_333 = arith.constant dense<0.000000e+00> : vector<16xf32>
    %694 = vector.multi_reduction <add>, %693, %cst_333 [1] : vector<16x128xf32> to vector<16xf32>
    %695 = vector.shape_cast %694 : vector<16xf32> to vector<16x1xf32>
    %cst_334 = arith.constant 3.125000e-02 : f32
    %696 = vector.broadcast %cst_334 : f32 to vector<16x1xf32>
    %697 = arith.mulf %695, %696 : vector<16x1xf32>
    %698 = arith.mulf %692, %692 : vector<16x1xf32>
    %699 = arith.subf %697, %698 : vector<16x1xf32>
    %cst_335 = arith.constant 0.000000e+00 : f32
    %700 = vector.broadcast %cst_335 : f32 to vector<16x1xf32>
    %701 = arith.maximumf %699, %700 : vector<16x1xf32>
    %702 = vector.broadcast %692 : vector<16x1xf32> to vector<16x128xf32>
    %703 = arith.subf %684, %702 : vector<16x128xf32>
    %cst_336 = arith.constant 9.99999974E-6 : f32
    %704 = vector.broadcast %cst_336 : f32 to vector<16x1xf32>
    %705 = arith.addf %701, %704 : vector<16x1xf32>
    %706 = math.rsqrt %705 : vector<16x1xf32>
    %707 = vector.broadcast %706 : vector<16x1xf32> to vector<16x128xf32>
    %708 = arith.mulf %703, %707 : vector<16x128xf32>
    %709 = vector.broadcast %686 : vector<1x128xf32> to vector<16x128xf32>
    %710 = arith.mulf %708, %709 : vector<16x128xf32>
    %711 = vector.broadcast %688 : vector<1x128xf32> to vector<16x128xf32>
    %712 = arith.addf %710, %711 : vector<16x128xf32>
    %cst_337 = arith.constant 5.000000e-01 : f32
    %713 = vector.broadcast %cst_337 : f32 to vector<16x128xf32>
    %714 = arith.mulf %713, %712 : vector<16x128xf32>
    %cst_338 = arith.constant 4.471500e-02 : f32
    %715 = vector.broadcast %cst_338 : f32 to vector<16x128xf32>
    %716 = arith.mulf %715, %712 : vector<16x128xf32>
    %717 = arith.mulf %716, %712 : vector<16x128xf32>
    %718 = arith.mulf %717, %712 : vector<16x128xf32>
    %719 = arith.addf %712, %718 : vector<16x128xf32>
    %cst_339 = arith.constant 0.797884583 : f32
    %720 = vector.broadcast %cst_339 : f32 to vector<16x128xf32>
    %721 = arith.mulf %720, %719 : vector<16x128xf32>
    %722 = math.tanh %721 : vector<16x128xf32>
    %cst_340 = arith.constant 1.000000e+00 : f32
    %723 = vector.broadcast %cst_340 : f32 to vector<16x128xf32>
    %724 = arith.addf %723, %722 : vector<16x128xf32>
    %725 = arith.mulf %714, %724 : vector<16x128xf32>
    %726 = arith.truncf %725 : vector<16x128xf32> to vector<16x128xbf16>
    %c3_341 = arith.constant 3 : index
    %c0_342 = arith.constant 0 : index
    %c0_343 = arith.constant 0 : index
    %727 = vector.load %arg12[%c3_341, %c0_342, %c0_343] : memref<4x128x128xbf16, #tpu.memory_space<vmem>>, vector<1x128x128xbf16>
    %728 = vector.shape_cast %727 : vector<1x128x128xbf16> to vector<128x128xbf16>
    %cst_344 = arith.constant dense<0.000000e+00> : vector<16x128xf32>
    %729 = tpu.matmul %726, %728, %cst_344 {dimension_numbers = #tpu.dot_dimension_numbers<[1], [0], [0], [1], [0, 0, 1, 1], [], []>} : vector<16x128xbf16>, vector<128x128xbf16>, vector<16x128xf32> -> vector<16x128xf32>
    %c3_345 = arith.constant 3 : index
    %c0_346 = arith.constant 0 : index
    %c0_347 = arith.constant 0 : index
    %730 = vector.load %arg13[%c3_345, %c0_346, %c0_347] : memref<4x1x128xf32, #tpu.memory_space<vmem>>, vector<1x1x128xf32>
    %731 = vector.shape_cast %730 : vector<1x1x128xf32> to vector<1x128xf32>
    %732 = vector.broadcast %731 : vector<1x128xf32> to vector<16x128xf32>
    %733 = arith.addf %729, %732 : vector<16x128xf32>
    %734 = arith.addf %566, %733 : vector<16x128xf32>
    %735 = vector.shape_cast %734 : vector<16x128xf32> to vector<1x16x128xf32>
    %c0_348 = arith.constant 0 : index
    %c0_349 = arith.constant 0 : index
    %c0_350 = arith.constant 0 : index
    %736 = vector.load %arg14[%c0_348, %c0_349, %c0_350] : memref<1x16x128xf32, #tpu.memory_space<vmem>>, vector<1x16x128xf32>
    tpu.vector_store %arg14[%c0_348, %c0_349, %c0_350], %735 {strides = array<i32>} : memref<1x16x128xf32, #tpu.memory_space<vmem>>, vector<1x16x128xf32>,
    return
  }
  func.func @transform_0(%arg0: i32) -> (i32, i32, i32) {
    %c0_i32 = arith.constant 0 : i32
    %c0_i32_0 = arith.constant 0 : i32
    %c0_i32_1 = arith.constant 0 : i32
    return %arg0, %c0_i32, %c0_i32_0 : i32, i32, i32
  }
  func.func @transform_1(%arg0: i32) -> (i32, i32, i32) {
    %c0_i32 = arith.constant 0 : i32
    %c0_i32_0 = arith.constant 0 : i32
    %c0_i32_1 = arith.constant 0 : i32
    %c0_i32_2 = arith.constant 0 : i32
    return %c0_i32, %c0_i32_0, %c0_i32_1 : i32, i32, i32
  }
  func.func @transform_2(%arg0: i32) -> (i32, i32, i32) {
    %c0_i32 = arith.constant 0 : i32
    %c0_i32_0 = arith.constant 0 : i32
    %c0_i32_1 = arith.constant 0 : i32
    %c0_i32_2 = arith.constant 0 : i32
    return %c0_i32, %c0_i32_0, %c0_i32_1 : i32, i32, i32
  }
  func.func @transform_3(%arg0: i32) -> (i32, i32, i32) {
    %c0_i32 = arith.constant 0 : i32
    %c0_i32_0 = arith.constant 0 : i32
    %c0_i32_1 = arith.constant 0 : i32
    %c0_i32_2 = arith.constant 0 : i32
    return %c0_i32, %c0_i32_0, %c0_i32_1 : i32, i32, i32
  }
  func.func @transform_4(%arg0: i32) -> (i32, i32, i32) {
    %c0_i32 = arith.constant 0 : i32
    %c0_i32_0 = arith.constant 0 : i32
    %c0_i32_1 = arith.constant 0 : i32
    %c0_i32_2 = arith.constant 0 : i32
    return %c0_i32, %c0_i32_0, %c0_i32_1 : i32, i32, i32
  }
  func.func @transform_5(%arg0: i32) -> (i32, i32, i32) {
    %c0_i32 = arith.constant 0 : i32
    %c0_i32_0 = arith.constant 0 : i32
    %c0_i32_1 = arith.constant 0 : i32
    %c0_i32_2 = arith.constant 0 : i32
    return %c0_i32, %c0_i32_0, %c0_i32_1 : i32, i32, i32
  }
  func.func @transform_6(%arg0: i32) -> (i32, i32, i32) {
    %c0_i32 = arith.constant 0 : i32
    %c0_i32_0 = arith.constant 0 : i32
    %c0_i32_1 = arith.constant 0 : i32
    %c0_i32_2 = arith.constant 0 : i32
    return %c0_i32, %c0_i32_0, %c0_i32_1 : i32, i32, i32
  }
  func.func @transform_7(%arg0: i32) -> (i32, i32, i32, i32) {
    %c0_i32 = arith.constant 0 : i32
    %c0_i32_0 = arith.constant 0 : i32
    %c0_i32_1 = arith.constant 0 : i32
    %c0_i32_2 = arith.constant 0 : i32
    %c0_i32_3 = arith.constant 0 : i32
    return %c0_i32, %c0_i32_0, %c0_i32_1, %c0_i32_2 : i32, i32, i32, i32
  }
  func.func @transform_8(%arg0: i32) -> (i32, i32, i32) {
    %c0_i32 = arith.constant 0 : i32
    %c0_i32_0 = arith.constant 0 : i32
    %c0_i32_1 = arith.constant 0 : i32
    %c0_i32_2 = arith.constant 0 : i32
    return %c0_i32, %c0_i32_0, %c0_i32_1 : i32, i32, i32
  }
  func.func @transform_9(%arg0: i32) -> (i32, i32, i32) {
    %c0_i32 = arith.constant 0 : i32
    %c0_i32_0 = arith.constant 0 : i32
    %c0_i32_1 = arith.constant 0 : i32
    %c0_i32_2 = arith.constant 0 : i32
    return %c0_i32, %c0_i32_0, %c0_i32_1 : i32, i32, i32
  }
  func.func @transform_10(%arg0: i32) -> (i32, i32, i32) {
    %c0_i32 = arith.constant 0 : i32
    %c0_i32_0 = arith.constant 0 : i32
    %c0_i32_1 = arith.constant 0 : i32
    %c0_i32_2 = arith.constant 0 : i32
    return %c0_i32, %c0_i32_0, %c0_i32_1 : i32, i32, i32
  }
  func.func @transform_11(%arg0: i32) -> (i32, i32, i32) {
    %c0_i32 = arith.constant 0 : i32
    %c0_i32_0 = arith.constant 0 : i32
    %c0_i32_1 = arith.constant 0 : i32
    %c0_i32_2 = arith.constant 0 : i32
    return %c0_i32, %c0_i32_0, %c0_i32_1 : i32, i32, i32
  }
  func.func @transform_12(%arg0: i32) -> (i32, i32, i32) {
    %c0_i32 = arith.constant 0 : i32
    %c0_i32_0 = arith.constant 0 : i32
    %c0_i32_1 = arith.constant 0 : i32
    %c0_i32_2 = arith.constant 0 : i32
    return %c0_i32, %c0_i32_0, %c0_i32_1 : i32, i32, i32
  }
  func.func @transform_13(%arg0: i32) -> (i32, i32, i32) {
    %c0_i32 = arith.constant 0 : i32
    %c0_i32_0 = arith.constant 0 : i32
    %c0_i32_1 = arith.constant 0 : i32
    return %arg0, %c0_i32, %c0_i32_0 : i32, i32, i32
  }
}

</mosaic_0001>

<bundles_post_ra>
// kernel: nano_conv.1
= control target key start
LH: loop header
LB: loop body
LE: loop exit
PB: predicated region body
PF: predicated region fallthrough
CT: control target
= control target key end

     0   :  { %s6316_s0 = inlined_call_operand.vmem [shape: f32[2,16,64], index: 0, kind: input, shape index: {}]   ;;  %s6317_s1 = inlined_call_operand.vmem [shape: f32[4,1,128], index: 1, kind: input, shape index: {}]   ;;  %s6318_s2 = inlined_call_operand.vmem [shape: f32[4,1,128], index: 2, kind: input, shape index: {}]   ;;  %s6319_s3 = inlined_call_operand.vmem [shape: bf16[4,128,128], index: 3, kind: input, shape index: {}]   ;;  %s6320_s4 = inlined_call_operand.vmem [shape: f32[4,1,128], index: 4, kind: input, shape index: {}]   ;;  %s6321_s5 = inlined_call_operand.vmem [shape: f32[4,1,128], index: 5, kind: input, shape index: {}]   ;;  %s6322_s6 = inlined_call_operand.vmem [shape: f32[4,1,128], index: 6, kind: input, shape index: {}]   ;;  %s6323_s7 = inlined_call_operand.vmem [shape: bf16[4,3,128,128], index: 7, kind: input, shape index: {}]   ;;  %s6324_s8 = inlined_call_operand.vmem [shape: f32[4,1,128], index: 8, kind: input, shape index: {}]   ;;  %s6325_s9 = inlined_call_operand.vmem [shape: f32[4,1,128], index: 9, kind: input, shape index: {}]   ;;  %s6326_s10 = inlined_call_operand.vmem [shape: f32[4,1,128], index: 10, kind: input, shape index: {}]   ;;  %s6327_s11 = inlined_call_operand.vmem [shape: bf16[4,128,128], index: 11, kind: input, shape index: {}]   ;;  %s6328_s12 = inlined_call_operand.vmem [shape: f32[4,1,128], index: 12, kind: input, shape index: {}]   ;;  %s6329_s13 = inlined_call_operand.hbm [shape: f32[2,16,128], index: 13, kind: output, shape index: {}]  }
   0x1   :  { %6330 = sst [smem:[#allocation5_spill]] %s6316_s0 }
   0x2   :  { %6331 = sst [smem:[#allocation6_spill]] %s6317_s1 }
   0x3   :  { %18 = vsyncpa [#allocation3], 0 }
   0x4   :  { %20 = vsyncpa [#allocation3 + $0x1], 0  ;;  %s5264_s25 = smov 0   ;;  %s5266_s26 = smov 0  }
   0x5   :  { %s5268_s27 = smov 0   ;;  %s5270_s28 = smov 0  }
   0x6 LB: > { %s5285_s29 = sadd.s32 4294967295, %s5186_s28   ;;  %s3711_s30 = sadd.s32 4294967294, %s5186_s28   ;;  %s5186_s28 = sphi %s5270_s28, %s6343_s28   ;;  %s5182_s27 = sphi %s5268_s27, %s6342_s27   ;;  %s5178_s26 = sphi %s5266_s26, %s6341_s26   ;;  %s5174_s25 = sphi %s5264_s25, %s6340_s25  }
   0x7   : > { %s5289_s14 = sadd.s32 1, %s5186_s28   ;;  %s311_s15 = sadd.s32 1, %s5182_s27 }
   0x8   : > { %s308_s16 = ssub.s32 %s5186_s28, %s5289_s14  ;;  %p321_p0 = scmp.ne.s32.totalorder %s5182_s27, %s5178_s26 }
   0x9   : > { %p309_p1 = scmp.eq.s32.totalorder %s308_s16, 0  ;;  %p322_p2 = scmp.eq.s32.totalorder %s5285_s29, 1 }
   0xa   : > { %p327_p3 = scmp.ne.s32.totalorder %s5178_s26, %s5174_s25  ;;  %p328_p4 = scmp.eq.s32.totalorder %s3711_s30, 1 }
   0xb   : > { %s5300_s17 = scalar_select %p309_p1, %s5182_s27, %s311_s15  }
   0xc   : > { %p5302_p5 = por %p322_p2, %p321_p0  ;;  %p5306_p6 = por %p328_p4, %p327_p3 }
   0xd   : > { %p3714_p7 = scmp.ge.s32.totalorder %s5186_s28, 1  ;;  %p390_p8 = scmp.lt.s32.totalorder %s5186_s28, 3 }
   0xf   : > { %p391_p9 = pnand %p3714_p7, %p390_p8 }
  0x10   : > { %p434_p10 = scmp.lt.s32.totalorder (!%p391_p9), %s5285_s29, 1  ;;  %vm442_vm0 = vcmask (!%p391_p9), 523264   ;;  %s6334_s0 = sld [smem:[#allocation5_spill]] (!%p391_p9)  ;;  %v4868_v6 = vld [vmem:[%s6319_s3] sm:$0xff] (!%p391_p9)   ;;  %v5188_v7 = vmov (!%p391_p9), 0.0   ;;  %v4869_v8 = vld [vmem:[%s6319_s3 + $0x8] sm:$0xff] (!%p391_p9)  }
  0x11   : > { %394 = sbr.rel (%p391_p9) target bundleno = 5159 (0x1427), region = 72  ;;  %4424 = vmatprep.subr.bf16.mxu0 (!%p391_p9), %v5188_v7  ;;  %4444 = vmatprep.subr.bf16.mxu1 (!%p391_p9), %v5188_v7  ;;  %vm5189_vm1 = vmmov (!%p391_p9), 0   ;;  %v4870_v9 = vld [vmem:[%s6319_s3 + $0x10] sm:$0xff] (!%p391_p9)   ;;  %v4871_v10 = vld [vmem:[%s6319_s3 + $0x18] sm:$0xff] (!%p391_p9)   ;;  %v4872_v11 = vld [vmem:[%s6319_s3 + $0x20] sm:$0xff] (!%p391_p9)   ;;  %s6335_s1 = sld [smem:[#allocation6_spill]] (!%p391_p9) }
  0x12   : > { %4425 = vmatpush3.bf16.msra.mxu0 (!%p391_p9), %v4868_v6  ;;  %4440 = vmatprep.mubr.msk.bf16.mxu0 (!%p391_p9), %vm5189_vm1, %v5188_v7  ;;  %v4873_v12 = vld [vmem:[%s6319_s3 + $0x28] sm:$0xff] (!%p391_p9)   ;;  %v4874_v13 = vld [vmem:[%s6319_s3 + $0x30] sm:$0xff] (!%p391_p9)   ;;  %v4875_v14 = vld [vmem:[%s6319_s3 + $0x38] sm:$0xff] (!%p391_p9)   ;;  %vm5190_vm4 = vmmov (!%p391_p9), 1   ;;  %s431_s22 = sand.u32 (!%p391_p9), 1, %s5178_s26   ;;  %s5191_s30 = smov (!%p391_p9), [#allocation2]  }
  0x13   : > { %4426 = vmatprep.subr.bf16.mxu0 (!%p391_p9), %v5188_v7  ;;  %4460 = vmatprep.mubr.msk.bf16.mxu1 (!%p391_p9), %vm5189_vm1, %v5188_v7  ;;  %v3719_v35 = vld [vmem:[%s6318_s2] ss:$0 sm:$0xff] (!%p391_p9)  ;;  %s3715_s23 = sshll.u32 (!%p391_p9), %s431_s22, 4 }
  0x14   : > { %v3720_v62 = vld [vmem:[%s6320_s4] ss:$0 sm:$0xff] (!%p391_p9)  ;;  %s433_s15 = scalar_lea.vmem (!%p391_p9), [#allocation2], %s3715_s23 }
  0x15   : > { %s3649_s16 = sshll.u32 (!%p391_p9), %s433_s15, 4  ;;  %s6267_s16 = int_to_ptr.vmem [resolvable:$true] %s3649_s16 }
  0x16   : > { %4427 = vmatpush3.bf16.msra.mxu0 (!%p391_p9), %v4869_v8  ;;  %s5124_s23 = scalar_lea.vmem (!%p391_p9), %s6267_s16, 256 }
  0x17   : > { %4428 = vmatprep.subr.bf16.mxu0 (!%p391_p9), %v5188_v7  ;;  %v3718_v33 = vld [vmem:[%s6335_s1] ss:$0 sm:$0xff] (!%p391_p9)  ;;  %p5125_p11 = scmp.ne.s32.totalorder (!%p391_p9), %s6267_s16, %s5124_s23 }
  0x18   : > { %s435_s20 = scalar_select %p434_p10, %s5285_s29, 1 }
  0x19   : > { %p5126_p12 = pnand %p5125_p11, %p5302_p5 }
  0x1a   : > { %s4242_s21 = sshll.u32 %s435_s20, 4  ;;  %4429 = vmatpush3.bf16.msra.mxu0 %v4870_v9 }
  0x1b   : > { %s438_s24 = scalar_lea.vmem %s6334_s0, %s4242_s21  ;;  %4430 = vmatprep.subr.bf16.mxu0 %v5188_v7  ;;  %s4243_s0 = sshll.u32 %s5285_s29, 8 }
  0x1c   : > { %v440_v0 = vld [vmem:[%s438_s24] sm:$0xff]  ;;  %v441_v1 = vld [vmem:[%s438_s24 + $0x8] sm:$0xff]  ;;  %s6272_s24 = scalar_lea.hbm %s6329_s13, %s4243_s0  ;;  %s6275_s29 = scalar_lea.sflag [#allocation3], %s431_s22 }
  0x1d   : > { %v5317_v2 = vsel %vm442_vm0, %v440_v0, 0.0  ;;  %v5319_v3 = vsel %vm442_vm0, %v441_v1, 0.0  ;;  %p5127_p13 = pneg %p5126_p12 }
  0x1e   : > { %522 = vadd.xlane.f32.xlu0 %v5317_v2  ;;  %v528_v4 = vmul.f32 %v5317_v2, %v5317_v2  ;;  %v529_v5 = vmul.f32 %v5319_v3, %v5319_v3  ;;  %4431 = vmatpush3.bf16.msra.mxu0 %v4871_v10  ;;  %v4876_v10 = vld [vmem:[%s6323_s7 + $0x40] sm:$0xff]  }
  0x1f   : > { %4432 = vmatprep.subr.bf16.mxu0 %v5188_v7  ;;  %4445 = vmatpush3.bf16.msra.mxu1 %v4876_v10 }
  0x20   : > { %530 = vadd.xlane.f32.xlu1 %v528_v4  ;;  %4446 = vmatprep.subr.bf16.mxu1 %v5188_v7 }
  0x22   : > { %524 = vadd.xlane.f32.xlu0 %v5319_v3  ;;  %4433 = vmatpush3.bf16.msra.mxu0 %v4872_v11  ;;  %v4877_v11 = vld [vmem:[%s6323_s7 + $0x48] sm:$0xff]  }
  0x23   : > { %4434 = vmatprep.subr.bf16.mxu0 %v5188_v7  ;;  %4447 = vmatpush3.bf16.msra.mxu1 %v4877_v11 }
  0x24   : > { %532 = vadd.xlane.f32.xlu1 %v529_v5  ;;  %4448 = vmatprep.subr.bf16.mxu1 %v5188_v7 }
  0x26   : > { %4435 = vmatpush3.bf16.msra.mxu0 %v4873_v12  ;;  %v4878_v12 = vld [vmem:[%s6323_s7] sm:$0xff]  }
  0x27   : > { %4436 = vmatprep.subr.bf16.mxu0 %v5188_v7 }
  0x2a   : > { %4437 = vmatpush3.bf16.msra.mxu0 %v4874_v13  ;;  %v4879_v13 = vld [vmem:[%s6323_s7 + $0x50] sm:$0xff]  }
  0x2b   : > { %4438 = vmatprep.subr.bf16.mxu0 %v5188_v7  ;;  %4449 = vmatpush3.bf16.msra.mxu1 %v4879_v13 }
  0x2c   : > { %4450 = vmatprep.subr.bf16.mxu1 %v5188_v7 }
  0x2e   : > { %4439 = vmatpush3.bf16.msra.mxu0 %v4875_v14  ;;  %v4880_v14 = vld [vmem:[%s6323_s7 + $0x8] sm:$0xff]  }
  0x2f   : > { %4464 = vmatprep.subr.bf16.mxu0 %v5188_v7 }
  0xab   : > { %v523_v15 = vpop.xlane.xlu0 %522 }
  0xac   : > { %v526_v16 = vmul.f32 0.015625, %v523_v15  ;;  %v4881_v15 = vld [vmem:[%s6323_s7 + $0x58] sm:$0xff]  }
  0xad   : > { %v531_v17 = vpop.xlane.xlu1 %530  ;;  %4451 = vmatpush3.bf16.msra.mxu1 %v4881_v15  ;;  %v4892_v15 = vld [vmem:[%s6323_s7 + $0x80] sm:$0xff]  }
  0xae   : > { %v536_v18 = vmul.f32 %v526_v16, %v526_v16  ;;  %v534_v19 = vmul.f32 0.015625, %v531_v17  ;;  %v542_v31 = vsub.f32 %v5317_v2, %v526_v16  ;;  %v4882_v16 = vld [vmem:[%s6323_s7 + $0x10] sm:$0xff]   ;;  %v4883_v17 = vld [vmem:[%s6323_s7 + $0x60] sm:$0xff]   ;;  %4452 = vmatprep.subr.bf16.mxu1 %v5188_v7 }
  0xaf   : > { %v525_v20 = vpop.xlane.xlu0 %524 }
  0xb0   : > { %v538_v21 = vsub.f32 %v534_v19, %v536_v18  ;;  %v527_v22 = vmul.f32 0.015625, %v525_v20  ;;  %v4884_v18 = vld [vmem:[%s6323_s7 + $0x18] sm:$0xff]   ;;  %v4885_v19 = vld [vmem:[%s6323_s7 + $0x68] sm:$0xff]   ;;  %v4886_v20 = vld [vmem:[%s6323_s7 + $0x20] sm:$0xff]  }
  0xb1   : > { %v533_v23 = vpop.xlane.xlu1 %532  ;;  %4453 = vmatpush3.bf16.msra.mxu1 %v4883_v17 }
  0xb2   : > { %v540_v24 = vmax.f32 %v538_v21, 0.0  ;;  %v537_v25 = vmul.f32 %v527_v22, %v527_v22  ;;  %v535_v26 = vmul.f32 0.015625, %v533_v23  ;;  %v543_v37 = vsub.f32 %v5319_v3, %v527_v22  ;;  %4454 = vmatprep.subr.bf16.mxu1 %v5188_v7  ;;  %v4887_v21 = vld [vmem:[%s6323_s7 + $0x70] sm:$0xff]   ;;  %v4888_v22 = vld [vmem:[%s6323_s7 + $0x28] sm:$0xff]   ;;  %v4889_v23 = vld [vmem:[%s6323_s7 + $0x78] sm:$0xff]  }
  0xb4   : > { %v544_v27 = vadd.f32 1e-05, %v540_v24  ;;  %v539_v28 = vsub.f32 %v535_v26, %v537_v25  ;;  %v4890_v24 = vld [vmem:[%s6323_s7 + $0x30] sm:$0xff]   ;;  %v4891_v25 = vld [vmem:[%s6323_s7 + $0x38] sm:$0xff]  }
  0xb5   : > { %4455 = vmatpush3.bf16.msra.mxu1 %v4885_v19 }
  0xb6   : > { %5028 = vrsqrt.f32 %v544_v27  ;;  %v541_v29 = vmax.f32 %v539_v28, 0.0  ;;  %4456 = vmatprep.subr.bf16.mxu1 %v5188_v7 }
  0xb8   : > { %v545_v30 = vadd.f32 1e-05, %v541_v29 }
  0xb9   : > { %4457 = vmatpush3.bf16.msra.mxu1 %v4887_v21  ;;  %v5016_v21 = vld [vmem:[%s6323_s7 + $0x2e0] sm:$0xff]  }
  0xba   : > { %5030 = vrsqrt.f32 %v545_v30  ;;  %4458 = vmatprep.subr.bf16.mxu1 %v5188_v7 }
  0xbd   : > { %4459 = vmatpush3.bf16.msra.mxu1 %v4889_v23  ;;  %v4893_v23 = vld [vmem:[%s6323_s7 + $0x88] sm:$0xff]  }
  0xbe   : > { %4484 = vmatprep.subr.bf16.mxu1 %v5188_v7 }
  0xc0   : > { %v5029_v32 = vpop.eup %5028 }
  0xc1   : > { %v548_v34 = vmul.f32 %v5029_v32, %v542_v31 }
  0xc3   : > { %v556_v36 = vmul.f32 %v3718_v33, %v548_v34 }
  0xc4   : > { %v5031_v38 = vpop.eup %5030 }
  0xc5   : > { %v564_v39 = vadd.f32 %v3719_v35, %v556_v36  ;;  %v549_v40 = vmul.f32 %v5031_v38, %v543_v37 }
  0xc7   : > { %v557_v41 = vmul.f32 %v3718_v33, %v549_v40  ;;  %v568_v42 = vmul.f32 0.044715, %v564_v39  ;;  %v566_v56 = vmul.f32 0.5, %v564_v39 }
  0xc9   : > { %v565_v43 = vadd.f32 %v3719_v35, %v557_v41  ;;  %v570_v44 = vmul.f32 %v568_v42, %v564_v39 }
  0xcb   : > { %v569_v45 = vmul.f32 0.044715, %v565_v43  ;;  %v572_v46 = vmul.f32 %v570_v44, %v564_v39  ;;  %v567_v57 = vmul.f32 0.5, %v565_v43  ;;  %v3729_v44 = vld [vmem:[%s6321_s5] ss:$0 sm:$0xff] }
  0xcd   : > { %v571_v47 = vmul.f32 %v569_v45, %v565_v43  ;;  %v574_v48 = vadd.f32 %v572_v46, %v564_v39 }
  0xcf   : > { %v573_v49 = vmul.f32 %v571_v47, %v565_v43  ;;  %v576_v50 = vmul.f32 0.7978846, %v574_v48  ;;  %v3730_v48 = vld [vmem:[%s6322_s6] ss:$0 sm:$0xff] }
  0xd1   : > { %v575_v51 = vadd.f32 %v573_v49, %v565_v43  ;;  %5032 = vtanh.f32 %v576_v50 }
  0xd3   : > { %v577_v52 = vmul.f32 0.7978846, %v575_v51 }
  0xd5   : > { %5034 = vtanh.f32 %v577_v52 }
  0xdb   : > { %v5033_v53 = vpop.eup %5032 }
  0xdc   : > { %v580_v54 = vadd.f32 1.0, %v5033_v53 }
  0xde   : > { %v582_v59 = vmul.f32 %v580_v54, %v566_v56 }
  0xdf   : > { %v5035_v55 = vpop.eup %5034 }
  0xe0   : > { %v581_v58 = vadd.f32 1.0, %v5035_v55 }
  0xe2   : > { %v583_v60 = vmul.f32 %v581_v58, %v567_v57 }
  0xe4   : > { %v584_v61 = vpack.c.bf16 %v583_v60, %v582_v59 }
  0xe6   : > { %4441 = vmatmul.mubr.bf16.vlgmr.msra.gmra.mrb[0].mxu0 %v584_v61 }
  0xe7   : > { %4480 = vmatprep.mubr.msk.bf16.mxu0 %vm5189_vm1, %v5188_v7  ;;  %4465 = vmatpush3.bf16.msra.mxu0 %v4878_v12 }
  0xe8   : > { %4466 = vmatprep.subr.bf16.mxu0 %v5188_v7 }
  0xeb   : > { %4467 = vmatpush3.bf16.msra.mxu0 %v4880_v14 }
  0xec   : > { %4468 = vmatprep.subr.bf16.mxu0 %v5188_v7 }
  0xef   : > { %4469 = vmatpush3.bf16.msra.mxu0 %v4882_v16 }
  0xf0   : > { %4470 = vmatprep.subr.bf16.mxu0 %v5188_v7 }
  0xf3   : > { %4471 = vmatpush3.bf16.msra.mxu0 %v4884_v18 }
  0xf4   : > { %4472 = vmatprep.subr.bf16.mxu0 %v5188_v7 }
  0xf7   : > { %4473 = vmatpush3.bf16.msra.mxu0 %v4886_v20 }
  0xf8   : > { %4474 = vmatprep.subr.bf16.mxu0 %v5188_v7 }
  0xfb   : > { %4475 = vmatpush3.bf16.msra.mxu0 %v4888_v22 }
  0xfc   : > { %4476 = vmatprep.subr.bf16.mxu0 %v5188_v7 }
  0xff   : > { %4477 = vmatpush3.bf16.msra.mxu0 %v4890_v24  ;;  %v4894_v24 = vld [vmem:[%s6323_s7 + $0x90] sm:$0xff]  }
 0x100   : > { %4478 = vmatprep.subr.bf16.mxu0 %v5188_v7 }
 0x103   : > { %4479 = vmatpush3.bf16.msra.mxu0 %v4891_v25  ;;  %v4895_v25 = vld [vmem:[%s6323_s7 + $0x98] sm:$0xff]  }
 0x104   : > { %4504 = vmatprep.subr.bf16.mxu0 %v5188_v7 }
 0x1b9   : > { %v690_v63 = vpop.f32.mrb[0].mxu0 }
 0x1ba   : > { %v5378_v0 = vadd.f32 %v3720_v62, %v690_v63  ;;  %v4442_v1 = vpop.f32.mrb[1].mxu0 }
 0x1bb   : > { %v693_v4 = vpop.f32.mrb[2].mxu0 }
 0x1bc   : > { %v5380_v5 = vadd.f32 %v3720_v62, %v693_v4  ;;  %699 = vadd.xlane.f32.xlu0 %v5378_v0  ;;  %v4443_v6 = vpop.f32.mrb[3].mxu0  ;;  %v705_v8 = vmul.f32 %v5378_v0, %v5378_v0 }
 0x1be   : > { %701 = vadd.xlane.f32.xlu1 %v5380_v5  ;;  %v706_v9 = vmul.f32 %v5380_v5, %v5380_v5 }
 0x1c0   : > { %707 = vadd.xlane.f32.xlu0 %v705_v8 }
 0x1c2   : > { %709 = vadd.xlane.f32.xlu1 %v706_v9 }
 0x249   : > { %v700_v26 = vpop.xlane.xlu0 %699 }
 0x24a   : > { %v703_v27 = vmul.f32 0.03125, %v700_v26  ;;  %v4896_v26 = vld [vmem:[%s6323_s7 + $0xa0] sm:$0xff]  }
 0x24b   : > { %v702_v28 = vpop.xlane.xlu1 %701 }
 0x24c   : > { %v704_v29 = vmul.f32 0.03125, %v702_v28  ;;  %v713_v31 = vmul.f32 %v703_v27, %v703_v27  ;;  %v719_v42 = vsub.f32 %v5378_v0, %v703_v27  ;;  %v445_v0 = vlaneseq  ;;  %v4897_v28 = vld [vmem:[%s6323_s7 + $0xa8] sm:$0xff]  }
 0x24d   : > { %v708_v30 = vpop.xlane.xlu0 %707 }
 0x24e   : > { %v711_v32 = vmul.f32 0.03125, %v708_v30  ;;  %v714_v34 = vmul.f32 %v704_v29, %v704_v29  ;;  %v720_v45 = vsub.f32 %v5380_v5, %v704_v29  ;;  %v5460_v1 = vshrl.u32 %v445_v0, 7  ;;  %v4898_v30 = vld [vmem:[%s6323_s7 + $0xb0] sm:$0xff]   ;;  %v4904_v0 = vld [vmem:[%s6327_s11 + $0x20] sm:$0xff]  }
 0x24f   : > { %v710_v33 = vpop.xlane.xlu1 %709 }
 0x250   : > { %v715_v35 = vsub.f32 %v711_v32, %v713_v31  ;;  %v712_v36 = vmul.f32 0.03125, %v710_v33  ;;  %v5463_v4 = vand.u32 15, %v5460_v1  ;;  %vm763_vm3 = vcmp.lt.s32.totalorder %v5460_v1, 1 }
 0x251   : > { %v447_v27 = vadd.s32 8, %v5460_v1  ;;  %vm987_vm6 = vcmp.lt.s32.totalorder %v5460_v1, 7  ;;  %vm1542_vm10 = vcmp.lt.s32.totalorder %v5460_v1, 2  ;;  %vm1767_vm12 = vcmp.lt.s32.totalorder %v5460_v1, 6 }
 0x252   : > { %v717_v37 = vmax.f32 %v715_v35, 0.0  ;;  %v716_v38 = vsub.f32 %v712_v36, %v714_v34  ;;  %v472_v10 = vadd.s32 4294967295, %v5463_v4  ;;  %v4899_v34 = vld [vmem:[%s6323_s7 + $0xb8] sm:$0xff]   ;;  %vm2327_vm0 = vcmp.lt.s32.totalorder %v5460_v1, 4  ;;  %v4206_v1 = vld [vmem:[%s6324_s8 + $0x3] ss:$0 sm:$0xff] }
 0x253   : > { %v5506_v29 = vand.u32 15, %v447_v27 }
 0x254   : > { %v721_v39 = vadd.f32 1e-05, %v717_v37  ;;  %v718_v40 = vmax.f32 %v716_v38, 0.0  ;;  %vm474_vm2 = vcmp.ge.s32.totalorder %v472_v10, 0 }
 0x255   : > { %vm5475_vm5 = vmpackc.low %vm5190_vm4, %vm474_vm2  ;;  %v481_v31 = vadd.s32 1, %v5506_v29 }
 0x256   : > { %5036 = vrsqrt.f32 %v721_v39  ;;  %v722_v41 = vadd.f32 1e-05, %v718_v40 }
 0x257   : > { %vm485_vm7 = vcmp.lt.s32.totalorder %v481_v31, 16 }
 0x258   : > { %5038 = vrsqrt.f32 %v722_v41  ;;  %vm5523_vm8 = vmpackc.low %vm485_vm7, %vm5190_vm4 }
 0x260   : > { %v5037_v43 = vpop.eup %5036 }
 0x261   : > { %v725_v46 = vmul.f32 %v5037_v43, %v719_v42 }
 0x262   : > { %v5039_v47 = vpop.eup %5038 }
 0x263   : > { %v733_v49 = vmul.f32 %v3729_v44, %v725_v46  ;;  %v726_v50 = vmul.f32 %v5039_v47, %v720_v45 }
 0x265   : > { %v741_v51 = vadd.f32 %v3730_v48, %v733_v49  ;;  %v734_v52 = vmul.f32 %v3729_v44, %v726_v50  ;;  %v3793_v50 = vld [vmem:[%s6324_s8] ss:$0 sm:$0xff] }
 0x267   : > { %v742_v53 = vadd.f32 %v3730_v48, %v734_v52  ;;  %v745_v54 = vmul.f32 0.044715, %v741_v51  ;;  %v743_v6 = vmul.f32 0.5, %v741_v51 }
 0x269   : > { %v746_v55 = vmul.f32 0.044715, %v742_v53  ;;  %v747_v56 = vmul.f32 %v745_v54, %v741_v51  ;;  %v744_v11 = vmul.f32 0.5, %v742_v53 }
 0x26b   : > { %v748_v57 = vmul.f32 %v746_v55, %v742_v53  ;;  %v749_v58 = vmul.f32 %v747_v56, %v741_v51 }
 0x26d   : > { %v750_v59 = vmul.f32 %v748_v57, %v742_v53  ;;  %v751_v60 = vadd.f32 %v749_v58, %v741_v51 }
 0x26f   : > { %v752_v61 = vadd.f32 %v750_v59, %v742_v53  ;;  %v753_v62 = vmul.f32 0.7978846, %v751_v60  ;;  %v4900_v60 = vld [vmem:[%s6327_s11] sm:$0xff]  }
 0x271   : > { %v754_v63 = vmul.f32 0.7978846, %v752_v61  ;;  %5040 = vtanh.f32 %v753_v62  ;;  %v4901_v61 = vld [vmem:[%s6327_s11 + $0x8] sm:$0xff]   ;;  %v4902_v62 = vld [vmem:[%s6327_s11 + $0x10] sm:$0xff]  }
 0x273   : > { %5042 = vtanh.f32 %v754_v63  ;;  %v4903_v63 = vld [vmem:[%s6327_s11 + $0x18] sm:$0xff]  }
 0x27b   : > { %v5041_v5 = vpop.eup %5040 }
 0x27c   : > { %v757_v8 = vadd.f32 1.0, %v5041_v5  ;;  %v4905_v5 = vld [vmem:[%s6327_s11 + $0x28] sm:$0xff]  }
 0x27d   : > { %v5043_v9 = vpop.eup %5042 }
 0x27e   : > { %v758_v12 = vadd.f32 1.0, %v5043_v9  ;;  %v759_v13 = vmul.f32 %v757_v8, %v743_v6  ;;  %v4906_v6 = vld [vmem:[%s6327_s11 + $0x30] sm:$0xff]   ;;  %v4907_v8 = vld [vmem:[%s6327_s11 + $0x38] sm:$0xff]  }
 0x280   : > { %v760_v14 = vmul.f32 %v758_v12, %v744_v11  ;;  %v761_v16 = vrot.slane %v759_v13, 7  ;;  %v985_v33 = vrot.slane %v759_v13, 1 }
 0x282   : > { %v762_v17 = vrot.slane %v760_v14, 7  ;;  %v789_v18 = vpack.c.bf16 %v760_v14, %v759_v13  ;;  %v986_v32 = vrot.slane %v760_v14, 1 }
 0x284   : > { %4461 = vmatmul.mubr.bf16.vlgmr.msra.gmra.mrb[0].mxu1 %v789_v18  ;;  %v764_v19 = vsel %vm763_vm3, %v761_v16, %v762_v17  ;;  %v765_v20 = vsel %vm763_vm3, %v762_v17, %v761_v16  ;;  %v988_v35 = vsel %vm987_vm6, %v985_v33, %v986_v32  ;;  %v989_v36 = vsel %vm987_vm6, %v986_v32, %v985_v33  ;;  %v3795_v33 = vld [vmem:[%s6326_s10] ss:$0 sm:$0xff] }
 0x285   : > { %4485 = vmatpush3.bf16.msra.mxu1 %v4892_v15  ;;  %v3764_v22 = vpack.c.bf16 %v764_v19, %v765_v20  ;;  %4500 = vmatprep.mubr.msk.bf16.mxu1 %vm5189_vm1, %v5188_v7  ;;  %v3791_v38 = vpack.c.bf16 %v989_v36, %v988_v35 }
 0x286   : > { %4486 = vmatprep.subr.bf16.mxu1 %v5188_v7 }
 0x287   : > { %4481 = vmatmul.mubr.msk.bf16.vlgmr.msra.gmra.mrb[4].mxu0 %vm5475_vm5, %v3764_v22 }
 0x288   : > { %4520 = vmatprep.mubr.msk.bf16.mxu0 %vm5189_vm1, %v5188_v7  ;;  %4505 = vmatpush3.bf16.msra.mxu0 %v4900_v60 }
 0x289   : > { %4487 = vmatpush3.bf16.msra.mxu1 %v4893_v23  ;;  %4506 = vmatprep.subr.bf16.mxu0 %v5188_v7 }
 0x28a   : > { %4488 = vmatprep.subr.bf16.mxu1 %v5188_v7 }
 0x28c   : > { %4507 = vmatpush3.bf16.msra.mxu0 %v4901_v61 }
 0x28d   : > { %4489 = vmatpush3.bf16.msra.mxu1 %v4894_v24  ;;  %4508 = vmatprep.subr.bf16.mxu0 %v5188_v7 }
 0x28e   : > { %4490 = vmatprep.subr.bf16.mxu1 %v5188_v7 }
 0x290   : > { %4509 = vmatpush3.bf16.msra.mxu0 %v4902_v62 }
 0x291   : > { %4491 = vmatpush3.bf16.msra.mxu1 %v4895_v25  ;;  %4510 = vmatprep.subr.bf16.mxu0 %v5188_v7 }
 0x292   : > { %4492 = vmatprep.subr.bf16.mxu1 %v5188_v7 }
 0x294   : > { %4511 = vmatpush3.bf16.msra.mxu0 %v4903_v63 }
 0x295   : > { %4493 = vmatpush3.bf16.msra.mxu1 %v4896_v26  ;;  %4512 = vmatprep.subr.bf16.mxu0 %v5188_v7 }
 0x296   : > { %4494 = vmatprep.subr.bf16.mxu1 %v5188_v7 }
 0x298   : > { %4513 = vmatpush3.bf16.msra.mxu0 %v4904_v0 }
 0x299   : > { %4495 = vmatpush3.bf16.msra.mxu1 %v4897_v28  ;;  %4514 = vmatprep.subr.bf16.mxu0 %v5188_v7  ;;  %v3794_v28 = vld [vmem:[%s6325_s9] ss:$0 sm:$0xff] }
 0x29a   : > { %4496 = vmatprep.subr.bf16.mxu1 %v5188_v7 }
 0x29c   : > { %4515 = vmatpush3.bf16.msra.mxu0 %v4905_v5 }
 0x29d   : > { %4497 = vmatpush3.bf16.msra.mxu1 %v4898_v30  ;;  %4516 = vmatprep.subr.bf16.mxu0 %v5188_v7 }
 0x29e   : > { %4498 = vmatprep.subr.bf16.mxu1 %v5188_v7 }
 0x2a0   : > { %4517 = vmatpush3.bf16.msra.mxu0 %v4906_v6 }
 0x2a1   : > { %4499 = vmatpush3.bf16.msra.mxu1 %v4899_v34  ;;  %4518 = vmatprep.subr.bf16.mxu0 %v5188_v7 }
 0x2a2   : > { %4524 = vmatprep.subr.bf16.mxu1 %v5188_v7 }
 0x2a4   : > { %4501 = vmatmul.mubr.msk.bf16.vlgmr.msra.gmra.mrb[4].mxu1 %vm5523_vm8, %v3791_v38  ;;  %4519 = vmatpush3.bf16.msra.mxu0 %v4907_v8 }
 0x2a5   : > { %4540 = vmatprep.mubr.msk.bf16.mxu1 %vm5189_vm1, %v5188_v7  ;;  %4544 = vmatprep.subr.bf16.mxu0 %v5188_v7 }
 0x357   : > { %v889_v39 = vpop.f32.mrb[0].mxu1 }
 0x358   : > { %v4462_v40 = vpop.f32.mrb[1].mxu1 }
 0x359   : > { %v892_v41 = vpop.f32.mrb[2].mxu1 }
 0x35a   : > { %v4463_v42 = vpop.f32.mrb[3].mxu1  ;;  %v978_v43 = vpop.f32.mrb[4].mxu0 }
 0x35b   : > { %v979_v44 = vadd.f32 %v978_v43, %v889_v39  ;;  %v4482_v45 = vpop.f32.mrb[5].mxu0 }
 0x35c   : > { %v981_v46 = vpop.f32.mrb[6].mxu0 }
 0x35d   : > { %v982_v47 = vadd.f32 %v981_v46, %v892_v41  ;;  %v4483_v48 = vpop.f32.mrb[7].mxu0 }
 0x377   : > { %v1096_v49 = vpop.f32.mrb[4].mxu1 }
 0x378   : > { %v1103_v51 = vadd.f32 %v1096_v49, %v979_v44  ;;  %v4502_v52 = vpop.f32.mrb[5].mxu1 }
 0x379   : > { %v1099_v53 = vpop.f32.mrb[6].mxu1 }
 0x37a   : > { %v1112_v54 = vadd.f32 %v3793_v50, %v1103_v51  ;;  %v1104_v55 = vadd.f32 %v1099_v53, %v982_v47  ;;  %v4503_v56 = vpop.f32.mrb[7].mxu1 }
 0x37c   : > { %v1113_v57 = vadd.f32 %v3793_v50, %v1104_v55  ;;  %1116 = vadd.xlane.f32.xlu0 %v1112_v54  ;;  %v1122_v58 = vmul.f32 %v1112_v54, %v1112_v54 }
 0x37e   : > { %1118 = vadd.xlane.f32.xlu1 %v1113_v57  ;;  %v1123_v59 = vmul.f32 %v1113_v57, %v1113_v57 }
 0x380   : > { %1124 = vadd.xlane.f32.xlu0 %v1122_v58 }
 0x382   : > { %1126 = vadd.xlane.f32.xlu1 %v1123_v59  ;;  %v3796_v59 = vld [vmem:[%s6328_s12] ss:$0 sm:$0xff] }
 0x409   : > { %v1117_v9 = vpop.xlane.xlu0 %1116 }
 0x40a   : > { %v1120_v10 = vmul.f32 0.03125, %v1117_v9 }
 0x40b   : > { %v1119_v11 = vpop.xlane.xlu1 %1118 }
 0x40c   : > { %v1121_v12 = vmul.f32 0.03125, %v1119_v11  ;;  %v1130_v14 = vmul.f32 %v1120_v10, %v1120_v10  ;;  %v1136_v26 = vsub.f32 %v1112_v54, %v1120_v10  ;;  %v4910_v11 = vld [vmem:[%s6319_s3 + $0x50] sm:$0xff]  }
 0x40d   : > { %v1125_v13 = vpop.xlane.xlu0 %1124 }
 0x40e   : > { %v1128_v15 = vmul.f32 0.03125, %v1125_v13  ;;  %v1131_v17 = vmul.f32 %v1121_v12, %v1121_v12  ;;  %v1137_v30 = vsub.f32 %v1113_v57, %v1121_v12  ;;  %v4911_v12 = vld [vmem:[%s6319_s3 + $0x58] sm:$0xff]   ;;  %v4912_v13 = vld [vmem:[%s6319_s3 + $0x60] sm:$0xff]  }
 0x40f   : > { %v1127_v16 = vpop.xlane.xlu1 %1126 }
 0x410   : > { %v1132_v18 = vsub.f32 %v1128_v15, %v1130_v14  ;;  %v1129_v19 = vmul.f32 0.03125, %v1127_v16  ;;  %v4913_v14 = vld [vmem:[%s6319_s3 + $0x68] sm:$0xff]   ;;  %v4914_v15 = vld [vmem:[%s6319_s3 + $0x70] sm:$0xff]   ;;  %v4915_v16 = vld [vmem:[%s6319_s3 + $0x78] sm:$0xff]  }
 0x412   : > { %v1134_v20 = vmax.f32 %v1132_v18, 0.0  ;;  %v1133_v22 = vsub.f32 %v1129_v19, %v1131_v17 }
 0x414   : > { %v1138_v23 = vadd.f32 1e-05, %v1134_v20  ;;  %v1135_v24 = vmax.f32 %v1133_v22, 0.0 }
 0x416   : > { %5044 = vrsqrt.f32 %v1138_v23  ;;  %v1139_v25 = vadd.f32 1e-05, %v1135_v24 }
 0x418   : > { %5046 = vrsqrt.f32 %v1139_v25 }
 0x420   : > { %v5045_v27 = vpop.eup %5044 }
 0x421   : > { %v1142_v31 = vmul.f32 %v5045_v27, %v1136_v26 }
 0x422   : > { %v5047_v32 = vpop.eup %5046 }
 0x423   : > { %v1150_v34 = vmul.f32 %v3794_v28, %v1142_v31  ;;  %v1143_v35 = vmul.f32 %v5047_v32, %v1137_v30 }
 0x425   : > { %v1158_v36 = vadd.f32 %v3795_v33, %v1150_v34  ;;  %v1151_v38 = vmul.f32 %v3794_v28, %v1143_v35 }
 0x427   : > { %v1159_v39 = vadd.f32 %v3795_v33, %v1151_v38  ;;  %v1162_v40 = vmul.f32 0.044715, %v1158_v36  ;;  %v1160_v53 = vmul.f32 0.5, %v1158_v36  ;;  %v3807_v38 = vld [vmem:[%s6335_s1 + $0x1] ss:$0 sm:$0xff] }
 0x429   : > { %v1163_v41 = vmul.f32 0.044715, %v1159_v39  ;;  %v1164_v42 = vmul.f32 %v1162_v40, %v1158_v36  ;;  %v1161_v54 = vmul.f32 0.5, %v1159_v39 }
 0x42b   : > { %v1165_v43 = vmul.f32 %v1163_v41, %v1159_v39  ;;  %v1166_v44 = vmul.f32 %v1164_v42, %v1158_v36  ;;  %v3808_v42 = vld [vmem:[%s6318_s2 + $0x1] ss:$0 sm:$0xff] }
 0x42d   : > { %v1167_v45 = vmul.f32 %v1165_v43, %v1159_v39  ;;  %v1168_v46 = vadd.f32 %v1166_v44, %v1158_v36 }
 0x42f   : > { %v1169_v47 = vadd.f32 %v1167_v45, %v1159_v39  ;;  %v1170_v48 = vmul.f32 0.7978846, %v1168_v46 }
 0x431   : > { %v1171_v49 = vmul.f32 0.7978846, %v1169_v47  ;;  %5048 = vtanh.f32 %v1170_v48 }
 0x433   : > { %5050 = vtanh.f32 %v1171_v49 }
 0x43b   : > { %v5049_v50 = vpop.eup %5048 }
 0x43c   : > { %v1174_v51 = vadd.f32 1.0, %v5049_v50 }
 0x43d   : > { %v5051_v52 = vpop.eup %5050 }
 0x43e   : > { %v1175_v55 = vadd.f32 1.0, %v5051_v52  ;;  %v1176_v56 = vmul.f32 %v1174_v51, %v1160_v53 }
 0x440   : > { %v1177_v57 = vmul.f32 %v1175_v55, %v1161_v54 }
 0x442   : > { %v1178_v58 = vpack.c.bf16 %v1177_v57, %v1176_v56 }
 0x444   : > { %4521 = vmatmul.mubr.bf16.vlgmr.msra.gmra.mrb[8].mxu0 %v1178_v58 }
 0x445   : > { %4560 = vmatprep.mubr.msk.bf16.mxu0 %vm5189_vm1, %v5188_v7 }
 0x517   : > { %v1284_v60 = vpop.f32.mrb[8].mxu0 }
 0x518   : > { %v1285_v61 = vadd.f32 %v3796_v59, %v1284_v60  ;;  %v4522_v62 = vpop.f32.mrb[9].mxu0 }
 0x519   : > { %v1287_v63 = vpop.f32.mrb[10].mxu0 }
 0x51a   : > { %v5579_v0 = vadd.f32 %v1285_v61, %v5317_v2  ;;  %v1288_v5 = vadd.f32 %v3796_v59, %v1287_v63  ;;  %v4523_v6 = vpop.f32.mrb[11].mxu0  ;;  %v4908_v2 = vld [vmem:[%s6319_s3 + $0x40] sm:$0xff]  }
 0x51b   : > { %4525 = vmatpush3.bf16.msra.mxu1 %v4908_v2 }
 0x51c   : > { %v5582_v8 = vadd.f32 %v1288_v5, %v5319_v3  ;;  %1297 = vadd.xlane.f32.xlu0 %v5579_v0  ;;  %v1303_v9 = vmul.f32 %v5579_v0, %v5579_v0  ;;  %4526 = vmatprep.subr.bf16.mxu1 %v5188_v7  ;;  %v4909_v3 = vld [vmem:[%s6319_s3 + $0x48] sm:$0xff]  }
 0x51e   : > { %1299 = vadd.xlane.f32.xlu1 %v5582_v8  ;;  %v1304_v10 = vmul.f32 %v5582_v8, %v5582_v8 }
 0x51f   : > { %4527 = vmatpush3.bf16.msra.mxu1 %v4909_v3 }
 0x520   : > { %1305 = vadd.xlane.f32.xlu0 %v1303_v9  ;;  %4528 = vmatprep.subr.bf16.mxu1 %v5188_v7 }
 0x522   : > { %1307 = vadd.xlane.f32.xlu1 %v1304_v10  ;;  %v3826_v10 = vld [vmem:[%s6320_s4 + $0x1] ss:$0 sm:$0xff] }
 0x523   : > { %4529 = vmatpush3.bf16.msra.mxu1 %v4910_v11 }
 0x524   : > { %4530 = vmatprep.subr.bf16.mxu1 %v5188_v7 }
 0x527   : > { %4531 = vmatpush3.bf16.msra.mxu1 %v4911_v12 }
 0x528   : > { %4532 = vmatprep.subr.bf16.mxu1 %v5188_v7 }
 0x52b   : > { %4533 = vmatpush3.bf16.msra.mxu1 %v4912_v13 }
 0x52c   : > { %4534 = vmatprep.subr.bf16.mxu1 %v5188_v7 }
 0x52f   : > { %4535 = vmatpush3.bf16.msra.mxu1 %v4913_v14 }
 0x530   : > { %4536 = vmatprep.subr.bf16.mxu1 %v5188_v7 }
 0x533   : > { %4537 = vmatpush3.bf16.msra.mxu1 %v4914_v15 }
 0x534   : > { %4538 = vmatprep.subr.bf16.mxu1 %v5188_v7 }
 0x537   : > { %4539 = vmatpush3.bf16.msra.mxu1 %v4915_v16 }
 0x538   : > { %4564 = vmatprep.subr.bf16.mxu1 %v5188_v7 }
 0x5a9   : > { %v1298_v17 = vpop.xlane.xlu0 %1297 }
 0x5aa   : > { %v1301_v18 = vmul.f32 0.015625, %v1298_v17  ;;  %v4916_v17 = vld [vmem:[%s6323_s7 + $0x100] sm:$0xff]  }
 0x5ab   : > { %v1300_v19 = vpop.xlane.xlu1 %1299  ;;  %4545 = vmatpush3.bf16.msra.mxu0 %v4916_v17 }
 0x5ac   : > { %v1302_v20 = vmul.f32 0.015625, %v1300_v19  ;;  %v1311_v23 = vmul.f32 %v1301_v18, %v1301_v18  ;;  %v1317_v35 = vsub.f32 %v5579_v0, %v1301_v18  ;;  %4546 = vmatprep.subr.bf16.mxu0 %v5188_v7  ;;  %v4917_v18 = vld [vmem:[%s6323_s7 + $0x108] sm:$0xff]   ;;  %v4918_v19 = vld [vmem:[%s6323_s7 + $0xc0] sm:$0xff]  }
 0x5ad   : > { %v1306_v22 = vpop.xlane.xlu0 %1305 }
 0x5ae   : > { %v1309_v24 = vmul.f32 0.015625, %v1306_v22  ;;  %v1312_v26 = vmul.f32 %v1302_v20, %v1302_v20  ;;  %v1318_v39 = vsub.f32 %v5582_v8, %v1302_v20  ;;  %v4919_v20 = vld [vmem:[%s6323_s7 + $0x110] sm:$0xff]   ;;  %v4920_v22 = vld [vmem:[%s6323_s7 + $0xc8] sm:$0xff]  }
 0x5af   : > { %v1308_v25 = vpop.xlane.xlu1 %1307  ;;  %4547 = vmatpush3.bf16.msra.mxu0 %v4917_v18 }
 0x5b0   : > { %v1313_v27 = vsub.f32 %v1309_v24, %v1311_v23  ;;  %v1310_v28 = vmul.f32 0.015625, %v1308_v25  ;;  %4548 = vmatprep.subr.bf16.mxu0 %v5188_v7  ;;  %v4921_v23 = vld [vmem:[%s6323_s7 + $0x118] sm:$0xff]   ;;  %v4922_v24 = vld [vmem:[%s6323_s7 + $0xd0] sm:$0xff]   ;;  %v4923_v25 = vld [vmem:[%s6323_s7 + $0x120] sm:$0xff]  }
 0x5b2   : > { %v1315_v30 = vmax.f32 %v1313_v27, 0.0  ;;  %v1314_v31 = vsub.f32 %v1310_v28, %v1312_v26  ;;  %v4924_v26 = vld [vmem:[%s6323_s7 + $0xd8] sm:$0xff]   ;;  %v4925_v27 = vld [vmem:[%s6323_s7 + $0x128] sm:$0xff]   ;;  %v4926_v28 = vld [vmem:[%s6323_s7 + $0xe0] sm:$0xff]  }
 0x5b3   : > { %4549 = vmatpush3.bf16.msra.mxu0 %v4919_v20 }
 0x5b4   : > { %v1319_v32 = vadd.f32 1e-05, %v1315_v30  ;;  %v1316_v33 = vmax.f32 %v1314_v31, 0.0  ;;  %4550 = vmatprep.subr.bf16.mxu0 %v5188_v7  ;;  %v4927_v30 = vld [vmem:[%s6323_s7 + $0x130] sm:$0xff]   ;;  %v4928_v31 = vld [vmem:[%s6323_s7 + $0xe8] sm:$0xff]  }
 0x5b6   : > { %5052 = vrsqrt.f32 %v1319_v32  ;;  %v1320_v34 = vadd.f32 1e-05, %v1316_v33  ;;  %v4929_v32 = vld [vmem:[%s6323_s7 + $0x138] sm:$0xff]   ;;  %v4930_v33 = vld [vmem:[%s6323_s7 + $0xf0] sm:$0xff]  }
 0x5b7   : > { %4551 = vmatpush3.bf16.msra.mxu0 %v4921_v23 }
 0x5b8   : > { %5054 = vrsqrt.f32 %v1320_v34  ;;  %4552 = vmatprep.subr.bf16.mxu0 %v5188_v7  ;;  %v4931_v34 = vld [vmem:[%s6323_s7 + $0xf8] sm:$0xff]  }
 0x5bb   : > { %4553 = vmatpush3.bf16.msra.mxu0 %v4923_v25  ;;  %v4932_v25 = vld [vmem:[%s6323_s7 + $0x140] sm:$0xff]  }
 0x5bc   : > { %4554 = vmatprep.subr.bf16.mxu0 %v5188_v7 }
 0x5bf   : > { %4555 = vmatpush3.bf16.msra.mxu0 %v4925_v27 }
 0x5c0   : > { %v5053_v36 = vpop.eup %5052  ;;  %4556 = vmatprep.subr.bf16.mxu0 %v5188_v7 }
 0x5c1   : > { %v1323_v40 = vmul.f32 %v5053_v36, %v1317_v35 }
 0x5c2   : > { %v5055_v41 = vpop.eup %5054 }
 0x5c3   : > { %v1331_v43 = vmul.f32 %v3807_v38, %v1323_v40  ;;  %v1324_v44 = vmul.f32 %v5055_v41, %v1318_v39  ;;  %4557 = vmatpush3.bf16.msra.mxu0 %v4927_v30 }
 0x5c4   : > { %4558 = vmatprep.subr.bf16.mxu0 %v5188_v7 }
 0x5c5   : > { %v1339_v45 = vadd.f32 %v3808_v42, %v1331_v43  ;;  %v1332_v46 = vmul.f32 %v3807_v38, %v1324_v44 }
 0x5c7   : > { %v1340_v47 = vadd.f32 %v3808_v42, %v1332_v46  ;;  %v1343_v48 = vmul.f32 0.044715, %v1339_v45  ;;  %v1341_v61 = vmul.f32 0.5, %v1339_v45  ;;  %4559 = vmatpush3.bf16.msra.mxu0 %v4929_v32 }
 0x5c8   : > { %4584 = vmatprep.subr.bf16.mxu0 %v5188_v7 }
 0x5c9   : > { %v1344_v49 = vmul.f32 0.044715, %v1340_v47  ;;  %v1345_v50 = vmul.f32 %v1343_v48, %v1339_v45  ;;  %v1342_v62 = vmul.f32 0.5, %v1340_v47 }
 0x5cb   : > { %v1346_v51 = vmul.f32 %v1344_v49, %v1340_v47  ;;  %v1347_v52 = vmul.f32 %v1345_v50, %v1339_v45 }
 0x5cd   : > { %v1348_v53 = vmul.f32 %v1346_v51, %v1340_v47  ;;  %v1349_v54 = vadd.f32 %v1347_v52, %v1339_v45 }
 0x5cf   : > { %v1350_v55 = vadd.f32 %v1348_v53, %v1340_v47  ;;  %v1351_v56 = vmul.f32 0.7978846, %v1349_v54  ;;  %v3837_v54 = vld [vmem:[%s6321_s5 + $0x1] ss:$0 sm:$0xff] }
 0x5d1   : > { %v1352_v57 = vmul.f32 0.7978846, %v1350_v55  ;;  %5056 = vtanh.f32 %v1351_v56 }
 0x5d3   : > { %5058 = vtanh.f32 %v1352_v57 }
 0x5db   : > { %v5057_v58 = vpop.eup %5056 }
 0x5dc   : > { %v1355_v59 = vadd.f32 1.0, %v5057_v58  ;;  %v3838_v58 = vld [vmem:[%s6322_s6 + $0x1] ss:$0 sm:$0xff] }
 0x5dd   : > { %v5059_v60 = vpop.eup %5058 }
 0x5de   : > { %v1356_v63 = vadd.f32 1.0, %v5059_v60  ;;  %v1357_v5 = vmul.f32 %v1355_v59, %v1341_v61 }
 0x5e0   : > { %v1358_v6 = vmul.f32 %v1356_v63, %v1342_v62 }
 0x5e2   : > { %v1359_v9 = vpack.c.bf16 %v1358_v6, %v1357_v5 }
 0x5e4   : > { %4541 = vmatmul.mubr.bf16.vlgmr.msra.gmra.mrb[8].mxu1 %v1359_v9 }
 0x5e5   : > { %4580 = vmatprep.mubr.msk.bf16.mxu1 %vm5189_vm1, %v5188_v7  ;;  %4565 = vmatpush3.bf16.msra.mxu1 %v4918_v19  ;;  %v488_v19 = vadd.s32 4294967294, %v5463_v4 }
 0x5e6   : > { %4566 = vmatprep.subr.bf16.mxu1 %v5188_v7 }
 0x5e7   : > { %vm490_vm9 = vcmp.ge.s32.totalorder %v488_v19, 0 }
 0x5e8   : > { %vm3887_vm11 = vmpackc.low %vm5190_vm4, %vm490_vm9 }
 0x5e9   : > { %4567 = vmatpush3.bf16.msra.mxu1 %v4920_v22 }
 0x5ea   : > { %4568 = vmatprep.subr.bf16.mxu1 %v5188_v7 }
 0x5ed   : > { %4569 = vmatpush3.bf16.msra.mxu1 %v4922_v24 }
 0x5ee   : > { %4570 = vmatprep.subr.bf16.mxu1 %v5188_v7 }
 0x5f1   : > { %4571 = vmatpush3.bf16.msra.mxu1 %v4924_v26 }
 0x5f2   : > { %4572 = vmatprep.subr.bf16.mxu1 %v5188_v7 }
 0x5f5   : > { %4573 = vmatpush3.bf16.msra.mxu1 %v4926_v28 }
 0x5f6   : > { %4574 = vmatprep.subr.bf16.mxu1 %v5188_v7 }
 0x5f9   : > { %4575 = vmatpush3.bf16.msra.mxu1 %v4928_v31 }
 0x5fa   : > { %4576 = vmatprep.subr.bf16.mxu1 %v5188_v7 }
 0x5fd   : > { %4577 = vmatpush3.bf16.msra.mxu1 %v4930_v33  ;;  %v4933_v33 = vld [vmem:[%s6323_s7 + $0x148] sm:$0xff]  }
 0x5fe   : > { %4578 = vmatprep.subr.bf16.mxu1 %v5188_v7 }
 0x601   : > { %4579 = vmatpush3.bf16.msra.mxu1 %v4931_v34  ;;  %v4934_v34 = vld [vmem:[%s6323_s7 + $0x150] sm:$0xff]  }
 0x602   : > { %4604 = vmatprep.subr.bf16.mxu1 %v5188_v7 }
 0x6b7   : > { %v1467_v2 = vpop.f32.mrb[8].mxu1 }
 0x6b8   : > { %v5635_v3 = vadd.f32 %v3826_v10, %v1467_v2  ;;  %v4542_v11 = vpop.f32.mrb[9].mxu1 }
 0x6b9   : > { %v1470_v12 = vpop.f32.mrb[10].mxu1 }
 0x6ba   : > { %v5637_v13 = vadd.f32 %v3826_v10, %v1470_v12  ;;  %1478 = vadd.xlane.f32.xlu0 %v5635_v3  ;;  %v4543_v14 = vpop.f32.mrb[11].mxu1  ;;  %v1484_v15 = vmul.f32 %v5635_v3, %v5635_v3 }
 0x6bc   : > { %1480 = vadd.xlane.f32.xlu1 %v5637_v13  ;;  %v1485_v16 = vmul.f32 %v5637_v13, %v5637_v13 }
 0x6be   : > { %1486 = vadd.xlane.f32.xlu0 %v1484_v15 }
 0x6c0   : > { %1488 = vadd.xlane.f32.xlu1 %v1485_v16 }
 0x747   : > { %v1479_v35 = vpop.xlane.xlu0 %1478 }
 0x748   : > { %v1482_v36 = vmul.f32 0.03125, %v1479_v35  ;;  %v4935_v35 = vld [vmem:[%s6323_s7 + $0x158] sm:$0xff]  }
 0x749   : > { %v1481_v38 = vpop.xlane.xlu1 %1480 }
 0x74a   : > { %v1483_v39 = vmul.f32 0.03125, %v1481_v38  ;;  %v1492_v41 = vmul.f32 %v1482_v36, %v1482_v36  ;;  %v1498_v52 = vsub.f32 %v5635_v3, %v1482_v36  ;;  %v4936_v36 = vld [vmem:[%s6323_s7 + $0x160] sm:$0xff]   ;;  %v4937_v38 = vld [vmem:[%s6323_s7 + $0x168] sm:$0xff]  }
 0x74b   : > { %v1487_v40 = vpop.xlane.xlu0 %1486 }
 0x74c   : > { %v1490_v42 = vmul.f32 0.03125, %v1487_v40  ;;  %v1493_v44 = vmul.f32 %v1483_v39, %v1483_v39  ;;  %v1499_v55 = vsub.f32 %v5637_v13, %v1483_v39  ;;  %v4938_v39 = vld [vmem:[%s6323_s7 + $0x170] sm:$0xff]   ;;  %v497_v40 = vadd.s32 2, %v5506_v29 }
 0x74d   : > { %v1489_v43 = vpop.xlane.xlu1 %1488 }
 0x74e   : > { %v1494_v45 = vsub.f32 %v1490_v42, %v1492_v41  ;;  %v1491_v46 = vmul.f32 0.03125, %v1489_v43  ;;  %v4939_v43 = vld [vmem:[%s6323_s7 + $0x178] sm:$0xff]   ;;  %vm501_vm13 = vcmp.lt.s32.totalorder %v497_v40, 16 }
 0x74f   : > { %vm3914_vm14 = vmpackc.low %vm501_vm13, %vm5190_vm4 }
 0x750   : > { %v1496_v47 = vmax.f32 %v1494_v45, 0.0  ;;  %v1495_v48 = vsub.f32 %v1491_v46, %v1493_v44 }
 0x752   : > { %v1500_v49 = vadd.f32 1e-05, %v1496_v47  ;;  %v1497_v50 = vmax.f32 %v1495_v48, 0.0 }
 0x754   : > { %5060 = vrsqrt.f32 %v1500_v49  ;;  %v1501_v51 = vadd.f32 1e-05, %v1497_v50 }
 0x756   : > { %5062 = vrsqrt.f32 %v1501_v51 }
 0x75e   : > { %v5061_v53 = vpop.eup %5060 }
 0x75f   : > { %v1504_v56 = vmul.f32 %v5061_v53, %v1498_v52 }
 0x760   : > { %v5063_v57 = vpop.eup %5062 }
 0x761   : > { %v1512_v59 = vmul.f32 %v3837_v54, %v1504_v56  ;;  %v1505_v60 = vmul.f32 %v5063_v57, %v1499_v55 }
 0x763   : > { %v1520_v61 = vadd.f32 %v3838_v58, %v1512_v59  ;;  %v1513_v62 = vmul.f32 %v3837_v54, %v1505_v60 }
 0x765   : > { %v1521_v63 = vadd.f32 %v3838_v58, %v1513_v62  ;;  %v1524_v5 = vmul.f32 0.044715, %v1520_v61  ;;  %v1522_v16 = vmul.f32 0.5, %v1520_v61  ;;  %v3918_v58 = vld [vmem:[%s6324_s8 + $0x1] ss:$0 sm:$0xff] }
 0x767   : > { %v1525_v6 = vmul.f32 0.044715, %v1521_v63  ;;  %v1526_v9 = vmul.f32 %v1524_v5, %v1520_v61  ;;  %v1523_v20 = vmul.f32 0.5, %v1521_v63 }
 0x769   : > { %v1527_v10 = vmul.f32 %v1525_v6, %v1521_v63  ;;  %v1528_v2 = vmul.f32 %v1526_v9, %v1520_v61 }
 0x76b   : > { %v1529_v3 = vmul.f32 %v1527_v10, %v1521_v63  ;;  %v1530_v11 = vadd.f32 %v1528_v2, %v1520_v61  ;;  %v4940_v2 = vld [vmem:[%s6327_s11 + $0x40] sm:$0xff]  }
 0x76d   : > { %v1531_v12 = vadd.f32 %v1529_v3, %v1521_v63  ;;  %v1532_v13 = vmul.f32 0.7978846, %v1530_v11  ;;  %v4941_v3 = vld [vmem:[%s6327_s11 + $0x48] sm:$0xff]   ;;  %v4942_v11 = vld [vmem:[%s6327_s11 + $0x50] sm:$0xff]  }
 0x76f   : > { %v1533_v14 = vmul.f32 0.7978846, %v1531_v12  ;;  %5064 = vtanh.f32 %v1532_v13  ;;  %v4943_v12 = vld [vmem:[%s6327_s11 + $0x58] sm:$0xff]   ;;  %v4944_v13 = vld [vmem:[%s6327_s11 + $0x60] sm:$0xff]  }
 0x771   : > { %5066 = vtanh.f32 %v1533_v14  ;;  %v4945_v14 = vld [vmem:[%s6327_s11 + $0x68] sm:$0xff]  }
 0x779   : > { %v5065_v15 = vpop.eup %5064 }
 0x77a   : > { %v1536_v17 = vadd.f32 1.0, %v5065_v15  ;;  %v4946_v15 = vld [vmem:[%s6327_s11 + $0x70] sm:$0xff]  }
 0x77b   : > { %v5067_v18 = vpop.eup %5066 }
 0x77c   : > { %v1537_v22 = vadd.f32 1.0, %v5067_v18  ;;  %v1538_v23 = vmul.f32 %v1536_v17, %v1522_v16  ;;  %v4947_v16 = vld [vmem:[%s6327_s11 + $0x78] sm:$0xff]  }
 0x77e   : > { %v1539_v24 = vmul.f32 %v1537_v22, %v1523_v20  ;;  %v1540_v26 = vrot.slane %v1538_v23, 6  ;;  %v1765_v42 = vrot.slane %v1538_v23, 2 }
 0x780   : > { %v1541_v27 = vrot.slane %v1539_v24, 6  ;;  %v1569_v28 = vpack.c.bf16 %v1539_v24, %v1538_v23  ;;  %v1766_v41 = vrot.slane %v1539_v24, 2 }
 0x782   : > { %4561 = vmatmul.mubr.bf16.vlgmr.msra.gmra.mrb[12].mxu0 %v1569_v28  ;;  %v1543_v30 = vsel %vm1542_vm10, %v1540_v26, %v1541_v27  ;;  %v1544_v31 = vsel %vm1542_vm10, %v1541_v27, %v1540_v26  ;;  %v1768_v44 = vsel %vm1767_vm12, %v1765_v42, %v1766_v41  ;;  %v1769_v45 = vsel %vm1767_vm12, %v1766_v41, %v1765_v42  ;;  %v3922_v42 = vld [vmem:[%s6326_s10 + $0x1] ss:$0 sm:$0xff] }
 0x783   : > { %4585 = vmatpush3.bf16.msra.mxu0 %v4932_v25  ;;  %v3888_v32 = vpack.c.bf16 %v1543_v30, %v1544_v31  ;;  %4600 = vmatprep.mubr.msk.bf16.mxu0 %vm5189_vm1, %v5188_v7  ;;  %v3915_v46 = vpack.c.bf16 %v1769_v45, %v1768_v44 }
 0x784   : > { %4586 = vmatprep.subr.bf16.mxu0 %v5188_v7 }
 0x785   : > { %4581 = vmatmul.mubr.msk.bf16.vlgmr.msra.gmra.mrb[12].mxu1 %vm3887_vm11, %v3888_v32 }
 0x786   : > { %4620 = vmatprep.mubr.msk.bf16.mxu1 %vm5189_vm1, %v5188_v7  ;;  %4605 = vmatpush3.bf16.msra.mxu1 %v4940_v2 }
 0x787   : > { %4587 = vmatpush3.bf16.msra.mxu0 %v4933_v33  ;;  %4606 = vmatprep.subr.bf16.mxu1 %v5188_v7 }
 0x788   : > { %4588 = vmatprep.subr.bf16.mxu0 %v5188_v7 }
 0x78a   : > { %4607 = vmatpush3.bf16.msra.mxu1 %v4941_v3 }
 0x78b   : > { %4589 = vmatpush3.bf16.msra.mxu0 %v4934_v34  ;;  %4608 = vmatprep.subr.bf16.mxu1 %v5188_v7 }
 0x78c   : > { %4590 = vmatprep.subr.bf16.mxu0 %v5188_v7 }
 0x78e   : > { %4609 = vmatpush3.bf16.msra.mxu1 %v4942_v11 }
 0x78f   : > { %4591 = vmatpush3.bf16.msra.mxu0 %v4935_v35  ;;  %4610 = vmatprep.subr.bf16.mxu1 %v5188_v7 }
 0x790   : > { %4592 = vmatprep.subr.bf16.mxu0 %v5188_v7 }
 0x792   : > { %4611 = vmatpush3.bf16.msra.mxu1 %v4943_v12 }
 0x793   : > { %4593 = vmatpush3.bf16.msra.mxu0 %v4936_v36  ;;  %4612 = vmatprep.subr.bf16.mxu1 %v5188_v7 }
 0x794   : > { %4594 = vmatprep.subr.bf16.mxu0 %v5188_v7 }
 0x796   : > { %4613 = vmatpush3.bf16.msra.mxu1 %v4944_v13 }
 0x797   : > { %4595 = vmatpush3.bf16.msra.mxu0 %v4937_v38  ;;  %4614 = vmatprep.subr.bf16.mxu1 %v5188_v7  ;;  %v3921_v38 = vld [vmem:[%s6325_s9 + $0x1] ss:$0 sm:$0xff] }
 0x798   : > { %4596 = vmatprep.subr.bf16.mxu0 %v5188_v7 }
 0x79a   : > { %4615 = vmatpush3.bf16.msra.mxu1 %v4945_v14 }
 0x79b   : > { %4597 = vmatpush3.bf16.msra.mxu0 %v4938_v39  ;;  %4616 = vmatprep.subr.bf16.mxu1 %v5188_v7 }
 0x79c   : > { %4598 = vmatprep.subr.bf16.mxu0 %v5188_v7 }
 0x79e   : > { %4617 = vmatpush3.bf16.msra.mxu1 %v4946_v15 }
 0x79f   : > { %4599 = vmatpush3.bf16.msra.mxu0 %v4939_v43  ;;  %4618 = vmatprep.subr.bf16.mxu1 %v5188_v7 }
 0x7a0   : > { %4624 = vmatprep.subr.bf16.mxu0 %v5188_v7 }
 0x7a2   : > { %4601 = vmatmul.mubr.msk.bf16.vlgmr.msra.gmra.mrb[16].mxu0 %vm3914_vm14, %v3915_v46  ;;  %4619 = vmatpush3.bf16.msra.mxu1 %v4947_v16 }
 0x7a3   : > { %4640 = vmatprep.mubr.msk.bf16.mxu0 %vm5189_vm1, %v5188_v7  ;;  %4644 = vmatprep.subr.bf16.mxu1 %v5188_v7 }
 0x855   : > { %v1669_v47 = vpop.f32.mrb[12].mxu0 }
 0x856   : > { %v4562_v48 = vpop.f32.mrb[13].mxu0 }
 0x857   : > { %v1672_v49 = vpop.f32.mrb[14].mxu0 }
 0x858   : > { %v4563_v50 = vpop.f32.mrb[15].mxu0  ;;  %v1758_v51 = vpop.f32.mrb[12].mxu1 }
 0x859   : > { %v1759_v52 = vadd.f32 %v1758_v51, %v1669_v47  ;;  %v4582_v53 = vpop.f32.mrb[13].mxu1 }
 0x85a   : > { %v1761_v54 = vpop.f32.mrb[14].mxu1 }
 0x85b   : > { %v1762_v55 = vadd.f32 %v1761_v54, %v1672_v49  ;;  %v4583_v56 = vpop.f32.mrb[15].mxu1 }
 0x875   : > { %v1876_v57 = vpop.f32.mrb[16].mxu0 }
 0x876   : > { %v1883_v59 = vadd.f32 %v1876_v57, %v1759_v52  ;;  %v4602_v60 = vpop.f32.mrb[17].mxu0 }
 0x877   : > { %v1879_v61 = vpop.f32.mrb[18].mxu0 }
 0x878   : > { %v1893_v62 = vadd.f32 %v3918_v58, %v1883_v59  ;;  %v1884_v63 = vadd.f32 %v1879_v61, %v1762_v55  ;;  %v4603_v5 = vpop.f32.mrb[19].mxu0 }
 0x87a   : > { %v1894_v6 = vadd.f32 %v3918_v58, %v1884_v63  ;;  %1899 = vadd.xlane.f32.xlu0 %v1893_v62  ;;  %v1905_v9 = vmul.f32 %v1893_v62, %v1893_v62 }
 0x87c   : > { %1901 = vadd.xlane.f32.xlu1 %v1894_v6  ;;  %v1906_v10 = vmul.f32 %v1894_v6, %v1894_v6 }
 0x87e   : > { %1907 = vadd.xlane.f32.xlu0 %v1905_v9 }
 0x880   : > { %1909 = vadd.xlane.f32.xlu1 %v1906_v10  ;;  %v3940_v10 = vld [vmem:[%s6328_s12 + $0x1] ss:$0 sm:$0xff] }
 0x907   : > { %v1900_v17 = vpop.xlane.xlu0 %1899 }
 0x908   : > { %v1903_v18 = vmul.f32 0.03125, %v1900_v17 }
 0x909   : > { %v1902_v19 = vpop.xlane.xlu1 %1901 }
 0x90a   : > { %v1904_v20 = vmul.f32 0.03125, %v1902_v19  ;;  %v1913_v23 = vmul.f32 %v1903_v18, %v1903_v18  ;;  %v1919_v35 = vsub.f32 %v1893_v62, %v1903_v18  ;;  %v4950_v19 = vld [vmem:[%s6319_s3 + $0x90] sm:$0xff]  }
 0x90b   : > { %v1908_v22 = vpop.xlane.xlu0 %1907 }
 0x90c   : > { %v1911_v24 = vmul.f32 0.03125, %v1908_v22  ;;  %v1914_v26 = vmul.f32 %v1904_v20, %v1904_v20  ;;  %v1920_v39 = vsub.f32 %v1894_v6, %v1904_v20  ;;  %v4951_v20 = vld [vmem:[%s6319_s3 + $0x98] sm:$0xff]   ;;  %v4952_v22 = vld [vmem:[%s6319_s3 + $0xa0] sm:$0xff]  }
 0x90d   : > { %v1910_v25 = vpop.xlane.xlu1 %1909 }
 0x90e   : > { %v1915_v27 = vsub.f32 %v1911_v24, %v1913_v23  ;;  %v1912_v28 = vmul.f32 0.03125, %v1910_v25  ;;  %v4953_v23 = vld [vmem:[%s6319_s3 + $0xa8] sm:$0xff]   ;;  %v4954_v24 = vld [vmem:[%s6319_s3 + $0xb0] sm:$0xff]   ;;  %v4955_v25 = vld [vmem:[%s6319_s3 + $0xb8] sm:$0xff]  }
 0x910   : > { %v1917_v30 = vmax.f32 %v1915_v27, 0.0  ;;  %v1916_v31 = vsub.f32 %v1912_v28, %v1914_v26 }
 0x912   : > { %v1921_v32 = vadd.f32 1e-05, %v1917_v30  ;;  %v1918_v33 = vmax.f32 %v1916_v31, 0.0 }
 0x914   : > { %5068 = vrsqrt.f32 %v1921_v32  ;;  %v1922_v34 = vadd.f32 1e-05, %v1918_v33 }
 0x916   : > { %5070 = vrsqrt.f32 %v1922_v34 }
 0x91e   : > { %v5069_v36 = vpop.eup %5068 }
 0x91f   : > { %v1925_v40 = vmul.f32 %v5069_v36, %v1919_v35 }
 0x920   : > { %v5071_v41 = vpop.eup %5070 }
 0x921   : > { %v1933_v43 = vmul.f32 %v3921_v38, %v1925_v40  ;;  %v1926_v44 = vmul.f32 %v5071_v41, %v1920_v39 }
 0x923   : > { %v1941_v45 = vadd.f32 %v3922_v42, %v1933_v43  ;;  %v1934_v46 = vmul.f32 %v3921_v38, %v1926_v44 }
 0x925   : > { %v1942_v47 = vadd.f32 %v3922_v42, %v1934_v46  ;;  %v1945_v48 = vmul.f32 0.044715, %v1941_v45  ;;  %v1943_v61 = vmul.f32 0.5, %v1941_v45  ;;  %v3951_v46 = vld [vmem:[%s6335_s1 + $0x2] ss:$0 sm:$0xff] }
 0x927   : > { %v1946_v49 = vmul.f32 0.044715, %v1942_v47  ;;  %v1947_v50 = vmul.f32 %v1945_v48, %v1941_v45  ;;  %v1944_v62 = vmul.f32 0.5, %v1942_v47 }
 0x929   : > { %v1948_v51 = vmul.f32 %v1946_v49, %v1942_v47  ;;  %v1949_v52 = vmul.f32 %v1947_v50, %v1941_v45  ;;  %v3952_v50 = vld [vmem:[%s6318_s2 + $0x2] ss:$0 sm:$0xff] }
 0x92b   : > { %v1950_v53 = vmul.f32 %v1948_v51, %v1942_v47  ;;  %v1951_v54 = vadd.f32 %v1949_v52, %v1941_v45 }
 0x92d   : > { %v1952_v55 = vadd.f32 %v1950_v53, %v1942_v47  ;;  %v1953_v56 = vmul.f32 0.7978846, %v1951_v54 }
 0x92f   : > { %v1954_v57 = vmul.f32 0.7978846, %v1952_v55  ;;  %5072 = vtanh.f32 %v1953_v56 }
 0x931   : > { %5074 = vtanh.f32 %v1954_v57 }
 0x939   : > { %v5073_v58 = vpop.eup %5072 }
 0x93a   : > { %v1957_v59 = vadd.f32 1.0, %v5073_v58 }
 0x93b   : > { %v5075_v60 = vpop.eup %5074 }
 0x93c   : > { %v1958_v63 = vadd.f32 1.0, %v5075_v60  ;;  %v1959_v5 = vmul.f32 %v1957_v59, %v1943_v61 }
 0x93e   : > { %v1960_v6 = vmul.f32 %v1958_v63, %v1944_v62 }
 0x940   : > { %v1961_v9 = vpack.c.bf16 %v1960_v6, %v1959_v5 }
 0x942   : > { %4621 = vmatmul.mubr.bf16.vlgmr.msra.gmra.mrb[16].mxu1 %v1961_v9 }
 0x943   : > { %4660 = vmatprep.mubr.msk.bf16.mxu1 %vm5189_vm1, %v5188_v7 }
 0xa15   : > { %v2069_v2 = vpop.f32.mrb[16].mxu1 }
 0xa16   : > { %v2070_v3 = vadd.f32 %v3940_v10, %v2069_v2  ;;  %v4622_v11 = vpop.f32.mrb[17].mxu1 }
 0xa17   : > { %v2072_v12 = vpop.f32.mrb[18].mxu1 }
 0xa18   : > { %v5808_v13 = vadd.f32 %v2070_v3, %v5579_v0  ;;  %v2073_v14 = vadd.f32 %v3940_v10, %v2072_v12  ;;  %v4623_v15 = vpop.f32.mrb[19].mxu1  ;;  %v4948_v0 = vld [vmem:[%s6319_s3 + $0x80] sm:$0xff]  }
 0xa19   : > { %4625 = vmatpush3.bf16.msra.mxu0 %v4948_v0 }
 0xa1a   : > { %v5811_v16 = vadd.f32 %v2073_v14, %v5582_v8  ;;  %2082 = vadd.xlane.f32.xlu0 %v5808_v13  ;;  %v2088_v17 = vmul.f32 %v5808_v13, %v5808_v13  ;;  %4626 = vmatprep.subr.bf16.mxu0 %v5188_v7  ;;  %v4949_v8 = vld [vmem:[%s6319_s3 + $0x88] sm:$0xff]  }
 0xa1c   : > { %2084 = vadd.xlane.f32.xlu1 %v5811_v16  ;;  %v2089_v18 = vmul.f32 %v5811_v16, %v5811_v16 }
 0xa1d   : > { %4627 = vmatpush3.bf16.msra.mxu0 %v4949_v8 }
 0xa1e   : > { %2090 = vadd.xlane.f32.xlu0 %v2088_v17  ;;  %4628 = vmatprep.subr.bf16.mxu0 %v5188_v7 }
 0xa20   : > { %2092 = vadd.xlane.f32.xlu1 %v2089_v18  ;;  %v3970_v18 = vld [vmem:[%s6320_s4 + $0x2] ss:$0 sm:$0xff] }
 0xa21   : > { %4629 = vmatpush3.bf16.msra.mxu0 %v4950_v19 }
 0xa22   : > { %4630 = vmatprep.subr.bf16.mxu0 %v5188_v7 }
 0xa25   : > { %4631 = vmatpush3.bf16.msra.mxu0 %v4951_v20 }
 0xa26   : > { %4632 = vmatprep.subr.bf16.mxu0 %v5188_v7 }
 0xa29   : > { %4633 = vmatpush3.bf16.msra.mxu0 %v4952_v22 }
 0xa2a   : > { %4634 = vmatprep.subr.bf16.mxu0 %v5188_v7 }
 0xa2d   : > { %4635 = vmatpush3.bf16.msra.mxu0 %v4953_v23 }
 0xa2e   : > { %4636 = vmatprep.subr.bf16.mxu0 %v5188_v7 }
 0xa31   : > { %4637 = vmatpush3.bf16.msra.mxu0 %v4954_v24 }
 0xa32   : > { %4638 = vmatprep.subr.bf16.mxu0 %v5188_v7 }
 0xa35   : > { %4639 = vmatpush3.bf16.msra.mxu0 %v4955_v25 }
 0xa36   : > { %4664 = vmatprep.subr.bf16.mxu0 %v5188_v7 }
 0xaa7   : > { %v2083_v26 = vpop.xlane.xlu0 %2082 }
 0xaa8   : > { %v2086_v27 = vmul.f32 0.015625, %v2083_v26  ;;  %v4956_v26 = vld [vmem:[%s6323_s7 + $0x1c0] sm:$0xff]  }
 0xaa9   : > { %v2085_v28 = vpop.xlane.xlu1 %2084  ;;  %4645 = vmatpush3.bf16.msra.mxu1 %v4956_v26 }
 0xaaa   : > { %v2087_v30 = vmul.f32 0.015625, %v2085_v28  ;;  %v2096_v32 = vmul.f32 %v2086_v27, %v2086_v27  ;;  %v2102_v44 = vsub.f32 %v5808_v13, %v2086_v27  ;;  %4646 = vmatprep.subr.bf16.mxu1 %v5188_v7  ;;  %v4957_v27 = vld [vmem:[%s6323_s7 + $0x1c8] sm:$0xff]   ;;  %v4958_v28 = vld [vmem:[%s6323_s7 + $0x180] sm:$0xff]  }
 0xaab   : > { %v2091_v31 = vpop.xlane.xlu0 %2090 }
 0xaac   : > { %v2094_v33 = vmul.f32 0.015625, %v2091_v31  ;;  %v2097_v35 = vmul.f32 %v2087_v30, %v2087_v30  ;;  %v2103_v47 = vsub.f32 %v5811_v16, %v2087_v30  ;;  %v4959_v30 = vld [vmem:[%s6323_s7 + $0x1d0] sm:$0xff]   ;;  %v4960_v31 = vld [vmem:[%s6323_s7 + $0x188] sm:$0xff]  }
 0xaad   : > { %v2093_v34 = vpop.xlane.xlu1 %2092  ;;  %4647 = vmatpush3.bf16.msra.mxu1 %v4957_v27 }
 0xaae   : > { %v2098_v36 = vsub.f32 %v2094_v33, %v2096_v32  ;;  %v2095_v38 = vmul.f32 0.015625, %v2093_v34  ;;  %4648 = vmatprep.subr.bf16.mxu1 %v5188_v7  ;;  %v4961_v32 = vld [vmem:[%s6323_s7 + $0x1d8] sm:$0xff]   ;;  %v4962_v33 = vld [vmem:[%s6323_s7 + $0x190] sm:$0xff]   ;;  %v4963_v34 = vld [vmem:[%s6323_s7 + $0x1e0] sm:$0xff]  }
 0xab0   : > { %v2100_v39 = vmax.f32 %v2098_v36, 0.0  ;;  %v2099_v40 = vsub.f32 %v2095_v38, %v2097_v35  ;;  %v4964_v35 = vld [vmem:[%s6323_s7 + $0x198] sm:$0xff]   ;;  %v4965_v36 = vld [vmem:[%s6323_s7 + $0x1e8] sm:$0xff]   ;;  %v4966_v38 = vld [vmem:[%s6323_s7 + $0x1a0] sm:$0xff]  }
 0xab1   : > { %4649 = vmatpush3.bf16.msra.mxu1 %v4959_v30 }
 0xab2   : > { %v2104_v41 = vadd.f32 1e-05, %v2100_v39  ;;  %v2101_v42 = vmax.f32 %v2099_v40, 0.0  ;;  %4650 = vmatprep.subr.bf16.mxu1 %v5188_v7  ;;  %v4967_v39 = vld [vmem:[%s6323_s7 + $0x1f0] sm:$0xff]   ;;  %v4968_v40 = vld [vmem:[%s6323_s7 + $0x1a8] sm:$0xff]  }
 0xab4   : > { %5076 = vrsqrt.f32 %v2104_v41  ;;  %v2105_v43 = vadd.f32 1e-05, %v2101_v42  ;;  %v4969_v41 = vld [vmem:[%s6323_s7 + $0x1f8] sm:$0xff]   ;;  %v4970_v42 = vld [vmem:[%s6323_s7 + $0x1b0] sm:$0xff]  }
 0xab5   : > { %4651 = vmatpush3.bf16.msra.mxu1 %v4961_v32 }
 0xab6   : > { %5078 = vrsqrt.f32 %v2105_v43  ;;  %4652 = vmatprep.subr.bf16.mxu1 %v5188_v7  ;;  %v4971_v43 = vld [vmem:[%s6323_s7 + $0x1b8] sm:$0xff]  }
 0xab9   : > { %4653 = vmatpush3.bf16.msra.mxu1 %v4963_v34  ;;  %v4972_v34 = vld [vmem:[%s6323_s7 + $0x200] sm:$0xff]  }
 0xaba   : > { %4654 = vmatprep.subr.bf16.mxu1 %v5188_v7 }
 0xabd   : > { %4655 = vmatpush3.bf16.msra.mxu1 %v4965_v36 }
 0xabe   : > { %v5077_v45 = vpop.eup %5076  ;;  %4656 = vmatprep.subr.bf16.mxu1 %v5188_v7 }
 0xabf   : > { %v2108_v48 = vmul.f32 %v5077_v45, %v2102_v44 }
 0xac0   : > { %v5079_v49 = vpop.eup %5078 }
 0xac1   : > { %v2116_v51 = vmul.f32 %v3951_v46, %v2108_v48  ;;  %v2109_v52 = vmul.f32 %v5079_v49, %v2103_v47  ;;  %4657 = vmatpush3.bf16.msra.mxu1 %v4967_v39 }
 0xac2   : > { %4658 = vmatprep.subr.bf16.mxu1 %v5188_v7 }
 0xac3   : > { %v2124_v53 = vadd.f32 %v3952_v50, %v2116_v51  ;;  %v2117_v54 = vmul.f32 %v3951_v46, %v2109_v52 }
 0xac5   : > { %v2125_v55 = vadd.f32 %v3952_v50, %v2117_v54  ;;  %v2128_v56 = vmul.f32 0.044715, %v2124_v53  ;;  %v2126_v3 = vmul.f32 0.5, %v2124_v53  ;;  %4659 = vmatpush3.bf16.msra.mxu1 %v4969_v41  ;;  %v4973_v41 = vld [vmem:[%s6323_s7 + $0x208] sm:$0xff]  }
 0xac6   : > { %4684 = vmatprep.subr.bf16.mxu1 %v5188_v7 }
 0xac7   : > { %v2129_v57 = vmul.f32 0.044715, %v2125_v55  ;;  %v2130_v58 = vmul.f32 %v2128_v56, %v2124_v53  ;;  %v2127_v11 = vmul.f32 0.5, %v2125_v55 }
 0xac9   : > { %v2131_v59 = vmul.f32 %v2129_v57, %v2125_v55  ;;  %v2132_v60 = vmul.f32 %v2130_v58, %v2124_v53 }
 0xacb   : > { %v2133_v61 = vmul.f32 %v2131_v59, %v2125_v55  ;;  %v2134_v62 = vadd.f32 %v2132_v60, %v2124_v53 }
 0xacd   : > { %v2135_v63 = vadd.f32 %v2133_v61, %v2125_v55  ;;  %v2136_v5 = vmul.f32 0.7978846, %v2134_v62  ;;  %v3981_v62 = vld [vmem:[%s6321_s5 + $0x2] ss:$0 sm:$0xff] }
 0xacf   : > { %v2137_v6 = vmul.f32 0.7978846, %v2135_v63  ;;  %5080 = vtanh.f32 %v2136_v5 }
 0xad1   : > { %5082 = vtanh.f32 %v2137_v6 }
 0xad9   : > { %v5081_v9 = vpop.eup %5080 }
 0xada   : > { %v2140_v10 = vadd.f32 1.0, %v5081_v9  ;;  %v3982_v9 = vld [vmem:[%s6322_s6 + $0x2] ss:$0 sm:$0xff] }
 0xadb   : > { %v5083_v2 = vpop.eup %5082 }
 0xadc   : > { %v2141_v12 = vadd.f32 1.0, %v5083_v2  ;;  %v2142_v14 = vmul.f32 %v2140_v10, %v2126_v3 }
 0xade   : > { %v2143_v15 = vmul.f32 %v2141_v12, %v2127_v11 }
 0xae0   : > { %v2144_v17 = vpack.c.bf16 %v2143_v15, %v2142_v14 }
 0xae2   : > { %4641 = vmatmul.mubr.bf16.vlgmr.msra.gmra.mrb[20].mxu0 %v2144_v17 }
 0xae3   : > { %4680 = vmatprep.mubr.msk.bf16.mxu0 %vm5189_vm1, %v5188_v7  ;;  %4665 = vmatpush3.bf16.msra.mxu0 %v4958_v28  ;;  %v504_v28 = vadd.s32 4294967292, %v5463_v4 }
 0xae4   : > { %4666 = vmatprep.subr.bf16.mxu0 %v5188_v7 }
 0xae5   : > { %vm506_vm15 = vcmp.ge.s32.totalorder %v504_v28, 0 }
 0xae6   : > { %vm4031_vm2 = vmpackc.low %vm5190_vm4, %vm506_vm15 }
 0xae7   : > { %4667 = vmatpush3.bf16.msra.mxu0 %v4960_v31 }
 0xae8   : > { %4668 = vmatprep.subr.bf16.mxu0 %v5188_v7 }
 0xaeb   : > { %4669 = vmatpush3.bf16.msra.mxu0 %v4962_v33 }
 0xaec   : > { %4670 = vmatprep.subr.bf16.mxu0 %v5188_v7 }
 0xaef   : > { %4671 = vmatpush3.bf16.msra.mxu0 %v4964_v35 }
 0xaf0   : > { %4672 = vmatprep.subr.bf16.mxu0 %v5188_v7 }
 0xaf3   : > { %4673 = vmatpush3.bf16.msra.mxu0 %v4966_v38 }
 0xaf4   : > { %4674 = vmatprep.subr.bf16.mxu0 %v5188_v7 }
 0xaf7   : > { %4675 = vmatpush3.bf16.msra.mxu0 %v4968_v40 }
 0xaf8   : > { %4676 = vmatprep.subr.bf16.mxu0 %v5188_v7 }
 0xafb   : > { %4677 = vmatpush3.bf16.msra.mxu0 %v4970_v42  ;;  %v4974_v42 = vld [vmem:[%s6323_s7 + $0x210] sm:$0xff]  }
 0xafc   : > { %4678 = vmatprep.subr.bf16.mxu0 %v5188_v7 }
 0xaff   : > { %4679 = vmatpush3.bf16.msra.mxu0 %v4971_v43  ;;  %v4975_v43 = vld [vmem:[%s6323_s7 + $0x218] sm:$0xff]  }
 0xb00   : > { %4704 = vmatprep.subr.bf16.mxu0 %v5188_v7 }
 0xbb5   : > { %v2252_v0 = vpop.f32.mrb[20].mxu0 }
 0xbb6   : > { %v5864_v8 = vadd.f32 %v3970_v18, %v2252_v0  ;;  %v4642_v19 = vpop.f32.mrb[21].mxu0 }
 0xbb7   : > { %v2255_v20 = vpop.f32.mrb[22].mxu0 }
 0xbb8   : > { %v5866_v22 = vadd.f32 %v3970_v18, %v2255_v20  ;;  %2263 = vadd.xlane.f32.xlu0 %v5864_v8  ;;  %v4643_v23 = vpop.f32.mrb[23].mxu0  ;;  %v2269_v24 = vmul.f32 %v5864_v8, %v5864_v8 }
 0xbba   : > { %2265 = vadd.xlane.f32.xlu1 %v5866_v22  ;;  %v2270_v25 = vmul.f32 %v5866_v22, %v5866_v22 }
 0xbbc   : > { %2271 = vadd.xlane.f32.xlu0 %v2269_v24 }
 0xbbe   : > { %2273 = vadd.xlane.f32.xlu1 %v2270_v25 }
 0xc45   : > { %v2264_v44 = vpop.xlane.xlu0 %2263 }
 0xc46   : > { %v2267_v45 = vmul.f32 0.03125, %v2264_v44  ;;  %v4976_v44 = vld [vmem:[%s6323_s7 + $0x220] sm:$0xff]  }
 0xc47   : > { %v2266_v46 = vpop.xlane.xlu1 %2265 }
 0xc48   : > { %v2268_v47 = vmul.f32 0.03125, %v2266_v46  ;;  %v2277_v49 = vmul.f32 %v2267_v45, %v2267_v45  ;;  %v2283_v60 = vsub.f32 %v5864_v8, %v2267_v45  ;;  %v4977_v45 = vld [vmem:[%s6323_s7 + $0x228] sm:$0xff]   ;;  %v4978_v46 = vld [vmem:[%s6323_s7 + $0x230] sm:$0xff]  }
 0xc49   : > { %v2272_v48 = vpop.xlane.xlu0 %2271 }
 0xc4a   : > { %v2275_v50 = vmul.f32 0.03125, %v2272_v48  ;;  %v2278_v52 = vmul.f32 %v2268_v47, %v2268_v47  ;;  %v2284_v63 = vsub.f32 %v5866_v22, %v2268_v47  ;;  %v513_v47 = vadd.s32 4, %v5506_v29  ;;  %v4979_v48 = vld [vmem:[%s6323_s7 + $0x238] sm:$0xff]  }
 0xc4b   : > { %v2274_v51 = vpop.xlane.xlu1 %2273 }
 0xc4c   : > { %v2279_v53 = vsub.f32 %v2275_v50, %v2277_v49  ;;  %v2276_v54 = vmul.f32 0.03125, %v2274_v51  ;;  %vm517_vm7 = vcmp.lt.s32.totalorder %v513_v47, 16 }
 0xc4d   : > { %vm4058_vm9 = vmpackc.low %vm517_vm7, %vm5190_vm4 }
 0xc4e   : > { %v2281_v55 = vmax.f32 %v2279_v53, 0.0  ;;  %v2280_v56 = vsub.f32 %v2276_v54, %v2278_v52 }
 0xc50   : > { %v2285_v57 = vadd.f32 1e-05, %v2281_v55  ;;  %v2282_v58 = vmax.f32 %v2280_v56, 0.0 }
 0xc52   : > { %5084 = vrsqrt.f32 %v2285_v57  ;;  %v2286_v59 = vadd.f32 1e-05, %v2282_v58 }
 0xc54   : > { %5086 = vrsqrt.f32 %v2286_v59 }
 0xc5c   : > { %v5085_v61 = vpop.eup %5084 }
 0xc5d   : > { %v2289_v5 = vmul.f32 %v5085_v61, %v2283_v60  ;;  %v4062_v60 = vld [vmem:[%s6324_s8 + $0x2] ss:$0 sm:$0xff] }
 0xc5e   : > { %v5087_v6 = vpop.eup %5086 }
 0xc5f   : > { %v2297_v10 = vmul.f32 %v3981_v62, %v2289_v5  ;;  %v2290_v2 = vmul.f32 %v5087_v6, %v2284_v63 }
 0xc61   : > { %v2305_v3 = vadd.f32 %v3982_v9, %v2297_v10  ;;  %v2298_v11 = vmul.f32 %v3981_v62, %v2290_v2 }
 0xc63   : > { %v2306_v12 = vadd.f32 %v3982_v9, %v2298_v11  ;;  %v2309_v14 = vmul.f32 0.044715, %v2305_v3  ;;  %v2307_v25 = vmul.f32 0.5, %v2305_v3  ;;  %v4980_v11 = vld [vmem:[%s6327_s11 + $0x80] sm:$0xff]  }
 0xc65   : > { %v2310_v15 = vmul.f32 0.044715, %v2306_v12  ;;  %v2311_v17 = vmul.f32 %v2309_v14, %v2305_v3  ;;  %v2308_v30 = vmul.f32 0.5, %v2306_v12  ;;  %v4982_v14 = vld [vmem:[%s6327_s11 + $0x90] sm:$0xff]  }
 0xc67   : > { %v2312_v18 = vmul.f32 %v2310_v15, %v2306_v12  ;;  %v2313_v0 = vmul.f32 %v2311_v17, %v2305_v3  ;;  %v4983_v15 = vld [vmem:[%s6327_s11 + $0x98] sm:$0xff]   ;;  %v4984_v17 = vld [vmem:[%s6327_s11 + $0xa0] sm:$0xff]  }
 0xc69   : > { %v2314_v8 = vmul.f32 %v2312_v18, %v2306_v12  ;;  %v2315_v19 = vadd.f32 %v2313_v0, %v2305_v3  ;;  %v4985_v18 = vld [vmem:[%s6327_s11 + $0xa8] sm:$0xff]   ;;  %v4986_v0 = vld [vmem:[%s6327_s11 + $0xb0] sm:$0xff]  }
 0xc6b   : > { %v2316_v20 = vadd.f32 %v2314_v8, %v2306_v12  ;;  %v2317_v22 = vmul.f32 0.7978846, %v2315_v19  ;;  %v4981_v12 = vld [vmem:[%s6327_s11 + $0x88] sm:$0xff]   ;;  %v4987_v8 = vld [vmem:[%s6327_s11 + $0xb8] sm:$0xff]  }
 0xc6d   : > { %v2318_v23 = vmul.f32 0.7978846, %v2316_v20  ;;  %5088 = vtanh.f32 %v2317_v22 }
 0xc6f   : > { %5090 = vtanh.f32 %v2318_v23 }
 0xc77   : > { %v5089_v24 = vpop.eup %5088 }
 0xc78   : > { %v2321_v26 = vadd.f32 1.0, %v5089_v24 }
 0xc79   : > { %v5091_v27 = vpop.eup %5090 }
 0xc7a   : > { %v2322_v31 = vadd.f32 1.0, %v5091_v27  ;;  %v2323_v32 = vmul.f32 %v2321_v26, %v2307_v25 }
 0xc7c   : > { %v2324_v33 = vmul.f32 %v2322_v31, %v2308_v30  ;;  %v2325_v35 = vrot.slane %v2323_v32, 4 }
 0xc7e   : > { %v2326_v36 = vrot.slane %v2324_v33, 4  ;;  %v2354_v38 = vpack.c.bf16 %v2324_v33, %v2323_v32 }
 0xc80   : > { %4661 = vmatmul.mubr.bf16.vlgmr.msra.gmra.mrb[20].mxu1 %v2354_v38  ;;  %v2328_v39 = vsel %vm2327_vm0, %v2325_v35, %v2326_v36  ;;  %v2329_v40 = vsel %vm2327_vm0, %v2326_v36, %v2325_v35 }
 0xc81   : > { %4685 = vmatpush3.bf16.msra.mxu1 %v4972_v34  ;;  %v4032_v4 = vpack.c.bf16 %v2328_v39, %v2329_v40  ;;  %4700 = vmatprep.mubr.msk.bf16.mxu1 %vm5189_vm1, %v5188_v7  ;;  %v4059_v49 = vpack.c.bf16 %v2329_v40, %v2328_v39  ;;  %v4065_v40 = vld [vmem:[%s6325_s9 + $0x2] ss:$0 sm:$0xff] }
 0xc82   : > { %4686 = vmatprep.subr.bf16.mxu1 %v5188_v7 }
 0xc83   : > { %4681 = vmatmul.mubr.msk.bf16.vlgmr.msra.gmra.mrb[24].mxu0 %vm4031_vm2, %v4032_v4 }
 0xc84   : > { %4720 = vmatprep.mubr.msk.bf16.mxu0 %vm5189_vm1, %v5188_v7  ;;  %4705 = vmatpush3.bf16.msra.mxu0 %v4980_v11 }
 0xc85   : > { %4687 = vmatpush3.bf16.msra.mxu1 %v4973_v41  ;;  %4706 = vmatprep.subr.bf16.mxu0 %v5188_v7 }
 0xc86   : > { %4688 = vmatprep.subr.bf16.mxu1 %v5188_v7 }
 0xc88   : > { %4707 = vmatpush3.bf16.msra.mxu0 %v4981_v12 }
 0xc89   : > { %4689 = vmatpush3.bf16.msra.mxu1 %v4974_v42  ;;  %4708 = vmatprep.subr.bf16.mxu0 %v5188_v7 }
 0xc8a   : > { %4690 = vmatprep.subr.bf16.mxu1 %v5188_v7 }
 0xc8c   : > { %4709 = vmatpush3.bf16.msra.mxu0 %v4982_v14 }
 0xc8d   : > { %4691 = vmatpush3.bf16.msra.mxu1 %v4975_v43  ;;  %4710 = vmatprep.subr.bf16.mxu0 %v5188_v7  ;;  %v4066_v43 = vld [vmem:[%s6326_s10 + $0x2] ss:$0 sm:$0xff] }
 0xc8e   : > { %4692 = vmatprep.subr.bf16.mxu1 %v5188_v7 }
 0xc90   : > { %4711 = vmatpush3.bf16.msra.mxu0 %v4983_v15 }
 0xc91   : > { %4693 = vmatpush3.bf16.msra.mxu1 %v4976_v44  ;;  %4712 = vmatprep.subr.bf16.mxu0 %v5188_v7 }
 0xc92   : > { %4694 = vmatprep.subr.bf16.mxu1 %v5188_v7 }
 0xc94   : > { %4713 = vmatpush3.bf16.msra.mxu0 %v4984_v17 }
 0xc95   : > { %4695 = vmatpush3.bf16.msra.mxu1 %v4977_v45  ;;  %4714 = vmatprep.subr.bf16.mxu0 %v5188_v7 }
 0xc96   : > { %4696 = vmatprep.subr.bf16.mxu1 %v5188_v7 }
 0xc98   : > { %4715 = vmatpush3.bf16.msra.mxu0 %v4985_v18 }
 0xc99   : > { %4697 = vmatpush3.bf16.msra.mxu1 %v4978_v46  ;;  %4716 = vmatprep.subr.bf16.mxu0 %v5188_v7 }
 0xc9a   : > { %4698 = vmatprep.subr.bf16.mxu1 %v5188_v7 }
 0xc9c   : > { %4717 = vmatpush3.bf16.msra.mxu0 %v4986_v0 }
 0xc9d   : > { %4699 = vmatpush3.bf16.msra.mxu1 %v4979_v48  ;;  %4718 = vmatprep.subr.bf16.mxu0 %v5188_v7 }
 0xc9e   : > { %4724 = vmatprep.subr.bf16.mxu1 %v5188_v7 }
 0xca0   : > { %4701 = vmatmul.mubr.msk.bf16.vlgmr.msra.gmra.mrb[24].mxu1 %vm4058_vm9, %v4059_v49  ;;  %4719 = vmatpush3.bf16.msra.mxu0 %v4987_v8 }
 0xca1   : > { %4740 = vmatprep.mubr.msk.bf16.mxu1 %vm5189_vm1, %v5188_v7  ;;  %4744 = vmatprep.subr.bf16.mxu0 %v5188_v7 }
 0xd53   : > { %v2454_v50 = vpop.f32.mrb[20].mxu1 }
 0xd54   : > { %v4662_v29 = vpop.f32.mrb[21].mxu1 }
 0xd55   : > { %v2457_v51 = vpop.f32.mrb[22].mxu1 }
 0xd56   : > { %v4663_v52 = vpop.f32.mrb[23].mxu1  ;;  %v2543_v53 = vpop.f32.mrb[24].mxu0 }
 0xd57   : > { %v2544_v54 = vadd.f32 %v2543_v53, %v2454_v50  ;;  %v4682_v55 = vpop.f32.mrb[25].mxu0 }
 0xd58   : > { %v2546_v56 = vpop.f32.mrb[26].mxu0 }
 0xd59   : > { %v2547_v57 = vadd.f32 %v2546_v56, %v2457_v51  ;;  %v4683_v58 = vpop.f32.mrb[27].mxu0 }
 0xd73   : > { %v2656_v59 = vpop.f32.mrb[24].mxu1 }
 0xd74   : > { %v2663_v61 = vadd.f32 %v2656_v59, %v2544_v54  ;;  %v4702_v62 = vpop.f32.mrb[25].mxu1 }
 0xd75   : > { %v2659_v63 = vpop.f32.mrb[26].mxu1 }
 0xd76   : > { %v2673_v5 = vadd.f32 %v4062_v60, %v2663_v61  ;;  %v2664_v6 = vadd.f32 %v2659_v63, %v2547_v57  ;;  %v4703_v9 = vpop.f32.mrb[27].mxu1 }
 0xd78   : > { %v2674_v10 = vadd.f32 %v4062_v60, %v2664_v6  ;;  %2679 = vadd.xlane.f32.xlu0 %v2673_v5  ;;  %v2685_v2 = vmul.f32 %v2673_v5, %v2673_v5 }
 0xd7a   : > { %2681 = vadd.xlane.f32.xlu1 %v2674_v10  ;;  %v2686_v3 = vmul.f32 %v2674_v10, %v2674_v10 }
 0xd7c   : > { %2687 = vadd.xlane.f32.xlu0 %v2685_v2 }
 0xd7e   : > { %2689 = vadd.xlane.f32.xlu1 %v2686_v3 }
 0xe05   : > { %v2680_v19 = vpop.xlane.xlu0 %2679 }
 0xe06   : > { %v2683_v20 = vmul.f32 0.03125, %v2680_v19  ;;  %v4990_v19 = vld [vmem:[%s6319_s3 + $0xd0] sm:$0xff]  }
 0xe07   : > { %v2682_v22 = vpop.xlane.xlu1 %2681 }
 0xe08   : > { %v2684_v23 = vmul.f32 0.03125, %v2682_v22  ;;  %v2693_v25 = vmul.f32 %v2683_v20, %v2683_v20  ;;  %v2699_v38 = vsub.f32 %v2673_v5, %v2683_v20  ;;  %v4991_v20 = vld [vmem:[%s6319_s3 + $0xd8] sm:$0xff]   ;;  %v4992_v22 = vld [vmem:[%s6319_s3 + $0xe0] sm:$0xff]  }
 0xe09   : > { %v2688_v24 = vpop.xlane.xlu0 %2687 }
 0xe0a   : > { %v2691_v26 = vmul.f32 0.03125, %v2688_v24  ;;  %v2694_v28 = vmul.f32 %v2684_v23, %v2684_v23  ;;  %v2700_v4 = vsub.f32 %v2674_v10, %v2684_v23  ;;  %v4084_v10 = vld [vmem:[%s6328_s12 + $0x2] ss:$0 sm:$0xff]  ;;  %v4993_v23 = vld [vmem:[%s6319_s3 + $0xe8] sm:$0xff]   ;;  %v4994_v24 = vld [vmem:[%s6319_s3 + $0xf0] sm:$0xff]  }
 0xe0b   : > { %v2690_v27 = vpop.xlane.xlu1 %2689 }
 0xe0c   : > { %v2695_v30 = vsub.f32 %v2691_v26, %v2693_v25  ;;  %v2692_v31 = vmul.f32 0.03125, %v2690_v27  ;;  %v4995_v25 = vld [vmem:[%s6319_s3 + $0xf8] sm:$0xff]  }
 0xe0e   : > { %v2697_v32 = vmax.f32 %v2695_v30, 0.0  ;;  %v2696_v33 = vsub.f32 %v2692_v31, %v2694_v28 }
 0xe10   : > { %v2701_v34 = vadd.f32 1e-05, %v2697_v32  ;;  %v2698_v35 = vmax.f32 %v2696_v33, 0.0 }
 0xe12   : > { %5092 = vrsqrt.f32 %v2701_v34  ;;  %v2702_v36 = vadd.f32 1e-05, %v2698_v35 }
 0xe14   : > { %5094 = vrsqrt.f32 %v2702_v36 }
 0xe1c   : > { %v5093_v39 = vpop.eup %5092 }
 0xe1d   : > { %v2705_v41 = vmul.f32 %v5093_v39, %v2699_v38 }
 0xe1e   : > { %v5095_v42 = vpop.eup %5094 }
 0xe1f   : > { %v2713_v44 = vmul.f32 %v4065_v40, %v2705_v41  ;;  %v2706_v45 = vmul.f32 %v5095_v42, %v2700_v4 }
 0xe21   : > { %v2721_v46 = vadd.f32 %v4066_v43, %v2713_v44  ;;  %v2714_v47 = vmul.f32 %v4065_v40, %v2706_v45  ;;  %v4095_v45 = vld [vmem:[%s6335_s1 + $0x3] ss:$0 sm:$0xff]  ;;  %s5128_s1 = sshll.u32 %s5191_s30, 4  ;;  %s5129_s1 = int_to_ptr.vmem [resolvable:$false] %s5128_s1 }
 0xe22   : > { %s5130_s20 = scalar_lea.vmem %s5129_s1, 512  ;;  %p5131_p0 = scmp.lt.s32.totalorder %s6267_s16, %s5129_s1 }
 0xe23   : > { %v2722_v48 = vadd.f32 %v4066_v43, %v2714_v47  ;;  %v2725_v49 = vmul.f32 0.044715, %v2721_v46  ;;  %v2723_v61 = vmul.f32 0.5, %v2721_v46  ;;  %p5132_p1 = scmp.lt.s32.totalorder %s5130_s20, %s5124_s23 }
 0xe25   : > { %v2726_v50 = vmul.f32 0.044715, %v2722_v48  ;;  %v2727_v29 = vmul.f32 %v2725_v49, %v2721_v46  ;;  %v2724_v62 = vmul.f32 0.5, %v2722_v48  ;;  %v4096_v49 = vld [vmem:[%s6318_s2 + $0x3] ss:$0 sm:$0xff]  ;;  %p5133_p2 = por %p5132_p1, %p5131_p0 }
 0xe27   : > { %v2728_v51 = vmul.f32 %v2726_v50, %v2722_v48  ;;  %v2729_v52 = vmul.f32 %v2727_v29, %v2721_v46  ;;  %p5134_p3 = pnand %p5133_p2, %p5127_p13 }
 0xe29   : > { %v2730_v53 = vmul.f32 %v2728_v51, %v2722_v48  ;;  %v2731_v54 = vadd.f32 %v2729_v52, %v2721_v46 }
 0xe2b   : > { %v2732_v55 = vadd.f32 %v2730_v53, %v2722_v48  ;;  %v2733_v56 = vmul.f32 0.7978846, %v2731_v54 }
 0xe2d   : > { %v2734_v57 = vmul.f32 0.7978846, %v2732_v55  ;;  %5096 = vtanh.f32 %v2733_v56 }
 0xe2f   : > { %5098 = vtanh.f32 %v2734_v57 }
 0xe37   : > { %v5097_v58 = vpop.eup %5096 }
 0xe38   : > { %v2737_v59 = vadd.f32 1.0, %v5097_v58 }
 0xe39   : > { %v5099_v60 = vpop.eup %5098 }
 0xe3a   : > { %v2738_v63 = vadd.f32 1.0, %v5099_v60  ;;  %v2739_v5 = vmul.f32 %v2737_v59, %v2723_v61 }
 0xe3c   : > { %v2740_v6 = vmul.f32 %v2738_v63, %v2724_v62 }
 0xe3e   : > { %v2741_v9 = vpack.c.bf16 %v2740_v6, %v2739_v5 }
 0xe40   : > { %4721 = vmatmul.mubr.bf16.vlgmr.msra.gmra.mrb[28].mxu0 %v2741_v9 }
 0xe41   : > { %4760 = vmatprep.mubr.msk.bf16.mxu0 %vm5189_vm1, %v5188_v7 }
 0xf13   : > { %v2849_v2 = vpop.f32.mrb[28].mxu0 }
 0xf14   : > { %v2850_v3 = vadd.f32 %v4084_v10, %v2849_v2  ;;  %v4722_v11 = vpop.f32.mrb[29].mxu0 }
 0xf15   : > { %v2852_v12 = vpop.f32.mrb[30].mxu0 }
 0xf16   : > { %v6036_v14 = vadd.f32 %v2850_v3, %v5808_v13  ;;  %v2853_v15 = vadd.f32 %v4084_v10, %v2852_v12  ;;  %v4723_v17 = vpop.f32.mrb[31].mxu0  ;;  %v4988_v13 = vld [vmem:[%s6319_s3 + $0xc0] sm:$0xff]  }
 0xf17   : > { %4725 = vmatpush3.bf16.msra.mxu1 %v4988_v13  ;;  %v4114_v17 = vld [vmem:[%s6320_s4 + $0x3] ss:$0 sm:$0xff] }
 0xf18   : > { %v6039_v18 = vadd.f32 %v2853_v15, %v5811_v16  ;;  %2862 = vadd.xlane.f32.xlu0 %v6036_v14  ;;  %v2868_v0 = vmul.f32 %v6036_v14, %v6036_v14  ;;  %4726 = vmatprep.subr.bf16.mxu1 %v5188_v7  ;;  %v4989_v16 = vld [vmem:[%s6319_s3 + $0xc8] sm:$0xff]  }
 0xf1a   : > { %2864 = vadd.xlane.f32.xlu1 %v6039_v18  ;;  %v2869_v8 = vmul.f32 %v6039_v18, %v6039_v18 }
 0xf1b   : > { %4727 = vmatpush3.bf16.msra.mxu1 %v4989_v16 }
 0xf1c   : > { %2870 = vadd.xlane.f32.xlu0 %v2868_v0  ;;  %4728 = vmatprep.subr.bf16.mxu1 %v5188_v7 }
 0xf1e   : > { %2872 = vadd.xlane.f32.xlu1 %v2869_v8 }
 0xf1f   : > { %4729 = vmatpush3.bf16.msra.mxu1 %v4990_v19 }
 0xf20   : > { %4730 = vmatprep.subr.bf16.mxu1 %v5188_v7 }
 0xf23   : > { %4731 = vmatpush3.bf16.msra.mxu1 %v4991_v20 }
 0xf24   : > { %4732 = vmatprep.subr.bf16.mxu1 %v5188_v7 }
 0xf27   : > { %4733 = vmatpush3.bf16.msra.mxu1 %v4992_v22 }
 0xf28   : > { %4734 = vmatprep.subr.bf16.mxu1 %v5188_v7 }
 0xf2b   : > { %4735 = vmatpush3.bf16.msra.mxu1 %v4993_v23 }
 0xf2c   : > { %4736 = vmatprep.subr.bf16.mxu1 %v5188_v7 }
 0xf2f   : > { %4737 = vmatpush3.bf16.msra.mxu1 %v4994_v24  ;;  %v4996_v24 = vld [vmem:[%s6323_s7 + $0x280] sm:$0xff]  }
 0xf30   : > { %4738 = vmatprep.subr.bf16.mxu1 %v5188_v7  ;;  %4745 = vmatpush3.bf16.msra.mxu0 %v4996_v24 }
 0xf31   : > { %4746 = vmatprep.subr.bf16.mxu0 %v5188_v7 }
 0xf33   : > { %4739 = vmatpush3.bf16.msra.mxu1 %v4995_v25  ;;  %v4997_v25 = vld [vmem:[%s6323_s7 + $0x288] sm:$0xff]  }
 0xf34   : > { %4764 = vmatprep.subr.bf16.mxu1 %v5188_v7  ;;  %4747 = vmatpush3.bf16.msra.mxu0 %v4997_v25 }
 0xf35   : > { %4748 = vmatprep.subr.bf16.mxu0 %v5188_v7 }
 0xfa5   : > { %v2863_v26 = vpop.xlane.xlu0 %2862 }
 0xfa6   : > { %v2866_v27 = vmul.f32 0.015625, %v2863_v26  ;;  %v4998_v26 = vld [vmem:[%s6323_s7 + $0x240] sm:$0xff]  }
 0xfa7   : > { %v2865_v28 = vpop.xlane.xlu1 %2864 }
 0xfa8   : > { %v2867_v30 = vmul.f32 0.015625, %v2865_v28  ;;  %v2876_v32 = vmul.f32 %v2866_v27, %v2866_v27  ;;  %v2882_v43 = vsub.f32 %v6036_v14, %v2866_v27  ;;  %v4999_v27 = vld [vmem:[%s6323_s7 + $0x290] sm:$0xff]   ;;  %v5000_v28 = vld [vmem:[%s6323_s7 + $0x248] sm:$0xff]  }
 0xfa9   : > { %v2871_v31 = vpop.xlane.xlu0 %2870  ;;  %4749 = vmatpush3.bf16.msra.mxu0 %v4999_v27 }
 0xfaa   : > { %v2874_v33 = vmul.f32 0.015625, %v2871_v31  ;;  %v2877_v35 = vmul.f32 %v2867_v30, %v2867_v30  ;;  %v2883_v46 = vsub.f32 %v6039_v18, %v2867_v30  ;;  %v5001_v30 = vld [vmem:[%s6323_s7 + $0x298] sm:$0xff]   ;;  %v5002_v31 = vld [vmem:[%s6323_s7 + $0x250] sm:$0xff]   ;;  %4750 = vmatprep.subr.bf16.mxu0 %v5188_v7 }
 0xfab   : > { %v2873_v34 = vpop.xlane.xlu1 %2872 }
 0xfac   : > { %v2878_v36 = vsub.f32 %v2874_v33, %v2876_v32  ;;  %v2875_v38 = vmul.f32 0.015625, %v2873_v34  ;;  %v5003_v32 = vld [vmem:[%s6323_s7 + $0x2a0] sm:$0xff]   ;;  %v5004_v33 = vld [vmem:[%s6323_s7 + $0x258] sm:$0xff]   ;;  %v5005_v34 = vld [vmem:[%s6323_s7 + $0x2a8] sm:$0xff]  }
 0xfad   : > { %4751 = vmatpush3.bf16.msra.mxu0 %v5001_v30 }
 0xfae   : > { %v2880_v39 = vmax.f32 %v2878_v36, 0.0  ;;  %v2879_v40 = vsub.f32 %v2875_v38, %v2877_v35  ;;  %4752 = vmatprep.subr.bf16.mxu0 %v5188_v7  ;;  %v5006_v35 = vld [vmem:[%s6323_s7 + $0x260] sm:$0xff]   ;;  %v5007_v36 = vld [vmem:[%s6323_s7 + $0x2b0] sm:$0xff]   ;;  %v5008_v38 = vld [vmem:[%s6323_s7 + $0x268] sm:$0xff]  }
 0xfb0   : > { %v2884_v4 = vadd.f32 1e-05, %v2880_v39  ;;  %v2881_v41 = vmax.f32 %v2879_v40, 0.0  ;;  %v5009_v39 = vld [vmem:[%s6323_s7 + $0x2b8] sm:$0xff]   ;;  %v5010_v40 = vld [vmem:[%s6323_s7 + $0x270] sm:$0xff]  }
 0xfb1   : > { %4753 = vmatpush3.bf16.msra.mxu0 %v5003_v32 }
 0xfb2   : > { %5100 = vrsqrt.f32 %v2884_v4  ;;  %v2885_v42 = vadd.f32 1e-05, %v2881_v41  ;;  %4754 = vmatprep.subr.bf16.mxu0 %v5188_v7  ;;  %v5011_v4 = vld [vmem:[%s6323_s7 + $0x278] sm:$0xff]  }
 0xfb4   : > { %5102 = vrsqrt.f32 %v2885_v42 }
 0xfb5   : > { %4755 = vmatpush3.bf16.msra.mxu0 %v5005_v34 }
 0xfb6   : > { %4756 = vmatprep.subr.bf16.mxu0 %v5188_v7 }
 0xfb9   : > { %4757 = vmatpush3.bf16.msra.mxu0 %v5007_v36  ;;  %v5013_v36 = vld [vmem:[%s6323_s7 + $0x2c8] sm:$0xff]  }
 0xfba   : > { %4758 = vmatprep.subr.bf16.mxu0 %v5188_v7 }
 0xfbc   : > { %v5101_v44 = vpop.eup %5100 }
 0xfbd   : > { %v2888_v47 = vmul.f32 %v5101_v44, %v2882_v43  ;;  %4759 = vmatpush3.bf16.msra.mxu0 %v5009_v39  ;;  %v5015_v39 = vld [vmem:[%s6323_s7 + $0x2d8] sm:$0xff]  }
 0xfbe   : > { %v5103_v48 = vpop.eup %5102  ;;  %4784 = vmatprep.subr.bf16.mxu0 %v5188_v7 }
 0xfbf   : > { %v2896_v50 = vmul.f32 %v4095_v45, %v2888_v47  ;;  %v2889_v29 = vmul.f32 %v5103_v48, %v2883_v46 }
 0xfc1   : > { %v2904_v51 = vadd.f32 %v4096_v49, %v2896_v50  ;;  %v2897_v52 = vmul.f32 %v4095_v45, %v2889_v29 }
 0xfc3   : > { %v2905_v53 = vadd.f32 %v4096_v49, %v2897_v52  ;;  %v2908_v54 = vmul.f32 0.044715, %v2904_v51  ;;  %v2906_v10 = vmul.f32 0.5, %v2904_v51 }
 0xfc5   : > { %v2909_v55 = vmul.f32 0.044715, %v2905_v53  ;;  %v2910_v56 = vmul.f32 %v2908_v54, %v2904_v51  ;;  %v2907_v2 = vmul.f32 0.5, %v2905_v53 }
 0xfc7   : > { %v2911_v57 = vmul.f32 %v2909_v55, %v2905_v53  ;;  %v2912_v58 = vmul.f32 %v2910_v56, %v2904_v51 }
 0xfc9   : > { %v2913_v59 = vmul.f32 %v2911_v57, %v2905_v53  ;;  %v2914_v60 = vadd.f32 %v2912_v58, %v2904_v51  ;;  %v4125_v58 = vld [vmem:[%s6321_s5 + $0x3] ss:$0 sm:$0xff] }
 0xfcb   : > { %v2915_v61 = vadd.f32 %v2913_v59, %v2905_v53  ;;  %v2916_v62 = vmul.f32 0.7978846, %v2914_v60 }
 0xfcd   : > { %v2917_v63 = vmul.f32 0.7978846, %v2915_v61  ;;  %5104 = vtanh.f32 %v2916_v62  ;;  %v4126_v62 = vld [vmem:[%s6322_s6 + $0x3] ss:$0 sm:$0xff] }
 0xfcf   : > { %5106 = vtanh.f32 %v2917_v63 }
 0xfd7   : > { %v5105_v5 = vpop.eup %5104 }
 0xfd8   : > { %v2920_v6 = vadd.f32 1.0, %v5105_v5 }
 0xfd9   : > { %v5107_v9 = vpop.eup %5106 }
 0xfda   : > { %v2921_v3 = vadd.f32 1.0, %v5107_v9  ;;  %v2922_v11 = vmul.f32 %v2920_v6, %v2906_v10 }
 0xfdc   : > { %v2923_v12 = vmul.f32 %v2921_v3, %v2907_v2 }
 0xfde   : > { %v2924_v15 = vpack.c.bf16 %v2923_v12, %v2922_v11 }
 0xfe0   : > { %4741 = vmatmul.mubr.bf16.vlgmr.msra.gmra.mrb[28].mxu1 %v2924_v15 }
 0xfe1   : > { %4780 = vmatprep.mubr.msk.bf16.mxu1 %vm5189_vm1, %v5188_v7  ;;  %4765 = vmatpush3.bf16.msra.mxu1 %v4998_v26 }
 0xfe2   : > { %4766 = vmatprep.subr.bf16.mxu1 %v5188_v7 }
 0xfe5   : > { %4767 = vmatpush3.bf16.msra.mxu1 %v5000_v28  ;;  %v5012_v28 = vld [vmem:[%s6323_s7 + $0x2c0] sm:$0xff]  }
 0xfe6   : > { %4768 = vmatprep.subr.bf16.mxu1 %v5188_v7 }
 0xfe9   : > { %4769 = vmatpush3.bf16.msra.mxu1 %v5002_v31 }
 0xfea   : > { %4770 = vmatprep.subr.bf16.mxu1 %v5188_v7 }
 0xfed   : > { %4771 = vmatpush3.bf16.msra.mxu1 %v5004_v33 }
 0xfee   : > { %4772 = vmatprep.subr.bf16.mxu1 %v5188_v7 }
 0xff1   : > { %4773 = vmatpush3.bf16.msra.mxu1 %v5006_v35 }
 0xff2   : > { %4774 = vmatprep.subr.bf16.mxu1 %v5188_v7 }
 0xff5   : > { %4775 = vmatpush3.bf16.msra.mxu1 %v5008_v38  ;;  %v5014_v38 = vld [vmem:[%s6323_s7 + $0x2d0] sm:$0xff]  }
 0xff6   : > { %4776 = vmatprep.subr.bf16.mxu1 %v5188_v7 }
 0xff9   : > { %4777 = vmatpush3.bf16.msra.mxu1 %v5010_v40  ;;  %v5017_v40 = vld [vmem:[%s6323_s7 + $0x2e8] sm:$0xff]  }
 0xffa   : > { %4778 = vmatprep.subr.bf16.mxu1 %v5188_v7 }
 0xffd   : > { %4779 = vmatpush3.bf16.msra.mxu1 %v5011_v4  ;;  %v5018_v4 = vld [vmem:[%s6323_s7 + $0x2f0] sm:$0xff]  }
 0xffe   : > { %4804 = vmatprep.subr.bf16.mxu1 %v5188_v7 }
0x10b3   : > { %v3032_v0 = vpop.f32.mrb[28].mxu1 }
0x10b4   : > { %v6092_v8 = vadd.f32 %v4114_v17, %v3032_v0  ;;  %v4742_v13 = vpop.f32.mrb[29].mxu1 }
0x10b5   : > { %v3035_v16 = vpop.f32.mrb[30].mxu1 }
0x10b6   : > { %v6094_v19 = vadd.f32 %v4114_v17, %v3035_v16  ;;  %3043 = vadd.xlane.f32.xlu0 %v6092_v8  ;;  %v4743_v20 = vpop.f32.mrb[31].mxu1  ;;  %v3049_v22 = vmul.f32 %v6092_v8, %v6092_v8 }
0x10b8   : > { %3045 = vadd.xlane.f32.xlu1 %v6094_v19  ;;  %v3050_v23 = vmul.f32 %v6094_v19, %v6094_v19 }
0x10ba   : > { %3051 = vadd.xlane.f32.xlu0 %v3049_v22 }
0x10bc   : > { %3053 = vadd.xlane.f32.xlu1 %v3050_v23 }
0x1143   : > { %v3044_v41 = vpop.xlane.xlu0 %3043 }
0x1144   : > { %v3047_v42 = vmul.f32 0.03125, %v3044_v41 }
0x1145   : > { %v3046_v43 = vpop.xlane.xlu1 %3045 }
0x1146   : > { %v3048_v44 = vmul.f32 0.03125, %v3046_v43  ;;  %v3057_v46 = vmul.f32 %v3047_v42, %v3047_v42  ;;  %v3063_v56 = vsub.f32 %v6092_v8, %v3047_v42  ;;  %v5019_v43 = vld [vmem:[%s6323_s7 + $0x2f8] sm:$0xff]  }
0x1147   : > { %v3052_v45 = vpop.xlane.xlu0 %3051 }
0x1148   : > { %v3055_v47 = vmul.f32 0.03125, %v3052_v45  ;;  %v3058_v49 = vmul.f32 %v3048_v44, %v3048_v44  ;;  %v3064_v59 = vsub.f32 %v6094_v19, %v3048_v44 }
0x1149   : > { %v3054_v48 = vpop.xlane.xlu1 %3053 }
0x114a   : > { %v3059_v50 = vsub.f32 %v3055_v47, %v3057_v46  ;;  %v3056_v29 = vmul.f32 0.03125, %v3054_v48 }
0x114c   : > { %v3061_v51 = vmax.f32 %v3059_v50, 0.0  ;;  %v3060_v52 = vsub.f32 %v3056_v29, %v3058_v49 }
0x114e   : > { %v3065_v53 = vadd.f32 1e-05, %v3061_v51  ;;  %v3062_v54 = vmax.f32 %v3060_v52, 0.0 }
0x1150   : > { %5108 = vrsqrt.f32 %v3065_v53  ;;  %v3066_v55 = vadd.f32 1e-05, %v3062_v54 }
0x1152   : > { %5110 = vrsqrt.f32 %v3066_v55 }
0x115a   : > { %v5109_v57 = vpop.eup %5108 }
0x115b   : > { %v3069_v60 = vmul.f32 %v5109_v57, %v3063_v56 }
0x115c   : > { %v5111_v61 = vpop.eup %5110 }
0x115d   : > { %v3077_v63 = vmul.f32 %v4125_v58, %v3069_v60  ;;  %v3070_v5 = vmul.f32 %v5111_v61, %v3064_v59 }
0x115f   : > { %v3085_v6 = vadd.f32 %v4126_v62, %v3077_v63  ;;  %v3078_v9 = vmul.f32 %v4125_v58, %v3070_v5 }
0x1161   : > { %v3086_v10 = vadd.f32 %v4126_v62, %v3078_v9  ;;  %v3089_v2 = vmul.f32 0.044715, %v3085_v6  ;;  %v3087_v20 = vmul.f32 0.5, %v3085_v6  ;;  %v5021_v9 = vld [vmem:[%s6327_s11 + $0xc8] sm:$0xff]  }
0x1163   : > { %v3090_v3 = vmul.f32 0.044715, %v3086_v10  ;;  %v3091_v11 = vmul.f32 %v3089_v2, %v3085_v6  ;;  %v3088_v24 = vmul.f32 0.5, %v3086_v10  ;;  %v5023_v2 = vld [vmem:[%s6327_s11 + $0xd8] sm:$0xff]  }
0x1165   : > { %v3092_v12 = vmul.f32 %v3090_v3, %v3086_v10  ;;  %v3093_v15 = vmul.f32 %v3091_v11, %v3085_v6  ;;  %v5024_v3 = vld [vmem:[%s6327_s11 + $0xe0] sm:$0xff]   ;;  %v5025_v11 = vld [vmem:[%s6327_s11 + $0xe8] sm:$0xff]  }
0x1167   : > { %v3094_v17 = vmul.f32 %v3092_v12, %v3086_v10  ;;  %v3095_v0 = vadd.f32 %v3093_v15, %v3085_v6  ;;  %v5020_v6 = vld [vmem:[%s6327_s11 + $0xc0] sm:$0xff]   ;;  %v5026_v12 = vld [vmem:[%s6327_s11 + $0xf0] sm:$0xff]   ;;  %v5027_v15 = vld [vmem:[%s6327_s11 + $0xf8] sm:$0xff]  }
0x1169   : > { %v3096_v8 = vadd.f32 %v3094_v17, %v3086_v10  ;;  %v3097_v13 = vmul.f32 0.7978846, %v3095_v0  ;;  %v5022_v10 = vld [vmem:[%s6327_s11 + $0xd0] sm:$0xff]  }
0x116b   : > { %v3098_v16 = vmul.f32 0.7978846, %v3096_v8  ;;  %5112 = vtanh.f32 %v3097_v13 }
0x116d   : > { %5114 = vtanh.f32 %v3098_v16 }
0x1175   : > { %v5113_v19 = vpop.eup %5112 }
0x1176   : > { %v3101_v22 = vadd.f32 1.0, %v5113_v19 }
0x1177   : > { %v5115_v23 = vpop.eup %5114 }
0x1178   : > { %v3102_v25 = vadd.f32 1.0, %v5115_v23  ;;  %v3103_v26 = vmul.f32 %v3101_v22, %v3087_v20 }
0x117a   : > { %v3104_v27 = vmul.f32 %v3102_v25, %v3088_v24  ;;  %v3105_v30 = vrot.slane %v3103_v26, 7  ;;  %v3325_v42 = vrot.slane %v3103_v26, 1 }
0x117c   : > { %v3106_v31 = vrot.slane %v3104_v27, 7  ;;  %v3129_v32 = vpack.c.bf16 %v3104_v27, %v3103_v26  ;;  %v3326_v41 = vrot.slane %v3104_v27, 1 }
0x117e   : > { %4761 = vmatmul.mubr.bf16.vlgmr.msra.gmra.mrb[32].mxu0 %v3129_v32  ;;  %v3107_v33 = vsel %vm763_vm3, %v3105_v30, %v3106_v31  ;;  %v3108_v34 = vsel %vm763_vm3, %v3106_v31, %v3105_v30  ;;  %v3327_v44 = vsel %vm987_vm6, %v3325_v42, %v3326_v41  ;;  %v3328_v45 = vsel %vm987_vm6, %v3326_v41, %v3325_v42 }
0x117f   : > { %4785 = vmatpush3.bf16.msra.mxu0 %v5012_v28  ;;  %v4176_v35 = vpack.c.bf16 %v3107_v33, %v3108_v34  ;;  %4800 = vmatprep.mubr.msk.bf16.mxu0 %vm5189_vm1, %v5188_v7  ;;  %v4203_v46 = vpack.c.bf16 %v3328_v45, %v3327_v44  ;;  %v4209_v33 = vld [vmem:[%s6325_s9 + $0x3] ss:$0 sm:$0xff] }
0x1180   : > { %4786 = vmatprep.subr.bf16.mxu0 %v5188_v7 }
0x1181   : > { %4781 = vmatmul.mubr.msk.bf16.vlgmr.msra.gmra.mrb[32].mxu1 %vm5475_vm5, %v4176_v35 }
0x1182   : > { %4820 = vmatprep.mubr.msk.bf16.mxu1 %vm5189_vm1, %v5188_v7  ;;  %4805 = vmatpush3.bf16.msra.mxu1 %v5020_v6 }
0x1183   : > { %4787 = vmatpush3.bf16.msra.mxu0 %v5013_v36  ;;  %4806 = vmatprep.subr.bf16.mxu1 %v5188_v7 }
0x1184   : > { %4788 = vmatprep.subr.bf16.mxu0 %v5188_v7 }
0x1186   : > { %4807 = vmatpush3.bf16.msra.mxu1 %v5021_v9 }
0x1187   : > { %4789 = vmatpush3.bf16.msra.mxu0 %v5014_v38  ;;  %4808 = vmatprep.subr.bf16.mxu1 %v5188_v7  ;;  %v4210_v38 = vld [vmem:[%s6326_s10 + $0x3] ss:$0 sm:$0xff] }
0x1188   : > { %4790 = vmatprep.subr.bf16.mxu0 %v5188_v7 }
0x118a   : > { %4809 = vmatpush3.bf16.msra.mxu1 %v5022_v10 }
0x118b   : > { %4791 = vmatpush3.bf16.msra.mxu0 %v5015_v39  ;;  %4810 = vmatprep.subr.bf16.mxu1 %v5188_v7 }
0x118c   : > { %4792 = vmatprep.subr.bf16.mxu0 %v5188_v7 }
0x118e   : > { %4811 = vmatpush3.bf16.msra.mxu1 %v5023_v2 }
0x118f   : > { %4793 = vmatpush3.bf16.msra.mxu0 %v5016_v21  ;;  %4812 = vmatprep.subr.bf16.mxu1 %v5188_v7 }
0x1190   : > { %4794 = vmatprep.subr.bf16.mxu0 %v5188_v7 }
0x1192   : > { %4813 = vmatpush3.bf16.msra.mxu1 %v5024_v3 }
0x1193   : > { %4795 = vmatpush3.bf16.msra.mxu0 %v5017_v40  ;;  %4814 = vmatprep.subr.bf16.mxu1 %v5188_v7 }
0x1194   : > { %4796 = vmatprep.subr.bf16.mxu0 %v5188_v7 }
0x1196   : > { %4815 = vmatpush3.bf16.msra.mxu1 %v5025_v11 }
0x1197   : > { %4797 = vmatpush3.bf16.msra.mxu0 %v5018_v4  ;;  %4816 = vmatprep.subr.bf16.mxu1 %v5188_v7 }
0x1198   : > { %4798 = vmatprep.subr.bf16.mxu0 %v5188_v7 }
0x119a   : > { %4817 = vmatpush3.bf16.msra.mxu1 %v5026_v12 }
0x119b   : > { %4799 = vmatpush3.bf16.msra.mxu0 %v5019_v43  ;;  %4818 = vmatprep.subr.bf16.mxu1 %v5188_v7 }
0x119e   : > { %4801 = vmatmul.mubr.msk.bf16.vlgmr.msra.gmra.mrb[36].mxu0 %vm5523_vm8, %v4203_v46  ;;  %4819 = vmatpush3.bf16.msra.mxu1 %v5027_v15 }
0x1251   : > { %v3229_v47 = vpop.f32.mrb[32].mxu0 }
0x1252   : > { %v4762_v48 = vpop.f32.mrb[33].mxu0 }
0x1253   : > { %v3232_v49 = vpop.f32.mrb[34].mxu0 }
0x1254   : > { %v4763_v50 = vpop.f32.mrb[35].mxu0  ;;  %v3318_v29 = vpop.f32.mrb[32].mxu1 }
0x1255   : > { %v3319_v51 = vadd.f32 %v3318_v29, %v3229_v47  ;;  %v4782_v52 = vpop.f32.mrb[33].mxu1 }
0x1256   : > { %v3321_v53 = vpop.f32.mrb[34].mxu1 }
0x1257   : > { %v3322_v54 = vadd.f32 %v3321_v53, %v3232_v49  ;;  %v4783_v55 = vpop.f32.mrb[35].mxu1 }
0x1271   : > { %v3431_v56 = vpop.f32.mrb[36].mxu0 }
0x1272   : > { %v3438_v57 = vadd.f32 %v3431_v56, %v3319_v51  ;;  %v4802_v58 = vpop.f32.mrb[37].mxu0 }
0x1273   : > { %v3434_v59 = vpop.f32.mrb[38].mxu0 }
0x1274   : > { %v3448_v37 = vadd.f32 %v4206_v1, %v3438_v57  ;;  %v3439_v60 = vadd.f32 %v3434_v59, %v3322_v54  ;;  %v4803_v61 = vpop.f32.mrb[39].mxu0  ;;  %v4228_v59 = vld [vmem:[%s6328_s12 + $0x3] ss:$0 sm:$0xff] }
0x1276   : > { %v3449_v62 = vadd.f32 %v4206_v1, %v3439_v60  ;;  %3454 = vadd.xlane.f32.xlu0 %v3448_v37  ;;  %v3460_v63 = vmul.f32 %v3448_v37, %v3448_v37 }
0x1278   : > { %3456 = vadd.xlane.f32.xlu1 %v3449_v62  ;;  %v3461_v5 = vmul.f32 %v3449_v62, %v3449_v62 }
0x127a   : > { %3462 = vadd.xlane.f32.xlu0 %v3460_v63 }
0x127c   : > { %3464 = vadd.xlane.f32.xlu1 %v3461_v5 }
0x1303   : > { %v3455_v17 = vpop.xlane.xlu0 %3454 }
0x1304   : > { %v3458_v0 = vmul.f32 0.03125, %v3455_v17 }
0x1305   : > { %v3457_v8 = vpop.xlane.xlu1 %3456 }
0x1306   : > { %v3459_v13 = vmul.f32 0.03125, %v3457_v8  ;;  %v3468_v19 = vmul.f32 %v3458_v0, %v3458_v0  ;;  %v3474_v7 = vsub.f32 %v3448_v37, %v3458_v0 }
0x1307   : > { %v3463_v16 = vpop.xlane.xlu0 %3462 }
0x1308   : > { %v3466_v20 = vmul.f32 0.03125, %v3463_v16  ;;  %v3469_v23 = vmul.f32 %v3459_v13, %v3459_v13  ;;  %v3475_v34 = vsub.f32 %v3449_v62, %v3459_v13 }
0x1309   : > { %v3465_v22 = vpop.xlane.xlu1 %3464 }
0x130a   : > { %v3470_v24 = vsub.f32 %v3466_v20, %v3468_v19  ;;  %v3467_v25 = vmul.f32 0.03125, %v3465_v22 }
0x130c   : > { %v3472_v26 = vmax.f32 %v3470_v24, 0.0  ;;  %v3471_v27 = vsub.f32 %v3467_v25, %v3469_v23 }
0x130e   : > { %v3476_v28 = vadd.f32 1e-05, %v3472_v26  ;;  %v3473_v30 = vmax.f32 %v3471_v27, 0.0 }
0x1310   : > { %5116 = vrsqrt.f32 %v3476_v28  ;;  %v3477_v31 = vadd.f32 1e-05, %v3473_v30 }
0x1312   : > { %5118 = vrsqrt.f32 %v3477_v31 }
0x131a   : > { %v5117_v32 = vpop.eup %5116 }
0x131b   : > { %v3480_v35 = vmul.f32 %v5117_v32, %v3474_v7 }
0x131c   : > { %v5119_v36 = vpop.eup %5118 }
0x131d   : > { %v3488_v39 = vmul.f32 %v4209_v33, %v3480_v35  ;;  %v3481_v21 = vmul.f32 %v5119_v36, %v3475_v34 }
0x131f   : > { %v3496_v40 = vadd.f32 %v4210_v38, %v3488_v39  ;;  %v3489_v4 = vmul.f32 %v4209_v33, %v3481_v21 }
0x1321   : > { %v3497_v41 = vadd.f32 %v4210_v38, %v3489_v4  ;;  %v3500_v42 = vmul.f32 0.044715, %v3496_v40  ;;  %v3498_v54 = vmul.f32 0.5, %v3496_v40 }
0x1323   : > { %v3501_v43 = vmul.f32 0.044715, %v3497_v41  ;;  %v3502_v44 = vmul.f32 %v3500_v42, %v3496_v40  ;;  %v3499_v55 = vmul.f32 0.5, %v3497_v41 }
0x1325   : > { %v3503_v45 = vmul.f32 %v3501_v43, %v3497_v41  ;;  %v3504_v46 = vmul.f32 %v3502_v44, %v3496_v40 }
0x1327   : > { %v3505_v47 = vmul.f32 %v3503_v45, %v3497_v41  ;;  %v3506_v48 = vadd.f32 %v3504_v46, %v3496_v40 }
0x1329   : > { %v3507_v49 = vadd.f32 %v3505_v47, %v3497_v41  ;;  %v3508_v50 = vmul.f32 0.7978846, %v3506_v48 }
0x132b   : > { %v3509_v29 = vmul.f32 0.7978846, %v3507_v49  ;;  %5120 = vtanh.f32 %v3508_v50 }
0x132d   : > { %5122 = vtanh.f32 %v3509_v29 }
0x1335   : > { %v5121_v51 = vpop.eup %5120 }
0x1336   : > { %v3512_v52 = vadd.f32 1.0, %v5121_v51 }
0x1337   : > { %v5123_v53 = vpop.eup %5122 }
0x1338   : > { %v3513_v56 = vadd.f32 1.0, %v5123_v53  ;;  %v3514_v1 = vmul.f32 %v3512_v52, %v3498_v54 }
0x133a   : > { %v3515_v57 = vmul.f32 %v3513_v56, %v3499_v55 }
0x133c   : > { %v3516_v58 = vpack.c.bf16 %v3515_v57, %v3514_v1 }
0x133e   : > { %4821 = vmatmul.mubr.bf16.vlgmr.msra.gmra.mrb[36].mxu1 %v3516_v58 }
0x1411   : > { %v3624_v37 = vpop.f32.mrb[36].mxu1 }
0x1412   : > { %v3625_v60 = vadd.f32 %v4228_v59, %v3624_v37  ;;  %v4822_v61 = vpop.f32.mrb[37].mxu1 }
0x1413   : > { %v3627_v62 = vpop.f32.mrb[38].mxu1 }
0x1414   : > { %v3631_v63 = vadd.f32 %v3625_v60, %v6036_v14  ;;  %v3628_v5 = vadd.f32 %v4228_v59, %v3627_v62  ;;  %v4823_v6 = vpop.f32.mrb[39].mxu1 }
0x1416   : > { %3633 = vst [vmem:[%s433_s15] sm:$0xff] %v3631_v63  ;;  %v3632_v9 = vadd.f32 %v3628_v5, %v6039_v18 }
0x1418   : > { %3634 = vst [vmem:[%s433_s15 + $0x8] sm:$0xff] %v3632_v9 }
0x1419   : > { %5137 = shalt.err (!%p5134_p3)
}
0x141a   : > { %s5138_s22 = scalar_lea.hbm %s6272_s24, 256  ;;  %s5142_s21 = scalar_lea.hbm %s6329_s13, 512 }
0x141b   : > { %p5139_p4 = scmp.ne.s32.totalorder %s6272_s24, %s5138_s22  ;;  %p5143_p9 = scmp.lt.u32.totalorder %s6272_s24, %s6329_s13 }
0x141c   : > { %p5144_p10 = scmp.lt.u32.totalorder %s5142_s21, %s5138_s22  ;;  %p5146_p12 = scmp.lt.u32.totalorder %s5138_s22, %s6272_s24 }
0x141d   : > { %p5140_p7 = pnand %p5139_p4, %p5302_p5 }
0x141e   : > { %p5145_p11 = por %p5144_p10, %p5143_p9 }
0x141f   : > { %p5141_p8 = pneg %p5140_p7 }
0x1420   : > { %p5147_p13 = por %p5146_p12, %p5145_p11 }
0x1422   : > { %p5148_p0 = pnand %p5147_p13, %p5141_p8 }
0x1424   : > { %5151 = shalt.err (!%p5148_p0)
}
0x1425   : > { %s5192_s23 = smov 128   ;;  %s5193_s20 = smov 8  }
0x1426   : > { %4824 = dma.vmem_to_hbm [thread:$0]  (%p5302_p5), %s6267_s16, 256, %s6272_s24, %s6275_s29, %s5192_s23, %s5192_s23, %s5193_s20  }
0x1427 PF: > { %p4830_p1 = scmp.ge.s32.totalorder %s5186_s28, 2  ;;  %s3664_s15 = sand.u32 1, %s5174_s25  }
0x1428   : > { %s3665_s22 = scalar_lea.sflag [#allocation3], %s3664_s15 }
0x1429   : > { %p4827_p2 = pnand %p4830_p1, %p5306_p6 }
0x142b   : > { %5169 = dma.done.wait (!%p4827_p2), %s3665_s22, 256  }
0x142c   : > { %5171 = vsyncadd (!%p4827_p2), %s3665_s22, 4294967040  ;;  %p23_p3 = scmp.ge.s32.totalorder %s5289_s14, 4   ;;  %s6340_s25 = smov %s5178_s26 }
0x142d   : > { %s6341_s26 = smov %s5182_s27  ;;  %s6342_s27 = smov %s5300_s17 }
0x142e   : > { %s6343_s28 = smov %s5289_s14  ;;  %25 = sbr.rel (!%p23_p3) target bundleno = 6 (0x6), region = 151 }
0x1435   :  { %3670 = vsyncpa [#allocation3], 1 }
0x1436   :  { %3672 = vsyncpa [#allocation3 + $0x1], 1 }

</bundles_post_ra>
